<compile_context>
chip_gen: v5e
topology: v5e:2x2
jax: 0.10.0
libtpu: 0.0.40
codegen_flags: <defaults>
</compile_context>

<pallas_src>
import functools

import jax
import jax.numpy as jnp
from jax.experimental import pallas as pl
from jax.experimental.pallas import tpu as pltpu

_MATMUL_DTYPE = jnp.bfloat16      # MXU operand dtype (f32 accumulation)
_RESIDUAL_DTYPE = jnp.float32     # residual stream; bf16 halves writeback on v5e
_TM_MAX = 512                     # row-tile cap (multiple of 8)
_TQ_MAX = 256                     # q-row tile inside the attention kernel


# ------------------------------ helpers ------------------------------------ #
@functools.lru_cache(maxsize=None)
def _vmem_limit_bytes():
    """~75% of physical VMEM: ~48 MiB on v7x (64 MiB/TC), ~96 MiB on v5e/v6e."""
    cap = 64 * 1024 * 1024
    try:
        info = pltpu.get_tpu_info()
        cap = getattr(info, "vmem_capacity_bytes", cap) or cap
    except Exception:
        pass
    return int(min((cap * 3) // 4, 100 * 1024 * 1024))


def _pick_tm(m):
    """Largest row tile <= _TM_MAX; if all of M fits, still split in two so
    both v7x TensorCores get work from the 'parallel' grid axis."""
    tm = min(m, _TM_MAX)
    if tm == m and m > 8:
        half = (((m + 1) // 2) + 7) // 8 * 8
        if half < m:
            tm = half
    return tm


def _cost_estimate(m, n, k, x_bytes, w_bytes, o_bytes, transcendentals=0):
    return pl.CostEstimate(
        flops=2 * m * n * k,
        transcendentals=transcendentals,
        bytes_accessed=m * k * x_bytes + k * n * w_bytes + m * n * o_bytes)


def _erf(z):
    # Abramowitz & Stegun 7.1.26 rational approximation, |err| <= 1.5e-7
    # (~f32 eps); built from exp/mul/select which lower cleanly in Mosaic.
    # TODO(synk): on v5e the GELU epilogue could be VALU-bound; a tanh-based
    # GELU (EUP) is an option if a bundle dump shows no VALU slack.
    a1, a2, a3, a4, a5 = (0.254829592, -0.284496736, 1.421413741,
                          -1.453152027, 1.061405429)
    p = 0.3275911
    az = jnp.abs(z)
    t = 1.0 / (1.0 + p * az)
    poly = ((((a5 * t + a4) * t + a3) * t + a2) * t + a1) * t
    e = 1.0 - poly * jnp.exp(-az * az)
    return jnp.where(z < 0.0, -e, e)


def _gelu_exact(x):
    return 0.5 * x * (1.0 + _erf(x * 0.7071067811865476))


# ----------------------------- Pallas kernels ------------------------------ #
def _ln_linear_kernel(x_ref, g_ref, beta_ref, w_ref, bias_ref, o_ref, *, eps, gelu):
    # Fused PreNorm projection:  y = LayerNorm(x) @ W + b   [+ GELU epilogue]
    x = x_ref[...].astype(jnp.float32)
    mean = jnp.mean(x, axis=-1, keepdims=True)
    cen = x - mean
    var = jnp.mean(cen * cen, axis=-1, keepdims=True)        # biased, like torch LN
    h = cen * jax.lax.rsqrt(var + eps) * g_ref[...] + beta_ref[...]
    y = jnp.dot(h.astype(_MATMUL_DTYPE), w_ref[...].astype(_MATMUL_DTYPE),
                preferred_element_type=jnp.float32)
    y = y + bias_ref[...]
    if gelu:
        y = _gelu_exact(y)
    o_ref[...] = y.astype(o_ref.dtype)


def _linear_res_kernel(x_ref, w_ref, bias_ref, res_ref, o_ref):
    # Fused projection + residual:  y = x @ W + b + res
    y = jnp.dot(x_ref[...].astype(_MATMUL_DTYPE), w_ref[...].astype(_MATMUL_DTYPE),
                preferred_element_type=jnp.float32)
    o_ref[...] = (y + bias_ref[...] + res_ref[...].astype(jnp.float32)
                  ).astype(o_ref.dtype)


def _attention_kernel(q_ref, k_ref, v_ref, wout_ref, bout_ref, res_ref, o_ref,
                      *, scale, dim_head, h_blk, tq):
    # Blocks: q/k/v (1, seq, h_blk*dim_head); wout (h_blk*dim_head, dim);
    # res / o (1, seq, dim).  Grid = (batch, head_groups); output block is
    # resident across the head-group axis and accumulates the out-projection.
    gi = pl.program_id(1)

    @pl.when(gi == 0)
    def _():
        o_ref[...] = (res_ref[...].astype(jnp.float32)
                      + bout_ref[...].astype(jnp.float32)).astype(o_ref.dtype)

    seq = q_ref.shape[1]
    dim_out = o_ref.shape[2]
    for qs in range(0, seq, tq):                   # q-row tiling: (tq, seq) scores
        qn = min(tq, seq - qs)
        acc = jnp.zeros((qn, dim_out), jnp.float32)
        for h in range(h_blk):                     # short static loop over heads
            sl = slice(h * dim_head, (h + 1) * dim_head)
            k = k_ref[0, :, sl].astype(_MATMUL_DTYPE)          # (seq, dh)
            v = v_ref[0, :, sl].astype(_MATMUL_DTYPE)
            w_h = wout_ref[sl, :].astype(_MATMUL_DTYPE)        # (dh, dim)
            # Fold the softmax scale into q (tq*dh work instead of tq*seq).
            q = (q_ref[0, qs:qs + qn, sl].astype(jnp.float32) * scale
                 ).astype(_MATMUL_DTYPE)                       # (qn, dh)
            s = jax.lax.dot_general(q, k, (((1,), (1,)), ((), ())),
                                    preferred_element_type=jnp.float32)  # (qn, seq)
            m = jnp.max(s, axis=-1, keepdims=True)
            # TODO(synk): on v6e/v7x exp((s-m).astype(bf16)) would hit the
            # 2x-rate bf16 EUP path; kept f32 here for portability to v5e.
            p = jnp.exp(s - m)
            denom = jnp.sum(p, axis=-1, keepdims=True)
            o_h = jnp.dot(p.astype(_MATMUL_DTYPE), v,
                          preferred_element_type=jnp.float32) / denom    # exact norm
            # Fused attention out-projection for this head slice.
            acc = acc + jnp.dot(o_h.astype(_MATMUL_DTYPE), w_h,
                                preferred_element_type=jnp.float32)
        cur = o_ref[0, qs:qs + qn, :].astype(jnp.float32)
        o_ref[0, qs:qs + qn, :] = (cur + acc).astype(o_ref.dtype)


# ------------------------------ kernel wrappers ----------------------------- #
def ln_linear(x2d, gamma, beta, w, bias, *, gelu, out_dtype, eps=1e-5):
    """(M, K) --LN over K--> @ W(K, N) + bias [-> GELU] -> (M, N)."""
    M, K = x2d.shape
    N = w.shape[1]
    tm = _pick_tm(M)
    grid = (pl.cdiv(M, tm),)
    return pl.pallas_call(
        functools.partial(_ln_linear_kernel, eps=eps, gelu=gelu),
        grid=grid,
        out_shape=jax.ShapeDtypeStruct((M, N), out_dtype),
        in_specs=[
            pl.BlockSpec((tm, K), lambda i: (i, 0)),
            pl.BlockSpec((1, K), lambda i: (0, 0)),
            pl.BlockSpec((1, K), lambda i: (0, 0)),
            pl.BlockSpec((K, N), lambda i: (0, 0)),     # grid-resident weight
            pl.BlockSpec((1, N), lambda i: (0, 0)),
        ],
        out_specs=pl.BlockSpec((tm, N), lambda i: (i, 0)),   # lane-dense store
        compiler_params=pltpu.CompilerParams(
            dimension_semantics=("parallel",),
            vmem_limit_bytes=_vmem_limit_bytes()),
        cost_estimate=_cost_estimate(
            M, N, K, x2d.dtype.itemsize, w.dtype.itemsize,
            jnp.dtype(out_dtype).itemsize,
            transcendentals=M * N if gelu else 0),
    )(x2d, gamma.reshape(1, K), beta.reshape(1, K), w, bias.reshape(1, N))


def linear_res(x2d, w, bias, res, *, out_dtype=_RESIDUAL_DTYPE):
    """(M, K) @ W(K, N) + bias + res(M, N) -> (M, N)."""
    M, K = x2d.shape
    N = w.shape[1]
    tm = _pick_tm(M)
    grid = (pl.cdiv(M, tm),)
    return pl.pallas_call(
        _linear_res_kernel,
        grid=grid,
        out_shape=jax.ShapeDtypeStruct((M, N), out_dtype),
        in_specs=[
            pl.BlockSpec((tm, K), lambda i: (i, 0)),
            pl.BlockSpec((K, N), lambda i: (0, 0)),     # grid-resident weight
            pl.BlockSpec((1, N), lambda i: (0, 0)),
            pl.BlockSpec((tm, N), lambda i: (i, 0)),
        ],
        out_specs=pl.BlockSpec((tm, N), lambda i: (i, 0)),
        compiler_params=pltpu.CompilerParams(
            dimension_semantics=("parallel",),
            vmem_limit_bytes=_vmem_limit_bytes()),
        cost_estimate=_cost_estimate(
            M, N, K, x2d.dtype.itemsize, w.dtype.itemsize,
            jnp.dtype(out_dtype).itemsize),
    )(x2d, w, bias.reshape(1, N), res)


def attention_block(qkv, w_out, b_out, res, *, heads, dim_head, scale, out_dtype):
    """Multi-head attention with fused output projection + bias + residual.

    qkv: (b, seq, 3*heads*dim_head) laid out as [q | k | v], each 'b n (h d)'.
    Returns (b, seq, dim) = softmax(q k^T) v @ W_out + b_out + res.
    """
    b, seq, last = qkv.shape
    inner = heads * dim_head
    assert last == 3 * inner
    dim = w_out.shape[1]

    # Pack heads into the LARGEST lane-aligned group whose width <= 512.
    cands = [hb for hb in range(1, heads + 1)
             if heads % hb == 0 and (hb * dim_head) % 128 == 0]
    if cands:
        good = [hb for hb in cands if hb * dim_head <= 512]
        h_blk = max(good) if good else min(cands)
        width = h_blk * dim_head
        n_grp = heads // h_blk
        in_specs = [   # slice q / k / v straight out of qkv via column block index
            pl.BlockSpec((1, seq, width), lambda bi, gi: (bi, 0, gi)),
            pl.BlockSpec((1, seq, width), lambda bi, gi: (bi, 0, n_grp + gi)),
            pl.BlockSpec((1, seq, width), lambda bi, gi: (bi, 0, 2 * n_grp + gi)),
            pl.BlockSpec((width, dim), lambda bi, gi: (gi, 0)),
            pl.BlockSpec((1, dim), lambda bi, gi: (0, 0)),
            pl.BlockSpec((1, seq, dim), lambda bi, gi: (bi, 0, 0)),
        ]
        args = (qkv, qkv, qkv)
    else:
        # Fallback for non-lane-aligned inner dims: split in the wrapper
        # (extra copies) and process all heads of a batch element per step.
        h_blk, n_grp = heads, 1
        q, k, v = jnp.split(qkv, 3, axis=-1)
        spec = pl.BlockSpec((1, seq, inner), lambda bi, gi: (bi, 0, 0))
        in_specs = [spec, spec, spec,
                    pl.BlockSpec((inner, dim), lambda bi, gi: (0, 0)),
                    pl.BlockSpec((1, dim), lambda bi, gi: (0, 0)),
                    pl.BlockSpec((1, seq, dim), lambda bi, gi: (bi, 0, 0))]
        args = (q, k, v)

    tq = min(seq, _TQ_MAX)
    grid = (b, n_grp)
    flops = 4 * b * heads * seq * seq * dim_head + 2 * b * seq * inner * dim
    bytes_acc = (3 * b * seq * inner * qkv.dtype.itemsize
                 + inner * dim * w_out.dtype.itemsize
                 + b * seq * dim * (res.dtype.itemsize
                                    + jnp.dtype(out_dtype).itemsize))
    return pl.pallas_call(
        functools.partial(_attention_kernel, scale=scale, dim_head=dim_head,
                          h_blk=h_blk, tq=tq),
        grid=grid,
        out_shape=jax.ShapeDtypeStruct((b, seq, dim), out_dtype),
        in_specs=in_specs,
        out_specs=pl.BlockSpec((1, seq, dim), lambda bi, gi: (bi, 0, 0)),
        compiler_params=pltpu.CompilerParams(
            dimension_semantics=("parallel", "arbitrary"),
            vmem_limit_bytes=_vmem_limit_bytes()),
        cost_estimate=pl.CostEstimate(
            flops=flops,
            transcendentals=b * heads * seq * seq,
            bytes_accessed=bytes_acc),
    )(*args, w_out, b_out.reshape(1, dim), res)


# ------------------------------ parameters --------------------------------- #
def init_tfc_params(key, num_classes, dim, num_patches, depth, heads, dim_head,
                    mlp_dim, matmul_dtype=_MATMUL_DTYPE):
    inner = heads * dim_head
    keys = jax.random.split(key, 3 + depth)

    def dense(k, fan_in, fan_out, bias=True):
        kw, kb = jax.random.split(k)
        w = (jax.random.normal(kw, (fan_in, fan_out), jnp.float32)
             / jnp.sqrt(fan_in)).astype(matmul_dtype)       # store MXU weights bf16
        b = (jax.random.normal(kb, (fan_out,), jnp.float32) * 0.02
             if bias else jnp.zeros((fan_out,), jnp.float32))
        return w, b

    params = {
        "cls_token": jax.random.normal(keys[0], (1, 1, dim), jnp.float32),
        "pos_embedding": jax.random.normal(keys[1], (1, num_patches + 1, dim),
                                           jnp.float32),
        "layers": [],
    }
    for i in range(depth):
        k = jax.random.split(keys[3 + i], 4)
        w_qkv, _ = dense(k[0], dim, inner * 3, bias=False)   # to_qkv has no bias
        w_out, b_out = dense(k[1], inner, dim)
        w_ff1, b_ff1 = dense(k[2], dim, mlp_dim)
        w_ff2, b_ff2 = dense(k[3], mlp_dim, dim)
        params["layers"].append({
            "ln1_g": jnp.ones((dim,), jnp.float32),
            "ln1_b": jnp.zeros((dim,), jnp.float32),
            "w_qkv": w_qkv, "b_qkv": jnp.zeros((inner * 3,), jnp.float32),
            "w_out": w_out, "b_out": b_out,
            "ln2_g": jnp.ones((dim,), jnp.float32),
            "ln2_b": jnp.zeros((dim,), jnp.float32),
            "w_ff1": w_ff1, "b_ff1": b_ff1,
            "w_ff2": w_ff2, "b_ff2": b_ff2,
        })
    w_head, b_head = dense(keys[2], dim, num_classes)
    params["head_ln_g"] = jnp.ones((dim,), jnp.float32)
    params["head_ln_b"] = jnp.zeros((dim,), jnp.float32)
    params["w_head"] = w_head
    params["b_head"] = b_head
    return params


# -------------------------------- forward ---------------------------------- #
def tfc_forward(params, x, *, num_patches, heads, dim_head):
    """x: (b, n, dim) float32 -> logits (b, num_classes). Inference mode."""
    x = x[:, :num_patches]                       # x = x[:, :self.num_patches]
    b, n, dim = x.shape
    inner = heads * dim_head
    scale = dim_head ** -0.5

    cls = jnp.broadcast_to(params["cls_token"], (b, 1, dim))
    x = jnp.concatenate([cls, x], axis=1)        # (b, n+1, dim)
    x = x + params["pos_embedding"][:, :n + 1]
    # emb_dropout / per-layer dropouts: identity at inference.
    seq = n + 1
    M = b * seq
    x2 = x.reshape(M, dim).astype(_RESIDUAL_DTYPE)   # residual stream

    for lp in params["layers"]:
        # PreNorm multi-head attention; LN fused into the qkv projection,
        # out-projection + bias + residual fused into the attention kernel.
        qkv = ln_linear(x2, lp["ln1_g"], lp["ln1_b"], lp["w_qkv"], lp["b_qkv"],
                        gelu=False, out_dtype=_MATMUL_DTYPE)     # (M, 3*inner) bf16
        x2 = attention_block(qkv.reshape(b, seq, 3 * inner),
                             lp["w_out"], lp["b_out"],
                             x2.reshape(b, seq, dim),
                             heads=heads, dim_head=dim_head, scale=scale,
                             out_dtype=_RESIDUAL_DTYPE).reshape(M, dim)

        # PreNorm feed-forward + residual (LN + exact-erf GELU fused into FF1,
        # residual fused into FF2).
        h = ln_linear(x2, lp["ln2_g"], lp["ln2_b"], lp["w_ff1"], lp["b_ff1"],
                      gelu=True, out_dtype=_MATMUL_DTYPE)        # (M, mlp_dim) bf16
        x2 = linear_res(h, lp["w_ff2"], lp["b_ff2"], x2, out_dtype=_RESIDUAL_DTYPE)

    x_cls = x2.reshape(b, seq, dim)[:, 0]                        # pool == 'cls'
    return ln_linear(x_cls, params["head_ln_g"], params["head_ln_b"],
                     params["w_head"], params["b_head"],
                     gelu=False, out_dtype=jnp.float32)          # mlp_head


# ---------------------------------- main ------------------------------------ #
if __name__ == "__main__":
    key = jax.random.PRNGKey(0)
    kp, kx = jax.random.split(key)

    # Module defaults are dim=513, num_patches=498, depth=6, heads=16,
    # dim_head=64, mlp_dim=2048.  Scaled down here to small lane-friendly demo
    # shapes (the same code paths are exercised at the real sizes).
    num_classes = 3
    dim = 128
    num_patches = 16
    depth = 2
    heads = 4
    dim_head = 32
    mlp_dim = 256

    params = init_tfc_params(kp, num_classes, dim, num_patches, depth, heads,
                             dim_head, mlp_dim)
    x = jax.random.normal(kx, (2, 8, dim), jnp.float32)          # (batch, seq, dim)

    fwd = jax.jit(functools.partial(tfc_forward, num_patches=num_patches,
                                    heads=heads, dim_head=dim_head))
    out = fwd(params, x)
    jax.block_until_ready(out)
    assert out.shape == (2, num_classes)
    print("KERNEL_OK")
</pallas_src>

<mosaic_0001>
module attributes {stable_mosaic.version = 11 : i64} {
  func.func @_ln_linear_kernel(%arg0: i32, %arg1: memref<16x128xf32, #tpu.memory_space<vmem>>, %arg2: memref<1x128xf32, #tpu.memory_space<vmem>>, %arg3: memref<1x128xf32, #tpu.memory_space<vmem>>, %arg4: memref<128x384xbf16, #tpu.memory_space<vmem>>, %arg5: memref<1x384xf32, #tpu.memory_space<vmem>>, %arg6: memref<16x384xbf16, #tpu.memory_space<vmem>>) attributes {dimension_semantics = [#tpu.dimension_semantics<parallel>], iteration_bounds = array<i64: 2>, scalar_prefetch = 0 : i64, scratch_operands = 0 : i64, tpu.core_type = #tpu.core_type<tc>, window_params = [{transform_indices = @transform_0, window_bounds = array<i64: 16, 128>}, {pipeline_mode = #tpu.pipeline_mode<synchronous>, transform_indices = @transform_1, window_bounds = array<i64: 1, 128>}, {pipeline_mode = #tpu.pipeline_mode<synchronous>, transform_indices = @transform_2, window_bounds = array<i64: 1, 128>}, {pipeline_mode = #tpu.pipeline_mode<synchronous>, transform_indices = @transform_3, window_bounds = array<i64: 128, 384>}, {pipeline_mode = #tpu.pipeline_mode<synchronous>, transform_indices = @transform_4, window_bounds = array<i64: 1, 384>}, {transform_indices = @transform_5, window_bounds = array<i64: 16, 384>}]} {
    %c0 = arith.constant 0 : index
    %c0_0 = arith.constant 0 : index
    %0 = vector.load %arg1[%c0, %c0_0] : memref<16x128xf32, #tpu.memory_space<vmem>>, vector<16x128xf32>
    %cst = arith.constant dense<0.000000e+00> : vector<16xf32>
    %1 = vector.multi_reduction <add>, %0, %cst [1] : vector<16x128xf32> to vector<16xf32>
    %2 = vector.shape_cast %1 : vector<16xf32> to vector<16x1xf32>
    %cst_1 = arith.constant 1.280000e+02 : f32
    %3 = vector.broadcast %cst_1 : f32 to vector<16x1xf32>
    %4 = arith.divf %2, %3 : vector<16x1xf32>
    %5 = vector.broadcast %4 : vector<16x1xf32> to vector<16x128xf32>
    %6 = arith.subf %0, %5 : vector<16x128xf32>
    %7 = arith.mulf %6, %6 : vector<16x128xf32>
    %cst_2 = arith.constant dense<0.000000e+00> : vector<16xf32>
    %8 = vector.multi_reduction <add>, %7, %cst_2 [1] : vector<16x128xf32> to vector<16xf32>
    %9 = vector.shape_cast %8 : vector<16xf32> to vector<16x1xf32>
    %cst_3 = arith.constant 1.280000e+02 : f32
    %10 = vector.broadcast %cst_3 : f32 to vector<16x1xf32>
    %11 = arith.divf %9, %10 : vector<16x1xf32>
    %cst_4 = arith.constant 9.99999974E-6 : f32
    %12 = vector.broadcast %cst_4 : f32 to vector<16x1xf32>
    %13 = arith.addf %11, %12 : vector<16x1xf32>
    %14 = math.rsqrt %13 : vector<16x1xf32>
    %15 = vector.broadcast %14 : vector<16x1xf32> to vector<16x128xf32>
    %16 = arith.mulf %6, %15 : vector<16x128xf32>
    %c0_5 = arith.constant 0 : index
    %c0_6 = arith.constant 0 : index
    %17 = vector.load %arg2[%c0_5, %c0_6] : memref<1x128xf32, #tpu.memory_space<vmem>>, vector<1x128xf32>
    %18 = vector.broadcast %17 : vector<1x128xf32> to vector<16x128xf32>
    %19 = arith.mulf %16, %18 : vector<16x128xf32>
    %c0_7 = arith.constant 0 : index
    %c0_8 = arith.constant 0 : index
    %20 = vector.load %arg3[%c0_7, %c0_8] : memref<1x128xf32, #tpu.memory_space<vmem>>, vector<1x128xf32>
    %21 = vector.broadcast %20 : vector<1x128xf32> to vector<16x128xf32>
    %22 = arith.addf %19, %21 : vector<16x128xf32>
    %23 = arith.truncf %22 : vector<16x128xf32> to vector<16x128xbf16>
    %c0_9 = arith.constant 0 : index
    %c0_10 = arith.constant 0 : index
    %24 = vector.load %arg4[%c0_9, %c0_10] : memref<128x384xbf16, #tpu.memory_space<vmem>>, vector<128x384xbf16>
    %cst_11 = arith.constant dense<0.000000e+00> : vector<16x384xf32>
    %25 = tpu.matmul %23, %24, %cst_11 {dimension_numbers = #tpu.dot_dimension_numbers<[1], [0], [0], [1], [0, 0, 1, 1], [], []>} : vector<16x128xbf16>, vector<128x384xbf16>, vector<16x384xf32> -> vector<16x384xf32>
    %c0_12 = arith.constant 0 : index
    %c0_13 = arith.constant 0 : index
    %26 = vector.load %arg5[%c0_12, %c0_13] : memref<1x384xf32, #tpu.memory_space<vmem>>, vector<1x384xf32>
    %27 = vector.broadcast %26 : vector<1x384xf32> to vector<16x384xf32>
    %28 = arith.addf %25, %27 : vector<16x384xf32>
    %29 = arith.truncf %28 : vector<16x384xf32> to vector<16x384xbf16>
    %c0_14 = arith.constant 0 : index
    %c0_15 = arith.constant 0 : index
    %30 = vector.load %arg6[%c0_14, %c0_15] : memref<16x384xbf16, #tpu.memory_space<vmem>>, vector<16x384xbf16>
    tpu.vector_store %arg6[%c0_14, %c0_15], %29 {strides = array<i32>} : memref<16x384xbf16, #tpu.memory_space<vmem>>, vector<16x384xbf16>,
    return
  }
  func.func @transform_0(%arg0: i32) -> (i32, i32) {
    %c0_i32 = arith.constant 0 : i32
    %c0_i32_0 = arith.constant 0 : i32
    return %arg0, %c0_i32 : i32, i32
  }
  func.func @transform_1(%arg0: i32) -> (i32, i32) {
    %c0_i32 = arith.constant 0 : i32
    %c0_i32_0 = arith.constant 0 : i32
    %c0_i32_1 = arith.constant 0 : i32
    return %c0_i32, %c0_i32_0 : i32, i32
  }
  func.func @transform_2(%arg0: i32) -> (i32, i32) {
    %c0_i32 = arith.constant 0 : i32
    %c0_i32_0 = arith.constant 0 : i32
    %c0_i32_1 = arith.constant 0 : i32
    return %c0_i32, %c0_i32_0 : i32, i32
  }
  func.func @transform_3(%arg0: i32) -> (i32, i32) {
    %c0_i32 = arith.constant 0 : i32
    %c0_i32_0 = arith.constant 0 : i32
    %c0_i32_1 = arith.constant 0 : i32
    return %c0_i32, %c0_i32_0 : i32, i32
  }
  func.func @transform_4(%arg0: i32) -> (i32, i32) {
    %c0_i32 = arith.constant 0 : i32
    %c0_i32_0 = arith.constant 0 : i32
    %c0_i32_1 = arith.constant 0 : i32
    return %c0_i32, %c0_i32_0 : i32, i32
  }
  func.func @transform_5(%arg0: i32) -> (i32, i32) {
    %c0_i32 = arith.constant 0 : i32
    %c0_i32_0 = arith.constant 0 : i32
    return %arg0, %c0_i32 : i32, i32
  }
}

module attributes {stable_mosaic.version = 11 : i64} {
  func.func @_attention_kernel(%arg0: i32, %arg1: i32, %arg2: memref<1x9x128xbf16, #tpu.memory_space<vmem>>, %arg3: memref<1x9x128xbf16, #tpu.memory_space<vmem>>, %arg4: memref<1x9x128xbf16, #tpu.memory_space<vmem>>, %arg5: memref<128x128xbf16, #tpu.memory_space<vmem>>, %arg6: memref<1x128xf32, #tpu.memory_space<vmem>>, %arg7: memref<1x9x128xf32, #tpu.memory_space<vmem>>, %arg8: memref<1x9x128xf32, #tpu.memory_space<vmem>>) attributes {dimension_semantics = [#tpu.dimension_semantics<parallel>, #tpu.dimension_semantics<arbitrary>], iteration_bounds = array<i64: 2, 1>, scalar_prefetch = 0 : i64, scratch_operands = 0 : i64, tpu.core_type = #tpu.core_type<tc>, window_params = [{transform_indices = @transform_0, window_bounds = array<i64: 1, 9, 128>}, {transform_indices = @transform_1, window_bounds = array<i64: 1, 9, 128>}, {transform_indices = @transform_2, window_bounds = array<i64: 1, 9, 128>}, {transform_indices = @transform_3, window_bounds = array<i64: 128, 128>}, {pipeline_mode = #tpu.pipeline_mode<synchronous>, transform_indices = @transform_4, window_bounds = array<i64: 1, 128>}, {transform_indices = @transform_5, window_bounds = array<i64: 1, 9, 128>}, {transform_indices = @transform_6, window_bounds = array<i64: 1, 9, 128>}]} {
    %c0_i32 = arith.constant 0 : i32
    %0 = arith.cmpi eq, %arg1, %c0_i32 : i32
    %1 = arith.extui %0 : i1 to i32
    %c0_i32_0 = arith.constant 0 : i32
    %2 = arith.cmpi ne, %1, %c0_i32_0 : i32
    scf.if %2 {
      %c0_71 = arith.constant 0 : index
      %c0_72 = arith.constant 0 : index
      %c0_73 = arith.constant 0 : index
      %114 = vector.load %arg7[%c0_71, %c0_72, %c0_73] : memref<1x9x128xf32, #tpu.memory_space<vmem>>, vector<1x9x128xf32>
      %c0_74 = arith.constant 0 : index
      %c0_75 = arith.constant 0 : index
      %115 = vector.load %arg6[%c0_74, %c0_75] : memref<1x128xf32, #tpu.memory_space<vmem>>, vector<1x128xf32>
      %116 = vector.shape_cast %115 : vector<1x128xf32> to vector<1x1x128xf32>
      %117 = vector.broadcast %116 : vector<1x1x128xf32> to vector<1x9x128xf32>
      %118 = arith.addf %114, %117 : vector<1x9x128xf32>
      %c0_76 = arith.constant 0 : index
      %c0_77 = arith.constant 0 : index
      %c0_78 = arith.constant 0 : index
      %119 = vector.load %arg8[%c0_76, %c0_77, %c0_78] : memref<1x9x128xf32, #tpu.memory_space<vmem>>, vector<1x9x128xf32>
      tpu.vector_store %arg8[%c0_76, %c0_77, %c0_78], %118 {strides = array<i32>} : memref<1x9x128xf32, #tpu.memory_space<vmem>>, vector<1x9x128xf32>,
    } else {
    }
    %cst = arith.constant 0.000000e+00 : f32
    %3 = vector.broadcast %cst : f32 to vector<9x128xf32>
    %c0 = arith.constant 0 : index
    %c0_1 = arith.constant 0 : index
    %c0_2 = arith.constant 0 : index
    %4 = vector.load %arg3[%c0, %c0_1, %c0_2] : memref<1x9x128xbf16, #tpu.memory_space<vmem>>, vector<1x9x32xbf16>
    %5 = vector.shape_cast %4 : vector<1x9x32xbf16> to vector<9x32xbf16>
    %c0_3 = arith.constant 0 : index
    %c0_4 = arith.constant 0 : index
    %c0_5 = arith.constant 0 : index
    %6 = vector.load %arg4[%c0_3, %c0_4, %c0_5] : memref<1x9x128xbf16, #tpu.memory_space<vmem>>, vector<1x9x32xbf16>
    %7 = vector.shape_cast %6 : vector<1x9x32xbf16> to vector<9x32xbf16>
    %c0_6 = arith.constant 0 : index
    %c0_7 = arith.constant 0 : index
    %8 = vector.load %arg5[%c0_6, %c0_7] : memref<128x128xbf16, #tpu.memory_space<vmem>>, vector<32x128xbf16>
    %c0_8 = arith.constant 0 : index
    %c0_9 = arith.constant 0 : index
    %c0_10 = arith.constant 0 : index
    %9 = vector.load %arg2[%c0_8, %c0_9, %c0_10] : memref<1x9x128xbf16, #tpu.memory_space<vmem>>, vector<1x9x32xbf16>
    %10 = vector.shape_cast %9 : vector<1x9x32xbf16> to vector<9x32xbf16>
    %11 = arith.extf %10 : vector<9x32xbf16> to vector<9x32xf32>
    %cst_11 = arith.constant 0.176776692 : f32
    %12 = vector.broadcast %cst_11 : f32 to vector<9x32xf32>
    %13 = arith.mulf %11, %12 : vector<9x32xf32>
    %14 = arith.truncf %13 : vector<9x32xf32> to vector<9x32xbf16>
    %cst_12 = arith.constant dense<0.000000e+00> : vector<9x9xf32>
    %15 = tpu.matmul %14, %5, %cst_12 {dimension_numbers = #tpu.dot_dimension_numbers<[1], [1], [0], [0], [0, 0, 1, 0], [], []>} : vector<9x32xbf16>, vector<9x32xbf16>, vector<9x9xf32> -> vector<9x9xf32>
    %cst_13 = arith.constant dense<0xFF800000> : vector<9xf32>
    %16 = vector.multi_reduction <maximumf>, %15, %cst_13 [1] : vector<9x9xf32> to vector<9xf32>
    %17 = vector.shape_cast %16 : vector<9xf32> to vector<9x1xf32>
    %18 = vector.broadcast %17 : vector<9x1xf32> to vector<9x9xf32>
    %19 = arith.subf %15, %18 : vector<9x9xf32>
    %20 = math.exp %19 : vector<9x9xf32>
    %cst_14 = arith.constant dense<0.000000e+00> : vector<9xf32>
    %21 = vector.multi_reduction <add>, %20, %cst_14 [1] : vector<9x9xf32> to vector<9xf32>
    %22 = vector.shape_cast %21 : vector<9xf32> to vector<9x1xf32>
    %23 = arith.truncf %20 : vector<9x9xf32> to vector<9x9xbf16>
    %cst_15 = arith.constant dense<0.000000e+00> : vector<9x32xf32>
    %24 = tpu.matmul %23, %7, %cst_15 {dimension_numbers = #tpu.dot_dimension_numbers<[1], [0], [0], [1], [0, 0, 1, 1], [], []>} : vector<9x9xbf16>, vector<9x32xbf16>, vector<9x32xf32> -> vector<9x32xf32>
    %25 = vector.broadcast %22 : vector<9x1xf32> to vector<9x32xf32>
    %26 = arith.divf %24, %25 : vector<9x32xf32>
    %27 = arith.truncf %26 : vector<9x32xf32> to vector<9x32xbf16>
    %cst_16 = arith.constant dense<0.000000e+00> : vector<9x128xf32>
    %28 = tpu.matmul %27, %8, %cst_16 {dimension_numbers = #tpu.dot_dimension_numbers<[1], [0], [0], [1], [0, 0, 1, 1], [], []>} : vector<9x32xbf16>, vector<32x128xbf16>, vector<9x128xf32> -> vector<9x128xf32>
    %29 = arith.addf %3, %28 : vector<9x128xf32>
    %c0_17 = arith.constant 0 : index
    %c0_18 = arith.constant 0 : index
    %c32 = arith.constant 32 : index
    %30 = vector.load %arg3[%c0_17, %c0_18, %c32] : memref<1x9x128xbf16, #tpu.memory_space<vmem>>, vector<1x9x32xbf16>
    %31 = vector.shape_cast %30 : vector<1x9x32xbf16> to vector<9x32xbf16>
    %c0_19 = arith.constant 0 : index
    %c0_20 = arith.constant 0 : index
    %c32_21 = arith.constant 32 : index
    %32 = vector.load %arg4[%c0_19, %c0_20, %c32_21] : memref<1x9x128xbf16, #tpu.memory_space<vmem>>, vector<1x9x32xbf16>
    %33 = vector.shape_cast %32 : vector<1x9x32xbf16> to vector<9x32xbf16>
    %c32_22 = arith.constant 32 : index
    %c0_23 = arith.constant 0 : index
    %34 = vector.load %arg5[%c32_22, %c0_23] : memref<128x128xbf16, #tpu.memory_space<vmem>>, vector<32x128xbf16>
    %c0_24 = arith.constant 0 : index
    %c0_25 = arith.constant 0 : index
    %c32_26 = arith.constant 32 : index
    %35 = vector.load %arg2[%c0_24, %c0_25, %c32_26] : memref<1x9x128xbf16, #tpu.memory_space<vmem>>, vector<1x9x32xbf16>
    %36 = vector.shape_cast %35 : vector<1x9x32xbf16> to vector<9x32xbf16>
    %37 = arith.extf %36 : vector<9x32xbf16> to vector<9x32xf32>
    %cst_27 = arith.constant 0.176776692 : f32
    %38 = vector.broadcast %cst_27 : f32 to vector<9x32xf32>
    %39 = arith.mulf %37, %38 : vector<9x32xf32>
    %40 = arith.truncf %39 : vector<9x32xf32> to vector<9x32xbf16>
    %cst_28 = arith.constant dense<0.000000e+00> : vector<9x9xf32>
    %41 = tpu.matmul %40, %31, %cst_28 {dimension_numbers = #tpu.dot_dimension_numbers<[1], [1], [0], [0], [0, 0, 1, 0], [], []>} : vector<9x32xbf16>, vector<9x32xbf16>, vector<9x9xf32> -> vector<9x9xf32>
    %cst_29 = arith.constant dense<0xFF800000> : vector<9xf32>
    %42 = vector.multi_reduction <maximumf>, %41, %cst_29 [1] : vector<9x9xf32> to vector<9xf32>
    %43 = vector.shape_cast %42 : vector<9xf32> to vector<9x1xf32>
    %44 = vector.broadcast %43 : vector<9x1xf32> to vector<9x9xf32>
    %45 = arith.subf %41, %44 : vector<9x9xf32>
    %46 = math.exp %45 : vector<9x9xf32>
    %cst_30 = arith.constant dense<0.000000e+00> : vector<9xf32>
    %47 = vector.multi_reduction <add>, %46, %cst_30 [1] : vector<9x9xf32> to vector<9xf32>
    %48 = vector.shape_cast %47 : vector<9xf32> to vector<9x1xf32>
    %49 = arith.truncf %46 : vector<9x9xf32> to vector<9x9xbf16>
    %cst_31 = arith.constant dense<0.000000e+00> : vector<9x32xf32>
    %50 = tpu.matmul %49, %33, %cst_31 {dimension_numbers = #tpu.dot_dimension_numbers<[1], [0], [0], [1], [0, 0, 1, 1], [], []>} : vector<9x9xbf16>, vector<9x32xbf16>, vector<9x32xf32> -> vector<9x32xf32>
    %51 = vector.broadcast %48 : vector<9x1xf32> to vector<9x32xf32>
    %52 = arith.divf %50, %51 : vector<9x32xf32>
    %53 = arith.truncf %52 : vector<9x32xf32> to vector<9x32xbf16>
    %cst_32 = arith.constant dense<0.000000e+00> : vector<9x128xf32>
    %54 = tpu.matmul %53, %34, %cst_32 {dimension_numbers = #tpu.dot_dimension_numbers<[1], [0], [0], [1], [0, 0, 1, 1], [], []>} : vector<9x32xbf16>, vector<32x128xbf16>, vector<9x128xf32> -> vector<9x128xf32>
    %55 = arith.addf %29, %54 : vector<9x128xf32>
    %c0_33 = arith.constant 0 : index
    %c0_34 = arith.constant 0 : index
    %c64 = arith.constant 64 : index
    %56 = vector.load %arg3[%c0_33, %c0_34, %c64] : memref<1x9x128xbf16, #tpu.memory_space<vmem>>, vector<1x9x32xbf16>
    %57 = vector.shape_cast %56 : vector<1x9x32xbf16> to vector<9x32xbf16>
    %c0_35 = arith.constant 0 : index
    %c0_36 = arith.constant 0 : index
    %c64_37 = arith.constant 64 : index
    %58 = vector.load %arg4[%c0_35, %c0_36, %c64_37] : memref<1x9x128xbf16, #tpu.memory_space<vmem>>, vector<1x9x32xbf16>
    %59 = vector.shape_cast %58 : vector<1x9x32xbf16> to vector<9x32xbf16>
    %c64_38 = arith.constant 64 : index
    %c0_39 = arith.constant 0 : index
    %60 = vector.load %arg5[%c64_38, %c0_39] : memref<128x128xbf16, #tpu.memory_space<vmem>>, vector<32x128xbf16>
    %c0_40 = arith.constant 0 : index
    %c0_41 = arith.constant 0 : index
    %c64_42 = arith.constant 64 : index
    %61 = vector.load %arg2[%c0_40, %c0_41, %c64_42] : memref<1x9x128xbf16, #tpu.memory_space<vmem>>, vector<1x9x32xbf16>
    %62 = vector.shape_cast %61 : vector<1x9x32xbf16> to vector<9x32xbf16>
    %63 = arith.extf %62 : vector<9x32xbf16> to vector<9x32xf32>
    %cst_43 = arith.constant 0.176776692 : f32
    %64 = vector.broadcast %cst_43 : f32 to vector<9x32xf32>
    %65 = arith.mulf %63, %64 : vector<9x32xf32>
    %66 = arith.truncf %65 : vector<9x32xf32> to vector<9x32xbf16>
    %cst_44 = arith.constant dense<0.000000e+00> : vector<9x9xf32>
    %67 = tpu.matmul %66, %57, %cst_44 {dimension_numbers = #tpu.dot_dimension_numbers<[1], [1], [0], [0], [0, 0, 1, 0], [], []>} : vector<9x32xbf16>, vector<9x32xbf16>, vector<9x9xf32> -> vector<9x9xf32>
    %cst_45 = arith.constant dense<0xFF800000> : vector<9xf32>
    %68 = vector.multi_reduction <maximumf>, %67, %cst_45 [1] : vector<9x9xf32> to vector<9xf32>
    %69 = vector.shape_cast %68 : vector<9xf32> to vector<9x1xf32>
    %70 = vector.broadcast %69 : vector<9x1xf32> to vector<9x9xf32>
    %71 = arith.subf %67, %70 : vector<9x9xf32>
    %72 = math.exp %71 : vector<9x9xf32>
    %cst_46 = arith.constant dense<0.000000e+00> : vector<9xf32>
    %73 = vector.multi_reduction <add>, %72, %cst_46 [1] : vector<9x9xf32> to vector<9xf32>
    %74 = vector.shape_cast %73 : vector<9xf32> to vector<9x1xf32>
    %75 = arith.truncf %72 : vector<9x9xf32> to vector<9x9xbf16>
    %cst_47 = arith.constant dense<0.000000e+00> : vector<9x32xf32>
    %76 = tpu.matmul %75, %59, %cst_47 {dimension_numbers = #tpu.dot_dimension_numbers<[1], [0], [0], [1], [0, 0, 1, 1], [], []>} : vector<9x9xbf16>, vector<9x32xbf16>, vector<9x32xf32> -> vector<9x32xf32>
    %77 = vector.broadcast %74 : vector<9x1xf32> to vector<9x32xf32>
    %78 = arith.divf %76, %77 : vector<9x32xf32>
    %79 = arith.truncf %78 : vector<9x32xf32> to vector<9x32xbf16>
    %cst_48 = arith.constant dense<0.000000e+00> : vector<9x128xf32>
    %80 = tpu.matmul %79, %60, %cst_48 {dimension_numbers = #tpu.dot_dimension_numbers<[1], [0], [0], [1], [0, 0, 1, 1], [], []>} : vector<9x32xbf16>, vector<32x128xbf16>, vector<9x128xf32> -> vector<9x128xf32>
    %81 = arith.addf %55, %80 : vector<9x128xf32>
    %c0_49 = arith.constant 0 : index
    %c0_50 = arith.constant 0 : index
    %c96 = arith.constant 96 : index
    %82 = vector.load %arg3[%c0_49, %c0_50, %c96] : memref<1x9x128xbf16, #tpu.memory_space<vmem>>, vector<1x9x32xbf16>
    %83 = vector.shape_cast %82 : vector<1x9x32xbf16> to vector<9x32xbf16>
    %c0_51 = arith.constant 0 : index
    %c0_52 = arith.constant 0 : index
    %c96_53 = arith.constant 96 : index
    %84 = vector.load %arg4[%c0_51, %c0_52, %c96_53] : memref<1x9x128xbf16, #tpu.memory_space<vmem>>, vector<1x9x32xbf16>
    %85 = vector.shape_cast %84 : vector<1x9x32xbf16> to vector<9x32xbf16>
    %c96_54 = arith.constant 96 : index
    %c0_55 = arith.constant 0 : index
    %86 = vector.load %arg5[%c96_54, %c0_55] : memref<128x128xbf16, #tpu.memory_space<vmem>>, vector<32x128xbf16>
    %c0_56 = arith.constant 0 : index
    %c0_57 = arith.constant 0 : index
    %c96_58 = arith.constant 96 : index
    %87 = vector.load %arg2[%c0_56, %c0_57, %c96_58] : memref<1x9x128xbf16, #tpu.memory_space<vmem>>, vector<1x9x32xbf16>
    %88 = vector.shape_cast %87 : vector<1x9x32xbf16> to vector<9x32xbf16>
    %89 = arith.extf %88 : vector<9x32xbf16> to vector<9x32xf32>
    %cst_59 = arith.constant 0.176776692 : f32
    %90 = vector.broadcast %cst_59 : f32 to vector<9x32xf32>
    %91 = arith.mulf %89, %90 : vector<9x32xf32>
    %92 = arith.truncf %91 : vector<9x32xf32> to vector<9x32xbf16>
    %cst_60 = arith.constant dense<0.000000e+00> : vector<9x9xf32>
    %93 = tpu.matmul %92, %83, %cst_60 {dimension_numbers = #tpu.dot_dimension_numbers<[1], [1], [0], [0], [0, 0, 1, 0], [], []>} : vector<9x32xbf16>, vector<9x32xbf16>, vector<9x9xf32> -> vector<9x9xf32>
    %cst_61 = arith.constant dense<0xFF800000> : vector<9xf32>
    %94 = vector.multi_reduction <maximumf>, %93, %cst_61 [1] : vector<9x9xf32> to vector<9xf32>
    %95 = vector.shape_cast %94 : vector<9xf32> to vector<9x1xf32>
    %96 = vector.broadcast %95 : vector<9x1xf32> to vector<9x9xf32>
    %97 = arith.subf %93, %96 : vector<9x9xf32>
    %98 = math.exp %97 : vector<9x9xf32>
    %cst_62 = arith.constant dense<0.000000e+00> : vector<9xf32>
    %99 = vector.multi_reduction <add>, %98, %cst_62 [1] : vector<9x9xf32> to vector<9xf32>
    %100 = vector.shape_cast %99 : vector<9xf32> to vector<9x1xf32>
    %101 = arith.truncf %98 : vector<9x9xf32> to vector<9x9xbf16>
    %cst_63 = arith.constant dense<0.000000e+00> : vector<9x32xf32>
    %102 = tpu.matmul %101, %85, %cst_63 {dimension_numbers = #tpu.dot_dimension_numbers<[1], [0], [0], [1], [0, 0, 1, 1], [], []>} : vector<9x9xbf16>, vector<9x32xbf16>, vector<9x32xf32> -> vector<9x32xf32>
    %103 = vector.broadcast %100 : vector<9x1xf32> to vector<9x32xf32>
    %104 = arith.divf %102, %103 : vector<9x32xf32>
    %105 = arith.truncf %104 : vector<9x32xf32> to vector<9x32xbf16>
    %cst_64 = arith.constant dense<0.000000e+00> : vector<9x128xf32>
    %106 = tpu.matmul %105, %86, %cst_64 {dimension_numbers = #tpu.dot_dimension_numbers<[1], [0], [0], [1], [0, 0, 1, 1], [], []>} : vector<9x32xbf16>, vector<32x128xbf16>, vector<9x128xf32> -> vector<9x128xf32>
    %107 = arith.addf %81, %106 : vector<9x128xf32>
    %c0_65 = arith.constant 0 : index
    %c0_66 = arith.constant 0 : index
    %c0_67 = arith.constant 0 : index
    %108 = vector.load %arg8[%c0_65, %c0_66, %c0_67] : memref<1x9x128xf32, #tpu.memory_space<vmem>>, vector<1x9x128xf32>
    %109 = vector.shape_cast %108 : vector<1x9x128xf32> to vector<9x128xf32>
    %110 = arith.addf %109, %107 : vector<9x128xf32>
    %c0_68 = arith.constant 0 : index
    %c0_69 = arith.constant 0 : index
    %c0_70 = arith.constant 0 : index
    %111 = vector.load %arg8[%c0_68, %c0_69, %c0_70] : memref<1x9x128xf32, #tpu.memory_space<vmem>>, vector<1x9x128xf32>
    %112 = vector.shape_cast %111 : vector<1x9x128xf32> to vector<9x128xf32>
    %113 = vector.shape_cast %110 : vector<9x128xf32> to vector<1x9x128xf32>
    tpu.vector_store %arg8[%c0_68, %c0_69, %c0_70], %113 {strides = array<i32>} : memref<1x9x128xf32, #tpu.memory_space<vmem>>, vector<1x9x128xf32>,
    return
  }
  func.func @transform_0(%arg0: i32, %arg1: i32) -> (i32, i32, i32) {
    %c0_i32 = arith.constant 0 : i32
    %c0_i32_0 = arith.constant 0 : i32
    return %arg0, %c0_i32, %arg1 : i32, i32, i32
  }
  func.func @transform_1(%arg0: i32, %arg1: i32) -> (i32, i32, i32) {
    %c1_i32 = arith.constant 1 : i32
    %0 = arith.addi %c1_i32, %arg1 : i32
    %c0_i32 = arith.constant 0 : i32
    %c0_i32_0 = arith.constant 0 : i32
    return %arg0, %c0_i32, %0 : i32, i32, i32
  }
  func.func @transform_2(%arg0: i32, %arg1: i32) -> (i32, i32, i32) {
    %c2_i32 = arith.constant 2 : i32
    %0 = arith.addi %c2_i32, %arg1 : i32
    %c0_i32 = arith.constant 0 : i32
    %c0_i32_0 = arith.constant 0 : i32
    return %arg0, %c0_i32, %0 : i32, i32, i32
  }
  func.func @transform_3(%arg0: i32, %arg1: i32) -> (i32, i32) {
    %c0_i32 = arith.constant 0 : i32
    %c0_i32_0 = arith.constant 0 : i32
    return %arg1, %c0_i32 : i32, i32
  }
  func.func @transform_4(%arg0: i32, %arg1: i32) -> (i32, i32) {
    %c0_i32 = arith.constant 0 : i32
    %c0_i32_0 = arith.constant 0 : i32
    %c0_i32_1 = arith.constant 0 : i32
    return %c0_i32, %c0_i32_0 : i32, i32
  }
  func.func @transform_5(%arg0: i32, %arg1: i32) -> (i32, i32, i32) {
    %c0_i32 = arith.constant 0 : i32
    %c0_i32_0 = arith.constant 0 : i32
    %c0_i32_1 = arith.constant 0 : i32
    return %arg0, %c0_i32, %c0_i32_0 : i32, i32, i32
  }
  func.func @transform_6(%arg0: i32, %arg1: i32) -> (i32, i32, i32) {
    %c0_i32 = arith.constant 0 : i32
    %c0_i32_0 = arith.constant 0 : i32
    %c0_i32_1 = arith.constant 0 : i32
    return %arg0, %c0_i32, %c0_i32_0 : i32, i32, i32
  }
}

module attributes {stable_mosaic.version = 11 : i64} {
  func.func @_linear_res_kernel(%arg0: i32, %arg1: memref<16x256xbf16, #tpu.memory_space<vmem>>, %arg2: memref<256x128xbf16, #tpu.memory_space<vmem>>, %arg3: memref<1x128xf32, #tpu.memory_space<vmem>>, %arg4: memref<16x128xf32, #tpu.memory_space<vmem>>, %arg5: memref<16x128xf32, #tpu.memory_space<vmem>>) attributes {dimension_semantics = [#tpu.dimension_semantics<parallel>], iteration_bounds = array<i64: 2>, scalar_prefetch = 0 : i64, scratch_operands = 0 : i64, tpu.core_type = #tpu.core_type<tc>, window_params = [{transform_indices = @transform_0, window_bounds = array<i64: 16, 256>}, {pipeline_mode = #tpu.pipeline_mode<synchronous>, transform_indices = @transform_1, window_bounds = array<i64: 256, 128>}, {pipeline_mode = #tpu.pipeline_mode<synchronous>, transform_indices = @transform_2, window_bounds = array<i64: 1, 128>}, {transform_indices = @transform_3, window_bounds = array<i64: 16, 128>}, {transform_indices = @transform_4, window_bounds = array<i64: 16, 128>}]} {
    %c0 = arith.constant 0 : index
    %c0_0 = arith.constant 0 : index
    %0 = vector.load %arg1[%c0, %c0_0] : memref<16x256xbf16, #tpu.memory_space<vmem>>, vector<16x256xbf16>
    %c0_1 = arith.constant 0 : index
    %c0_2 = arith.constant 0 : index
    %1 = vector.load %arg2[%c0_1, %c0_2] : memref<256x128xbf16, #tpu.memory_space<vmem>>, vector<256x128xbf16>
    %cst = arith.constant dense<0.000000e+00> : vector<16x128xf32>
    %2 = tpu.matmul %0, %1, %cst {dimension_numbers = #tpu.dot_dimension_numbers<[1], [0], [0], [1], [0, 0, 1, 1], [], []>} : vector<16x256xbf16>, vector<256x128xbf16>, vector<16x128xf32> -> vector<16x128xf32>
    %c0_3 = arith.constant 0 : index
    %c0_4 = arith.constant 0 : index
    %3 = vector.load %arg3[%c0_3, %c0_4] : memref<1x128xf32, #tpu.memory_space<vmem>>, vector<1x128xf32>
    %4 = vector.broadcast %3 : vector<1x128xf32> to vector<16x128xf32>
    %5 = arith.addf %2, %4 : vector<16x128xf32>
    %c0_5 = arith.constant 0 : index
    %c0_6 = arith.constant 0 : index
    %6 = vector.load %arg4[%c0_5, %c0_6] : memref<16x128xf32, #tpu.memory_space<vmem>>, vector<16x128xf32>
    %7 = arith.addf %5, %6 : vector<16x128xf32>
    %c0_7 = arith.constant 0 : index
    %c0_8 = arith.constant 0 : index
    %8 = vector.load %arg5[%c0_7, %c0_8] : memref<16x128xf32, #tpu.memory_space<vmem>>, vector<16x128xf32>
    tpu.vector_store %arg5[%c0_7, %c0_8], %7 {strides = array<i32>} : memref<16x128xf32, #tpu.memory_space<vmem>>, vector<16x128xf32>,
    return
  }
  func.func @transform_0(%arg0: i32) -> (i32, i32) {
    %c0_i32 = arith.constant 0 : i32
    %c0_i32_0 = arith.constant 0 : i32
    return %arg0, %c0_i32 : i32, i32
  }
  func.func @transform_1(%arg0: i32) -> (i32, i32) {
    %c0_i32 = arith.constant 0 : i32
    %c0_i32_0 = arith.constant 0 : i32
    %c0_i32_1 = arith.constant 0 : i32
    return %c0_i32, %c0_i32_0 : i32, i32
  }
  func.func @transform_2(%arg0: i32) -> (i32, i32) {
    %c0_i32 = arith.constant 0 : i32
    %c0_i32_0 = arith.constant 0 : i32
    %c0_i32_1 = arith.constant 0 : i32
    return %c0_i32, %c0_i32_0 : i32, i32
  }
  func.func @transform_3(%arg0: i32) -> (i32, i32) {
    %c0_i32 = arith.constant 0 : i32
    %c0_i32_0 = arith.constant 0 : i32
    return %arg0, %c0_i32 : i32, i32
  }
  func.func @transform_4(%arg0: i32) -> (i32, i32) {
    %c0_i32 = arith.constant 0 : i32
    %c0_i32_0 = arith.constant 0 : i32
    return %arg0, %c0_i32 : i32, i32
  }
}

module attributes {stable_mosaic.version = 11 : i64} {
  func.func @_ln_linear_kernel(%arg0: i32, %arg1: memref<16x128xf32, #tpu.memory_space<vmem>>, %arg2: memref<1x128xf32, #tpu.memory_space<vmem>>, %arg3: memref<1x128xf32, #tpu.memory_space<vmem>>, %arg4: memref<128x256xbf16, #tpu.memory_space<vmem>>, %arg5: memref<1x256xf32, #tpu.memory_space<vmem>>, %arg6: memref<16x256xbf16, #tpu.memory_space<vmem>>) attributes {dimension_semantics = [#tpu.dimension_semantics<parallel>], iteration_bounds = array<i64: 2>, scalar_prefetch = 0 : i64, scratch_operands = 0 : i64, tpu.core_type = #tpu.core_type<tc>, window_params = [{transform_indices = @transform_0, window_bounds = array<i64: 16, 128>}, {pipeline_mode = #tpu.pipeline_mode<synchronous>, transform_indices = @transform_1, window_bounds = array<i64: 1, 128>}, {pipeline_mode = #tpu.pipeline_mode<synchronous>, transform_indices = @transform_2, window_bounds = array<i64: 1, 128>}, {pipeline_mode = #tpu.pipeline_mode<synchronous>, transform_indices = @transform_3, window_bounds = array<i64: 128, 256>}, {pipeline_mode = #tpu.pipeline_mode<synchronous>, transform_indices = @transform_4, window_bounds = array<i64: 1, 256>}, {transform_indices = @transform_5, window_bounds = array<i64: 16, 256>}]} {
    %c0 = arith.constant 0 : index
    %c0_0 = arith.constant 0 : index
    %0 = vector.load %arg1[%c0, %c0_0] : memref<16x128xf32, #tpu.memory_space<vmem>>, vector<16x128xf32>
    %cst = arith.constant dense<0.000000e+00> : vector<16xf32>
    %1 = vector.multi_reduction <add>, %0, %cst [1] : vector<16x128xf32> to vector<16xf32>
    %2 = vector.shape_cast %1 : vector<16xf32> to vector<16x1xf32>
    %cst_1 = arith.constant 1.280000e+02 : f32
    %3 = vector.broadcast %cst_1 : f32 to vector<16x1xf32>
    %4 = arith.divf %2, %3 : vector<16x1xf32>
    %5 = vector.broadcast %4 : vector<16x1xf32> to vector<16x128xf32>
    %6 = arith.subf %0, %5 : vector<16x128xf32>
    %7 = arith.mulf %6, %6 : vector<16x128xf32>
    %cst_2 = arith.constant dense<0.000000e+00> : vector<16xf32>
    %8 = vector.multi_reduction <add>, %7, %cst_2 [1] : vector<16x128xf32> to vector<16xf32>
    %9 = vector.shape_cast %8 : vector<16xf32> to vector<16x1xf32>
    %cst_3 = arith.constant 1.280000e+02 : f32
    %10 = vector.broadcast %cst_3 : f32 to vector<16x1xf32>
    %11 = arith.divf %9, %10 : vector<16x1xf32>
    %cst_4 = arith.constant 9.99999974E-6 : f32
    %12 = vector.broadcast %cst_4 : f32 to vector<16x1xf32>
    %13 = arith.addf %11, %12 : vector<16x1xf32>
    %14 = math.rsqrt %13 : vector<16x1xf32>
    %15 = vector.broadcast %14 : vector<16x1xf32> to vector<16x128xf32>
    %16 = arith.mulf %6, %15 : vector<16x128xf32>
    %c0_5 = arith.constant 0 : index
    %c0_6 = arith.constant 0 : index
    %17 = vector.load %arg2[%c0_5, %c0_6] : memref<1x128xf32, #tpu.memory_space<vmem>>, vector<1x128xf32>
    %18 = vector.broadcast %17 : vector<1x128xf32> to vector<16x128xf32>
    %19 = arith.mulf %16, %18 : vector<16x128xf32>
    %c0_7 = arith.constant 0 : index
    %c0_8 = arith.constant 0 : index
    %20 = vector.load %arg3[%c0_7, %c0_8] : memref<1x128xf32, #tpu.memory_space<vmem>>, vector<1x128xf32>
    %21 = vector.broadcast %20 : vector<1x128xf32> to vector<16x128xf32>
    %22 = arith.addf %19, %21 : vector<16x128xf32>
    %23 = arith.truncf %22 : vector<16x128xf32> to vector<16x128xbf16>
    %c0_9 = arith.constant 0 : index
    %c0_10 = arith.constant 0 : index
    %24 = vector.load %arg4[%c0_9, %c0_10] : memref<128x256xbf16, #tpu.memory_space<vmem>>, vector<128x256xbf16>
    %cst_11 = arith.constant dense<0.000000e+00> : vector<16x256xf32>
    %25 = tpu.matmul %23, %24, %cst_11 {dimension_numbers = #tpu.dot_dimension_numbers<[1], [0], [0], [1], [0, 0, 1, 1], [], []>} : vector<16x128xbf16>, vector<128x256xbf16>, vector<16x256xf32> -> vector<16x256xf32>
    %c0_12 = arith.constant 0 : index
    %c0_13 = arith.constant 0 : index
    %26 = vector.load %arg5[%c0_12, %c0_13] : memref<1x256xf32, #tpu.memory_space<vmem>>, vector<1x256xf32>
    %27 = vector.broadcast %26 : vector<1x256xf32> to vector<16x256xf32>
    %28 = arith.addf %25, %27 : vector<16x256xf32>
    %cst_14 = arith.constant 5.000000e-01 : f32
    %29 = vector.broadcast %cst_14 : f32 to vector<16x256xf32>
    %30 = arith.mulf %29, %28 : vector<16x256xf32>
    %cst_15 = arith.constant 0.707106769 : f32
    %31 = vector.broadcast %cst_15 : f32 to vector<16x256xf32>
    %32 = arith.mulf %28, %31 : vector<16x256xf32>
    %33 = math.absf %32 : vector<16x256xf32>
    %cst_16 = arith.constant 0.327591091 : f32
    %34 = vector.broadcast %cst_16 : f32 to vector<16x256xf32>
    %35 = arith.mulf %34, %33 : vector<16x256xf32>
    %cst_17 = arith.constant 1.000000e+00 : f32
    %36 = vector.broadcast %cst_17 : f32 to vector<16x256xf32>
    %37 = arith.addf %36, %35 : vector<16x256xf32>
    %cst_18 = arith.constant 1.000000e+00 : f32
    %38 = vector.broadcast %cst_18 : f32 to vector<16x256xf32>
    %39 = arith.divf %38, %37 : vector<16x256xf32>
    %cst_19 = arith.constant 1.06140542 : f32
    %40 = vector.broadcast %cst_19 : f32 to vector<16x256xf32>
    %41 = arith.mulf %40, %39 : vector<16x256xf32>
    %cst_20 = arith.constant -1.45315206 : f32
    %42 = vector.broadcast %cst_20 : f32 to vector<16x256xf32>
    %43 = arith.addf %41, %42 : vector<16x256xf32>
    %44 = arith.mulf %43, %39 : vector<16x256xf32>
    %cst_21 = arith.constant 1.42141378 : f32
    %45 = vector.broadcast %cst_21 : f32 to vector<16x256xf32>
    %46 = arith.addf %44, %45 : vector<16x256xf32>
    %47 = arith.mulf %46, %39 : vector<16x256xf32>
    %cst_22 = arith.constant -0.284496725 : f32
    %48 = vector.broadcast %cst_22 : f32 to vector<16x256xf32>
    %49 = arith.addf %47, %48 : vector<16x256xf32>
    %50 = arith.mulf %49, %39 : vector<16x256xf32>
    %cst_23 = arith.constant 0.254829586 : f32
    %51 = vector.broadcast %cst_23 : f32 to vector<16x256xf32>
    %52 = arith.addf %50, %51 : vector<16x256xf32>
    %53 = arith.mulf %52, %39 : vector<16x256xf32>
    %cst_24 = arith.constant 0.000000e+00 : f32
    %54 = vector.broadcast %cst_24 : f32 to vector<16x256xf32>
    %55 = arith.subf %54, %33 : vector<16x256xf32>
    %56 = arith.mulf %55, %33 : vector<16x256xf32>
    %57 = math.exp %56 : vector<16x256xf32>
    %58 = arith.mulf %53, %57 : vector<16x256xf32>
    %cst_25 = arith.constant 1.000000e+00 : f32
    %59 = vector.broadcast %cst_25 : f32 to vector<16x256xf32>
    %60 = arith.subf %59, %58 : vector<16x256xf32>
    %cst_26 = arith.constant 0.000000e+00 : f32
    %61 = vector.broadcast %cst_26 : f32 to vector<16x256xf32>
    %62 = arith.cmpf olt, %32, %61 : vector<16x256xf32>
    %cst_27 = arith.constant 0.000000e+00 : f32
    %63 = vector.broadcast %cst_27 : f32 to vector<16x256xf32>
    %64 = arith.subf %63, %60 : vector<16x256xf32>
    %65 = arith.select %62, %64, %60 : vector<16x256xi1>, vector<16x256xf32>
    %cst_28 = arith.constant 1.000000e+00 : f32
    %66 = vector.broadcast %cst_28 : f32 to vector<16x256xf32>
    %67 = arith.addf %66, %65 : vector<16x256xf32>
    %68 = arith.mulf %30, %67 : vector<16x256xf32>
    %69 = arith.truncf %68 : vector<16x256xf32> to vector<16x256xbf16>
    %c0_29 = arith.constant 0 : index
    %c0_30 = arith.constant 0 : index
    %70 = vector.load %arg6[%c0_29, %c0_30] : memref<16x256xbf16, #tpu.memory_space<vmem>>, vector<16x256xbf16>
    tpu.vector_store %arg6[%c0_29, %c0_30], %69 {strides = array<i32>} : memref<16x256xbf16, #tpu.memory_space<vmem>>, vector<16x256xbf16>,
    return
  }
  func.func @transform_0(%arg0: i32) -> (i32, i32) {
    %c0_i32 = arith.constant 0 : i32
    %c0_i32_0 = arith.constant 0 : i32
    return %arg0, %c0_i32 : i32, i32
  }
  func.func @transform_1(%arg0: i32) -> (i32, i32) {
    %c0_i32 = arith.constant 0 : i32
    %c0_i32_0 = arith.constant 0 : i32
    %c0_i32_1 = arith.constant 0 : i32
    return %c0_i32, %c0_i32_0 : i32, i32
  }
  func.func @transform_2(%arg0: i32) -> (i32, i32) {
    %c0_i32 = arith.constant 0 : i32
    %c0_i32_0 = arith.constant 0 : i32
    %c0_i32_1 = arith.constant 0 : i32
    return %c0_i32, %c0_i32_0 : i32, i32
  }
  func.func @transform_3(%arg0: i32) -> (i32, i32) {
    %c0_i32 = arith.constant 0 : i32
    %c0_i32_0 = arith.constant 0 : i32
    %c0_i32_1 = arith.constant 0 : i32
    return %c0_i32, %c0_i32_0 : i32, i32
  }
  func.func @transform_4(%arg0: i32) -> (i32, i32) {
    %c0_i32 = arith.constant 0 : i32
    %c0_i32_0 = arith.constant 0 : i32
    %c0_i32_1 = arith.constant 0 : i32
    return %c0_i32, %c0_i32_0 : i32, i32
  }
  func.func @transform_5(%arg0: i32) -> (i32, i32) {
    %c0_i32 = arith.constant 0 : i32
    %c0_i32_0 = arith.constant 0 : i32
    return %arg0, %c0_i32 : i32, i32
  }
}

module attributes {stable_mosaic.version = 11 : i64} {
  func.func @_ln_linear_kernel(%arg0: i32, %arg1: memref<16x128xf32, #tpu.memory_space<vmem>>, %arg2: memref<1x128xf32, #tpu.memory_space<vmem>>, %arg3: memref<1x128xf32, #tpu.memory_space<vmem>>, %arg4: memref<128x384xbf16, #tpu.memory_space<vmem>>, %arg5: memref<1x384xf32, #tpu.memory_space<vmem>>, %arg6: memref<16x384xbf16, #tpu.memory_space<vmem>>) attributes {dimension_semantics = [#tpu.dimension_semantics<parallel>], iteration_bounds = array<i64: 2>, scalar_prefetch = 0 : i64, scratch_operands = 0 : i64, tpu.core_type = #tpu.core_type<tc>, window_params = [{transform_indices = @transform_0, window_bounds = array<i64: 16, 128>}, {pipeline_mode = #tpu.pipeline_mode<synchronous>, transform_indices = @transform_1, window_bounds = array<i64: 1, 128>}, {pipeline_mode = #tpu.pipeline_mode<synchronous>, transform_indices = @transform_2, window_bounds = array<i64: 1, 128>}, {pipeline_mode = #tpu.pipeline_mode<synchronous>, transform_indices = @transform_3, window_bounds = array<i64: 128, 384>}, {pipeline_mode = #tpu.pipeline_mode<synchronous>, transform_indices = @transform_4, window_bounds = array<i64: 1, 384>}, {transform_indices = @transform_5, window_bounds = array<i64: 16, 384>}]} {
    %c0 = arith.constant 0 : index
    %c0_0 = arith.constant 0 : index
    %0 = vector.load %arg1[%c0, %c0_0] : memref<16x128xf32, #tpu.memory_space<vmem>>, vector<16x128xf32>
    %cst = arith.constant dense<0.000000e+00> : vector<16xf32>
    %1 = vector.multi_reduction <add>, %0, %cst [1] : vector<16x128xf32> to vector<16xf32>
    %2 = vector.shape_cast %1 : vector<16xf32> to vector<16x1xf32>
    %cst_1 = arith.constant 1.280000e+02 : f32
    %3 = vector.broadcast %cst_1 : f32 to vector<16x1xf32>
    %4 = arith.divf %2, %3 : vector<16x1xf32>
    %5 = vector.broadcast %4 : vector<16x1xf32> to vector<16x128xf32>
    %6 = arith.subf %0, %5 : vector<16x128xf32>
    %7 = arith.mulf %6, %6 : vector<16x128xf32>
    %cst_2 = arith.constant dense<0.000000e+00> : vector<16xf32>
    %8 = vector.multi_reduction <add>, %7, %cst_2 [1] : vector<16x128xf32> to vector<16xf32>
    %9 = vector.shape_cast %8 : vector<16xf32> to vector<16x1xf32>
    %cst_3 = arith.constant 1.280000e+02 : f32
    %10 = vector.broadcast %cst_3 : f32 to vector<16x1xf32>
    %11 = arith.divf %9, %10 : vector<16x1xf32>
    %cst_4 = arith.constant 9.99999974E-6 : f32
    %12 = vector.broadcast %cst_4 : f32 to vector<16x1xf32>
    %13 = arith.addf %11, %12 : vector<16x1xf32>
    %14 = math.rsqrt %13 : vector<16x1xf32>
    %15 = vector.broadcast %14 : vector<16x1xf32> to vector<16x128xf32>
    %16 = arith.mulf %6, %15 : vector<16x128xf32>
    %c0_5 = arith.constant 0 : index
    %c0_6 = arith.constant 0 : index
    %17 = vector.load %arg2[%c0_5, %c0_6] : memref<1x128xf32, #tpu.memory_space<vmem>>, vector<1x128xf32>
    %18 = vector.broadcast %17 : vector<1x128xf32> to vector<16x128xf32>
    %19 = arith.mulf %16, %18 : vector<16x128xf32>
    %c0_7 = arith.constant 0 : index
    %c0_8 = arith.constant 0 : index
    %20 = vector.load %arg3[%c0_7, %c0_8] : memref<1x128xf32, #tpu.memory_space<vmem>>, vector<1x128xf32>
    %21 = vector.broadcast %20 : vector<1x128xf32> to vector<16x128xf32>
    %22 = arith.addf %19, %21 : vector<16x128xf32>
    %23 = arith.truncf %22 : vector<16x128xf32> to vector<16x128xbf16>
    %c0_9 = arith.constant 0 : index
    %c0_10 = arith.constant 0 : index
    %24 = vector.load %arg4[%c0_9, %c0_10] : memref<128x384xbf16, #tpu.memory_space<vmem>>, vector<128x384xbf16>
    %cst_11 = arith.constant dense<0.000000e+00> : vector<16x384xf32>
    %25 = tpu.matmul %23, %24, %cst_11 {dimension_numbers = #tpu.dot_dimension_numbers<[1], [0], [0], [1], [0, 0, 1, 1], [], []>} : vector<16x128xbf16>, vector<128x384xbf16>, vector<16x384xf32> -> vector<16x384xf32>
    %c0_12 = arith.constant 0 : index
    %c0_13 = arith.constant 0 : index
    %26 = vector.load %arg5[%c0_12, %c0_13] : memref<1x384xf32, #tpu.memory_space<vmem>>, vector<1x384xf32>
    %27 = vector.broadcast %26 : vector<1x384xf32> to vector<16x384xf32>
    %28 = arith.addf %25, %27 : vector<16x384xf32>
    %29 = arith.truncf %28 : vector<16x384xf32> to vector<16x384xbf16>
    %c0_14 = arith.constant 0 : index
    %c0_15 = arith.constant 0 : index
    %30 = vector.load %arg6[%c0_14, %c0_15] : memref<16x384xbf16, #tpu.memory_space<vmem>>, vector<16x384xbf16>
    tpu.vector_store %arg6[%c0_14, %c0_15], %29 {strides = array<i32>} : memref<16x384xbf16, #tpu.memory_space<vmem>>, vector<16x384xbf16>,
    return
  }
  func.func @transform_0(%arg0: i32) -> (i32, i32) {
    %c0_i32 = arith.constant 0 : i32
    %c0_i32_0 = arith.constant 0 : i32
    return %arg0, %c0_i32 : i32, i32
  }
  func.func @transform_1(%arg0: i32) -> (i32, i32) {
    %c0_i32 = arith.constant 0 : i32
    %c0_i32_0 = arith.constant 0 : i32
    %c0_i32_1 = arith.constant 0 : i32
    return %c0_i32, %c0_i32_0 : i32, i32
  }
  func.func @transform_2(%arg0: i32) -> (i32, i32) {
    %c0_i32 = arith.constant 0 : i32
    %c0_i32_0 = arith.constant 0 : i32
    %c0_i32_1 = arith.constant 0 : i32
    return %c0_i32, %c0_i32_0 : i32, i32
  }
  func.func @transform_3(%arg0: i32) -> (i32, i32) {
    %c0_i32 = arith.constant 0 : i32
    %c0_i32_0 = arith.constant 0 : i32
    %c0_i32_1 = arith.constant 0 : i32
    return %c0_i32, %c0_i32_0 : i32, i32
  }
  func.func @transform_4(%arg0: i32) -> (i32, i32) {
    %c0_i32 = arith.constant 0 : i32
    %c0_i32_0 = arith.constant 0 : i32
    %c0_i32_1 = arith.constant 0 : i32
    return %c0_i32, %c0_i32_0 : i32, i32
  }
  func.func @transform_5(%arg0: i32) -> (i32, i32) {
    %c0_i32 = arith.constant 0 : i32
    %c0_i32_0 = arith.constant 0 : i32
    return %arg0, %c0_i32 : i32, i32
  }
}

module attributes {stable_mosaic.version = 11 : i64} {
  func.func @_ln_linear_kernel(%arg0: i32, %arg1: memref<2x128xf32, #tpu.memory_space<vmem>>, %arg2: memref<1x128xf32, #tpu.memory_space<vmem>>, %arg3: memref<1x128xf32, #tpu.memory_space<vmem>>, %arg4: memref<128x3xbf16, #tpu.memory_space<vmem>>, %arg5: memref<1x3xf32, #tpu.memory_space<vmem>>, %arg6: memref<2x3xf32, #tpu.memory_space<vmem>>) attributes {dimension_semantics = [#tpu.dimension_semantics<parallel>], iteration_bounds = array<i64: 1>, scalar_prefetch = 0 : i64, scratch_operands = 0 : i64, tpu.core_type = #tpu.core_type<tc>, window_params = [{transform_indices = @transform_0, window_bounds = array<i64: 2, 128>}, {pipeline_mode = #tpu.pipeline_mode<synchronous>, transform_indices = @transform_1, window_bounds = array<i64: 1, 128>}, {pipeline_mode = #tpu.pipeline_mode<synchronous>, transform_indices = @transform_2, window_bounds = array<i64: 1, 128>}, {pipeline_mode = #tpu.pipeline_mode<synchronous>, transform_indices = @transform_3, window_bounds = array<i64: 128, 3>}, {pipeline_mode = #tpu.pipeline_mode<synchronous>, transform_indices = @transform_4, window_bounds = array<i64: 1, 3>}, {transform_indices = @transform_5, window_bounds = array<i64: 2, 3>}]} {
    %c0 = arith.constant 0 : index
    %c0_0 = arith.constant 0 : index
    %0 = vector.load %arg1[%c0, %c0_0] : memref<2x128xf32, #tpu.memory_space<vmem>>, vector<2x128xf32>
    %cst = arith.constant dense<0.000000e+00> : vector<2xf32>
    %1 = vector.multi_reduction <add>, %0, %cst [1] : vector<2x128xf32> to vector<2xf32>
    %2 = vector.shape_cast %1 : vector<2xf32> to vector<2x1xf32>
    %cst_1 = arith.constant 1.280000e+02 : f32
    %3 = vector.broadcast %cst_1 : f32 to vector<2x1xf32>
    %4 = arith.divf %2, %3 : vector<2x1xf32>
    %5 = vector.broadcast %4 : vector<2x1xf32> to vector<2x128xf32>
    %6 = arith.subf %0, %5 : vector<2x128xf32>
    %7 = arith.mulf %6, %6 : vector<2x128xf32>
    %cst_2 = arith.constant dense<0.000000e+00> : vector<2xf32>
    %8 = vector.multi_reduction <add>, %7, %cst_2 [1] : vector<2x128xf32> to vector<2xf32>
    %9 = vector.shape_cast %8 : vector<2xf32> to vector<2x1xf32>
    %cst_3 = arith.constant 1.280000e+02 : f32
    %10 = vector.broadcast %cst_3 : f32 to vector<2x1xf32>
    %11 = arith.divf %9, %10 : vector<2x1xf32>
    %cst_4 = arith.constant 9.99999974E-6 : f32
    %12 = vector.broadcast %cst_4 : f32 to vector<2x1xf32>
    %13 = arith.addf %11, %12 : vector<2x1xf32>
    %14 = math.rsqrt %13 : vector<2x1xf32>
    %15 = vector.broadcast %14 : vector<2x1xf32> to vector<2x128xf32>
    %16 = arith.mulf %6, %15 : vector<2x128xf32>
    %c0_5 = arith.constant 0 : index
    %c0_6 = arith.constant 0 : index
    %17 = vector.load %arg2[%c0_5, %c0_6] : memref<1x128xf32, #tpu.memory_space<vmem>>, vector<1x128xf32>
    %18 = vector.broadcast %17 : vector<1x128xf32> to vector<2x128xf32>
    %19 = arith.mulf %16, %18 : vector<2x128xf32>
    %c0_7 = arith.constant 0 : index
    %c0_8 = arith.constant 0 : index
    %20 = vector.load %arg3[%c0_7, %c0_8] : memref<1x128xf32, #tpu.memory_space<vmem>>, vector<1x128xf32>
    %21 = vector.broadcast %20 : vector<1x128xf32> to vector<2x128xf32>
    %22 = arith.addf %19, %21 : vector<2x128xf32>
    %23 = arith.truncf %22 : vector<2x128xf32> to vector<2x128xbf16>
    %c0_9 = arith.constant 0 : index
    %c0_10 = arith.constant 0 : index
    %24 = vector.load %arg4[%c0_9, %c0_10] : memref<128x3xbf16, #tpu.memory_space<vmem>>, vector<128x3xbf16>
    %cst_11 = arith.constant dense<0.000000e+00> : vector<2x3xf32>
    %25 = tpu.matmul %23, %24, %cst_11 {dimension_numbers = #tpu.dot_dimension_numbers<[1], [0], [0], [1], [0, 0, 1, 1], [], []>} : vector<2x128xbf16>, vector<128x3xbf16>, vector<2x3xf32> -> vector<2x3xf32>
    %c0_12 = arith.constant 0 : index
    %c0_13 = arith.constant 0 : index
    %26 = vector.load %arg5[%c0_12, %c0_13] : memref<1x3xf32, #tpu.memory_space<vmem>>, vector<1x3xf32>
    %27 = vector.broadcast %26 : vector<1x3xf32> to vector<2x3xf32>
    %28 = arith.addf %25, %27 : vector<2x3xf32>
    %c0_14 = arith.constant 0 : index
    %c0_15 = arith.constant 0 : index
    %29 = vector.load %arg6[%c0_14, %c0_15] : memref<2x3xf32, #tpu.memory_space<vmem>>, vector<2x3xf32>
    tpu.vector_store %arg6[%c0_14, %c0_15], %28 {strides = array<i32>} : memref<2x3xf32, #tpu.memory_space<vmem>>, vector<2x3xf32>,
    return
  }
  func.func @transform_0(%arg0: i32) -> (i32, i32) {
    %c0_i32 = arith.constant 0 : i32
    %c0_i32_0 = arith.constant 0 : i32
    return %arg0, %c0_i32 : i32, i32
  }
  func.func @transform_1(%arg0: i32) -> (i32, i32) {
    %c0_i32 = arith.constant 0 : i32
    %c0_i32_0 = arith.constant 0 : i32
    %c0_i32_1 = arith.constant 0 : i32
    return %c0_i32, %c0_i32_0 : i32, i32
  }
  func.func @transform_2(%arg0: i32) -> (i32, i32) {
    %c0_i32 = arith.constant 0 : i32
    %c0_i32_0 = arith.constant 0 : i32
    %c0_i32_1 = arith.constant 0 : i32
    return %c0_i32, %c0_i32_0 : i32, i32
  }
  func.func @transform_3(%arg0: i32) -> (i32, i32) {
    %c0_i32 = arith.constant 0 : i32
    %c0_i32_0 = arith.constant 0 : i32
    %c0_i32_1 = arith.constant 0 : i32
    return %c0_i32, %c0_i32_0 : i32, i32
  }
  func.func @transform_4(%arg0: i32) -> (i32, i32) {
    %c0_i32 = arith.constant 0 : i32
    %c0_i32_0 = arith.constant 0 : i32
    %c0_i32_1 = arith.constant 0 : i32
    return %c0_i32, %c0_i32_0 : i32, i32
  }
  func.func @transform_5(%arg0: i32) -> (i32, i32) {
    %c0_i32 = arith.constant 0 : i32
    %c0_i32_0 = arith.constant 0 : i32
    return %arg0, %c0_i32 : i32, i32
  }
}

</mosaic_0001>

<bundles_post_ra>
// kernel: tfc_forward.12
= control target key start
LH: loop header
LB: loop body
LE: loop exit
PB: predicated region body
PF: predicated region fallthrough
CT: control target
= control target key end

     0   :  { %s1002_s15 = smov 0   ;;  %s1004_s16 = smov 0   ;;  %s1139_s0 = inlined_call_operand.vmem [shape: bf16[18,256], index: 0, kind: input, shape index: {}]   ;;  %s1140_s1 = inlined_call_operand.vmem [shape: bf16[256,128], index: 1, kind: input, shape index: {}]   ;;  %s1141_s2 = inlined_call_operand.vmem [shape: f32[1,128], index: 2, kind: input, shape index: {}]   ;;  %s1142_s3 = inlined_call_operand.vmem [shape: f32[18,128], index: 3, kind: input, shape index: {}]   ;;  %s1143_s4 = inlined_call_operand.vmem [shape: f32[18,128], index: 4, kind: output, shape index: {}]  }
   0x1   :  { %s1006_s17 = smov 0  }
   0x2 LB: > { %s1015_s18 = sadd.s32 4294967295, %s943_s17   ;;  %s1017_s19 = sadd.s32 1, %s943_s17   ;;  %s943_s17 = sphi %s1006_s17, %s1147_s17   ;;  %s939_s16 = sphi %s1004_s16, %s1146_s16   ;;  %s935_s15 = sphi %s1002_s15, %s1145_s15  }
   0x3   : > { %s112_s20 = ssub.s32 %s943_s17, %s1017_s19  ;;  %s115_s21 = sadd.s32 1, %s939_s16 }
   0x4   : > { %p113_p0 = scmp.eq.s32.totalorder %s112_s20, 0  ;;  %p125_p1 = scmp.ne.s32.totalorder %s939_s16, %s935_s15 }
   0x5   : > { %p126_p2 = scmp.eq.s32.totalorder %s1015_s18, 1  ;;  %p682_p3 = scmp.ge.s32.totalorder %s943_s17, 1 }
   0x6   : > { %s1025_s22 = scalar_select %p113_p0, %s939_s16, %s115_s21  }
   0x7   : > { %p1027_p4 = por %p126_p2, %p125_p1  ;;  %p193_p5 = scmp.lt.s32.totalorder %s943_s17, 3 }
   0x9   : > { %p194_p6 = pnand %p682_p3, %p193_p5 }
   0xa   : > { %s1050_s10 = sshll.u32 (!%p194_p6), %s1015_s18, 1 }
   0xb   : > { %197 = sbr.rel (%p194_p6) target bundleno = 228 (0xe4), region = 36  ;;  %p239_p7 = scmp.lt.s32.totalorder (!%p194_p6), %s1050_s10, 2 }
  0x10   : > { %v788_v0 = vld [vmem:[%s1140_s1 + $0x38] sm:$0xff]  ;;  %v787_v2 = vld [vmem:[%s1140_s1 + $0x30] sm:$0xff]  ;;  %v786_v4 = vld [vmem:[%s1140_s1 + $0x28] sm:$0xff]  ;;  %s240_s25 = scalar_select %p239_p7, %s1050_s10, 2 }
  0x11   : > { %v796_v1 = vld [vmem:[%s1140_s1 + $0x78] sm:$0xff]  ;;  %413 = vmatpush.bf16.msra.mxu0 %v788_v0  ;;  %v795_v3 = vld [vmem:[%s1140_s1 + $0x70] sm:$0xff]  ;;  %v794_v5 = vld [vmem:[%s1140_s1 + $0x68] sm:$0xff] }
  0x12   : > { %427 = vmatpush.bf16.msra.mxu1 %v796_v1  ;;  %v785_v6 = vld [vmem:[%s1140_s1 + $0x20] sm:$0xff]  ;;  %v784_v8 = vld [vmem:[%s1140_s1 + $0x18] sm:$0xff]  ;;  %v783_v10 = vld [vmem:[%s1140_s1 + $0x10] sm:$0xff]  ;;  %s778_s30 = sshll.u32 %s240_s25, 3  ;;  %s230_s25 = sand.u32 1, %s935_s15  }
  0x13   : > { %v793_v7 = vld [vmem:[%s1140_s1 + $0x60] sm:$0xff]  ;;  %v792_v9 = vld [vmem:[%s1140_s1 + $0x58] sm:$0xff]  ;;  %v791_v11 = vld [vmem:[%s1140_s1 + $0x50] sm:$0xff]  ;;  %s243_s12 = scalar_lea.vmem %s1139_s0, %s778_s30  ;;  %s258_s28 = scalar_lea.vmem %s1142_s3, %s778_s30 }
  0x14   : > { %v782_v12 = vld [vmem:[%s1140_s1 + $0x8] sm:$0xff]  ;;  %v781_v14 = vld [vmem:[%s1140_s1] sm:$0xff]  ;;  %s683_s29 = sshll.u32 %s230_s25, 4  ;;  %s455_s15 = ssub.s32 (%p1027_p4), 3, %s1050_s10 }
  0x15   : > { %414 = vmatpush.bf16.msra.mxu0 %v787_v2  ;;  %v790_v13 = vld [vmem:[%s1140_s1 + $0x48] sm:$0xff]  ;;  %v789_v15 = vld [vmem:[%s1140_s1 + $0x40] sm:$0xff]  ;;  %s1094_s5 = scalar_lea.vmem [#allocation2], %s683_s29   ;;  %s797_s30 = sshll.u32 (%p1027_p4), %s1015_s18, 4 }
  0x16   : > { %428 = vmatpush.bf16.msra.mxu1 %v795_v3  ;;  %v691_v16 = vld [vmem:[%s243_s12] sm:$0xf]  ;;  %v780_v17 = vld [vmem:[%s243_s12 + $0x4] sm:$0xf0]  ;;  %v779_v18 = vld [vmem:[%s243_s12 + $0x4] sm:$0xf]  ;;  %s1105_s8 = scalar_lea.vmem (%p1027_p4), %s1143_s4, %s797_s30  }
  0x17   : > { %v693_v19 = vld [vmem:[%s243_s12 + $0x8] sm:$0xf0]  ;;  %v692_v20 = vor.u32 %v780_v17, %v691_v16  ;;  %v888_v22 = vld [vmem:[%s1141_s2] ss:$0 sm:$0xff]  ;;  %p456_p8 = scmp.lt.s32.totalorder (%p1027_p4), %s455_s15, 2 }
  0x18   : > { %v696_v21 = vor.u32 %v779_v18, %v693_v19  ;;  %v441_v26 = vld [vmem:[%s258_s28] sm:$0xff]  ;;  %v442_v32 = vld [vmem:[%s258_s28 + $0x8] sm:$0xff] }
  0x19   : > { %415 = vmatpush.bf16.msra.mxu0 %v786_v4 }
  0x1a   : > { %429 = vmatpush.bf16.msra.mxu1 %v794_v5 }
  0x1d   : > { %416 = vmatpush.bf16.msra.mxu0 %v785_v6 }
  0x1e   : > { %430 = vmatpush.bf16.msra.mxu1 %v793_v7 }
  0x21   : > { %417 = vmatpush.bf16.msra.mxu0 %v784_v8 }
  0x22   : > { %431 = vmatpush.bf16.msra.mxu1 %v792_v9 }
  0x25   : > { %418 = vmatpush.bf16.msra.mxu0 %v783_v10 }
  0x26   : > { %432 = vmatpush.bf16.msra.mxu1 %v791_v11 }
  0x29   : > { %419 = vmatpush.bf16.msra.mxu0 %v782_v12 }
  0x2a   : > { %433 = vmatpush.bf16.msra.mxu1 %v790_v13 }
  0x2d   : > { %420 = vmatpush.bf16.msra.mxu0 %v781_v14 }
  0x2e   : > { %434 = vmatpush.bf16.msra.mxu1 %v789_v15 }
  0x30   : > { %421 = vmatmul.bf16.vlgmr.msra.gmra.mxu0 %v692_v20 }
  0x31   : > { %435 = vmatmul.bf16.vlgmr.msra.gmra.mxu1 %v696_v21 }
  0xad   : > { %v422_v23 = vpop.f32.mrf.mxu0 }
  0xae   : > { %v436_v24 = vpop.f32.mrf.mxu1  ;;  %v423_v25 = vadd.f32 %v888_v22, %v422_v23 }
  0xb0   : > { %v437_v27 = vadd.f32 %v436_v24, %v423_v25 }
  0xb2   : > { %v443_v28 = vadd.f32 %v441_v26, %v437_v27 }
  0xb4   : > { %445 = vst [vmem:[%s1094_s5] sm:$0xff] %v443_v28 }
  0xb5   : > { %v424_v29 = vpop.f32.mrf.mxu0 }
  0xb6   : > { %v425_v30 = vadd.f32 %v888_v22, %v424_v29  ;;  %v438_v31 = vpop.f32.mrf.mxu1 }
  0xb8   : > { %v439_v33 = vadd.f32 %v438_v31, %v425_v30  ;;  %453 = sbr.rel (!%p1027_p4) target bundleno = 228 (0xe4), region = 40 }
  0xba   : > { %v444_v34 = vadd.f32 %v442_v32, %v439_v33 }
  0xbc   : > { %446 = vst [vmem:[%s1094_s5 + $0x8] sm:$0xff] %v444_v34 }
  0xbd   : > { %s1149_s15 = smov (!%p456_p8, %s455_s15), 2 }
  0xbe   : > { %s763_s9 = sshll.u32 %s1149_s15, 3 }
  0xbf   : > { %p766_p9 = scmp.eq.s32.totalorder %s763_s9, 0 }
  0xc0   : > { %s1111_s11 = sshrl.u32 (!%p766_p9), %s1149_s15, 1 }
  0xc1   : > { %464 = sbr.rel (%p766_p9) target bundleno = 228 (0xe4), region = 44  ;;  %p767_p10 = scmp.le.s32.totalorder (!%p766_p9), %s1111_s11, 0 }
  0xc6   : > { %629 = sbr.rel (%p767_p10) target bundleno = 211 (0xd3), region = 123  ;;  %s945_s18 = smov (!%p767_p10), %s1105_s8  }
  0xc7   : > { %s949_s23 = smov (!%p767_p10), %s1094_s5   ;;  %s953_s10 = smov (!%p767_p10), 0  }
  0xc8   : > { %s957_s12 = smov (!%p767_p10), 0  }
  0xcb LB: >> { %v529_v35 = vld [vmem:[%s951_s23] sm:$0xff]  ;;  %v531_v36 = vld [vmem:[%s951_s23 + $0x8] sm:$0xff]  ;;  %s533_s13 = sadd.s32 1, %s955_s10  ;;  %s523_s12 = sadd.s32 1, %s959_s12   ;;  %s959_s12 = sphi %s957_s12, %s523_s12   ;;  %s955_s10 = sphi %s953_s10, %s954_s10   ;;  %s951_s23 = sphi %s949_s23, %s538_s23   ;;  %s947_s18 = sphi %s945_s18, %s539_s18  }
  0xcc   : >> { %530 = vst [vmem:[%s947_s18] sm:$0xff] %v529_v35  ;;  %p534_p11 = scmp.ge.s32.totalorder %s533_s13, %s1111_s11  ;;  %p522_p12 = scmp.ge.s32.totalorder %s523_s12, %s1111_s11 }
  0xcd   : >> { %532 = vst [vmem:[%s947_s18 + $0x8] sm:$0xff] %v531_v36 }
  0xce   : >> { %s1151_s13 = smov (%p534_p11, %s533_s13), 0  ;;  %525 = sbr.rel (!%p522_p12) target bundleno = 203 (0xcb), region = 129 }
  0xcf   : >> { %s768_s14 = sshll.u32 %s1151_s13, 4  ;;  %s954_s10 = smov %s1151_s13  }
  0xd0   : >> { %s538_s23 = scalar_lea.vmem %s1094_s5, %s768_s14 [#allocation2]   ;;  %s539_s18 = scalar_lea.vmem %s1105_s8, %s768_s14  }
  0xd3 PF: > { %s1121_s17 = sand.u32 1, %s1149_s15   ;;  %s798_s20 = sshll.u32 %s1111_s11, 4 }
  0xd4   : > { %s544_s21 = scalar_lea.vmem %s1094_s5, %s798_s20 [#allocation2]   ;;  %s546_s24 = scalar_lea.vmem %s1105_s8, %s798_s20  }
  0xd5   : > { %p773_p13 = scmp.le.s32.totalorder %s1121_s17, 0 }
  0xd6   : > { %s961_s25 = smov (!%p773_p13), %s546_s24   ;;  %s965_s26 = smov (!%p773_p13), %s544_s21  }
  0xd7   : > { %643 = sbr.rel (%p773_p13) target bundleno = 228 (0xe4), region = 134  ;;  %s969_s27 = smov (!%p773_p13), 0  }
  0xd8   : > { %s973_s28 = smov (!%p773_p13), 0  }
  0xdc LB: >> { %v556_v37 = vld [vmem:[%s967_s26] sm:$0xff]  ;;  %s558_s29 = sadd.s32 1, %s971_s27  ;;  %s550_s28 = sadd.s32 1, %s975_s28   ;;  %s975_s28 = sphi %s973_s28, %s550_s28   ;;  %s971_s27 = sphi %s969_s27, %s970_s27   ;;  %s967_s26 = sphi %s965_s26, %s563_s26   ;;  %s963_s25 = sphi %s961_s25, %s564_s25  }
  0xdd   : >> { %557 = vst [vmem:[%s963_s25] sm:$0xff] %v556_v37  ;;  %p559_p0 = scmp.ge.s32.totalorder %s558_s29, %s1121_s17  ;;  %p549_p1 = scmp.ge.s32.totalorder %s550_s28, %s1121_s17 }
  0xdf   : >> { %s1153_s29 = smov (%p559_p0, %s558_s29), 0  ;;  %552 = sbr.rel (!%p549_p1) target bundleno = 220 (0xdc), region = 140 }
  0xe0   : >> { %s774_s5 = sshll.u32 %s1153_s29, 3  ;;  %s970_s27 = smov %s1153_s29  }
  0xe1   : >> { %s563_s26 = scalar_lea.vmem %s544_s21, %s774_s5 [#allocation2]   ;;  %s564_s25 = scalar_lea.vmem %s546_s24, %s774_s5  }
  0xe4 PF: > { %p11_p2 = scmp.ge.s32.totalorder %s1017_s19, 4   ;;  %s1145_s15 = smov %s939_s16 }
  0xe5   : > { %s1146_s16 = smov %s1025_s22  ;;  %s1147_s17 = smov %s1017_s19 }
  0xe6   :  { %13 = sbr.rel (!%p11_p2) target bundleno = 2 (0x2), region = 151 }

// kernel: tfc_forward.11
= control target key start
LH: loop header
LB: loop body
LE: loop exit
PB: predicated region body
PF: predicated region fallthrough
CT: control target
= control target key end

     0   :  { %s1168_s18 = smov 0   ;;  %s1170_s19 = smov 0   ;;  %s1429_s0 = inlined_call_operand.vmem [shape: f32[18,128], index: 0, kind: input, shape index: {}]   ;;  %s1430_s1 = inlined_call_operand.vmem [shape: f32[1,128], index: 1, kind: input, shape index: {}]   ;;  %s1431_s2 = inlined_call_operand.vmem [shape: f32[1,128], index: 2, kind: input, shape index: {}]   ;;  %s1432_s3 = inlined_call_operand.vmem [shape: bf16[128,256], index: 3, kind: input, shape index: {}]   ;;  %s1433_s4 = inlined_call_operand.vmem [shape: f32[1,256], index: 4, kind: input, shape index: {}]   ;;  %s1434_s5 = inlined_call_operand.vmem [shape: bf16[18,256], index: 5, kind: output, shape index: {}]  }
   0x1   :  { %s1172_s20 = smov 0  }
   0x2 LB: > { %s1181_s21 = sadd.s32 4294967295, %s1103_s20   ;;  %s1183_s22 = sadd.s32 1, %s1103_s20   ;;  %s1103_s20 = sphi %s1172_s20, %s1438_s20   ;;  %s1099_s19 = sphi %s1170_s19, %s1437_s19   ;;  %s1095_s18 = sphi %s1168_s18, %s1436_s18  }
   0x3   : > { %s129_s23 = ssub.s32 %s1103_s20, %s1183_s22  ;;  %s132_s24 = sadd.s32 1, %s1099_s19 }
   0x4   : > { %p130_p0 = scmp.eq.s32.totalorder %s129_s23, 0  ;;  %p142_p1 = scmp.ne.s32.totalorder %s1099_s19, %s1095_s18 }
   0x5   : > { %p143_p2 = scmp.eq.s32.totalorder %s1181_s21, 1  ;;  %p828_p3 = scmp.ge.s32.totalorder %s1103_s20, 1 }
   0x6   : > { %s1191_s25 = scalar_select %p130_p0, %s1099_s19, %s132_s24  }
   0x7   : > { %p1193_p4 = por %p143_p2, %p142_p1  ;;  %p196_p5 = scmp.lt.s32.totalorder %s1103_s20, 3 }
   0x9   : > { %p197_p6 = pnand %p828_p3, %p196_p5 }
   0xa   : > { %s1198_s27 = sshll.u32 (!%p197_p6), %s1181_s21, 1  ;;  %s224_s6 = sand.u32 (!%p197_p6), 1, %s1095_s18  }
   0xb   : > { %200 = sbr.rel (%p197_p6) target bundleno = 530 (0x212), region = 40  ;;  %p232_p7 = scmp.lt.s32.totalorder (!%p197_p6), %s1198_s27, 2 }
  0x10   : > { %s233_s28 = scalar_select %p232_p7, %s1198_s27, 2  ;;  %v1137_v2 = vmov 128.0   ;;  %v890_v17 = vld [vmem:[%s1432_s3 + $0x70] sm:$0xf]  ;;  %v930_v18 = vld [vmem:[%s1432_s3 + $0x74] sm:$0xf0] }
  0x11   : > { %1027 = vrcp.f32 %v1137_v2  ;;  %v929_v19 = vld [vmem:[%s1432_s3 + $0x74] sm:$0xf]  ;;  %v891_v20 = vor.u32 %v930_v18, %v890_v17  ;;  %v892_v21 = vld [vmem:[%s1432_s3 + $0x78] sm:$0xf0]  ;;  %v882_v23 = vld [vmem:[%s1432_s3 + $0x60] sm:$0xf] }
  0x12   : > { %s831_s29 = sshll.u32 %s233_s28, 3  ;;  %v895_v22 = vor.u32 %v929_v19, %v892_v21  ;;  %v928_v24 = vld [vmem:[%s1432_s3 + $0x64] sm:$0xf0]  ;;  %v927_v25 = vld [vmem:[%s1432_s3 + $0x64] sm:$0xf]  ;;  %s611_s8 = ssub.s32 (%p1193_p4), 3, %s1198_s27 }
  0x13   : > { %s235_s7 = scalar_lea.vmem %s1429_s0, %s831_s29  ;;  %411 = vmatpush.bf16.msra.mxu0 %v891_v20  ;;  %v883_v26 = vor.u32 %v928_v24, %v882_v23  ;;  %v884_v27 = vld [vmem:[%s1432_s3 + $0x68] sm:$0xf0]  ;;  %v874_v29 = vld [vmem:[%s1432_s3 + $0x50] sm:$0xf]  ;;  %v926_v30 = vld [vmem:[%s1432_s3 + $0x54] sm:$0xf0] }
  0x14   : > { %v247_v0 = vld [vmem:[%s235_s7] sm:$0xff]  ;;  %v248_v1 = vld [vmem:[%s235_s7 + $0x8] sm:$0xff]  ;;  %425 = vmatpush.bf16.msra.mxu1 %v895_v22  ;;  %v887_v28 = vor.u32 %v927_v25, %v884_v27  ;;  %v925_v31 = vld [vmem:[%s1432_s3 + $0x54] sm:$0xf]  ;;  %v875_v32 = vor.u32 %v926_v30, %v874_v29  ;;  %s829_s7 = sshll.u32 %s224_s6, 4  ;;  %s933_s9 = sshll.u32 (%p1193_p4), %s1181_s21, 4 }
  0x15   : > { %249 = vadd.xlane.f32.xlu0 %v247_v0  ;;  %v876_v33 = vld [vmem:[%s1432_s3 + $0x58] sm:$0xf0]  ;;  %v866_v35 = vld [vmem:[%s1432_s3 + $0x40] sm:$0xf]  ;;  %v924_v36 = vld [vmem:[%s1432_s3 + $0x44] sm:$0xf0]  ;;  %s1395_s12 = scalar_lea.vmem (%p1193_p4), %s1434_s5, %s933_s9  }
  0x16   : > { %v879_v34 = vor.u32 %v925_v31, %v876_v33  ;;  %v923_v37 = vld [vmem:[%s1432_s3 + $0x44] sm:$0xf]  ;;  %v867_v38 = vor.u32 %v924_v36, %v866_v35  ;;  %v868_v39 = vld [vmem:[%s1432_s3 + $0x48] sm:$0xf0]  ;;  %v858_v41 = vld [vmem:[%s1432_s3 + $0x30] sm:$0xf] }
  0x17   : > { %v1028_v3 = vpop.eup %1027  ;;  %412 = vmatpush.bf16.msra.mxu0 %v883_v26  ;;  %v871_v40 = vor.u32 %v923_v37, %v868_v39  ;;  %v922_v42 = vld [vmem:[%s1432_s3 + $0x34] sm:$0xf0]  ;;  %v921_v43 = vld [vmem:[%s1432_s3 + $0x34] sm:$0xf]  ;;  %v860_v45 = vld [vmem:[%s1432_s3 + $0x38] sm:$0xf0] }
  0x18   : > { %v254_v4 = vmul.f32 128.0, %v1028_v3  ;;  %vm258_vm0 = vweird.f32 %v1028_v3  ;;  %426 = vmatpush.bf16.msra.mxu1 %v887_v28  ;;  %v859_v44 = vor.u32 %v922_v42, %v858_v41  ;;  %v863_v46 = vor.u32 %v921_v43, %v860_v45  ;;  %v850_v47 = vld [vmem:[%s1432_s3 + $0x20] sm:$0xf]  ;;  %v920_v48 = vld [vmem:[%s1432_s3 + $0x24] sm:$0xf0]  ;;  %s1380_s18 = scalar_lea.vmem [#allocation2], %s829_s7  }
  0x19   : > { %v919_v49 = vld [vmem:[%s1432_s3 + $0x24] sm:$0xf]  ;;  %v851_v50 = vor.u32 %v920_v48, %v850_v47  ;;  %v852_v51 = vld [vmem:[%s1432_s3 + $0x28] sm:$0xf0]  ;;  %v842_v53 = vld [vmem:[%s1432_s3 + $0x10] sm:$0xf] }
  0x1a   : > { %v255_v5 = vsub.f32 1.0, %v254_v4  ;;  %v855_v52 = vor.u32 %v919_v49, %v852_v51  ;;  %v918_v54 = vld [vmem:[%s1432_s3 + $0x14] sm:$0xf0]  ;;  %v917_v55 = vld [vmem:[%s1432_s3 + $0x14] sm:$0xf]  ;;  %p612_p8 = scmp.lt.s32.totalorder (%p1193_p4), %s611_s8, 2 }
  0x1b   : > { %413 = vmatpush.bf16.msra.mxu0 %v875_v32  ;;  %v843_v56 = vor.u32 %v918_v54, %v842_v53  ;;  %v844_v57 = vld [vmem:[%s1432_s3 + $0x18] sm:$0xf0]  ;;  %v834_v58 = vld [vmem:[%s1432_s3] sm:$0xf]  ;;  %v916_v59 = vld [vmem:[%s1432_s3 + $0x4] sm:$0xf0] }
  0x1c   : > { %v256_v6 = vmul.f32 %v1028_v3, %v255_v5  ;;  %427 = vmatpush.bf16.msra.mxu1 %v879_v34  ;;  %v847_v60 = vor.u32 %v917_v55, %v844_v57  ;;  %v915_v61 = vld [vmem:[%s1432_s3 + $0x4] sm:$0xf]  ;;  %v836_v62 = vld [vmem:[%s1432_s3 + $0x8] sm:$0xf0]  ;;  %v1025_v22 = vld [vmem:[%s1430_s1] ss:$0 sm:$0xff] }
  0x1d   : > { %251 = vadd.xlane.f32.xlu0 %v248_v1  ;;  %v839_v2 = vor.u32 %v915_v61, %v836_v62  ;;  %v1026_v27 = vld [vmem:[%s1431_s2] ss:$0 sm:$0xff] }
  0x1e   : > { %v257_v7 = vadd.f32 %v1028_v3, %v256_v6 }
  0x1f   : > { %414 = vmatpush.bf16.msra.mxu0 %v867_v38 }
  0x20   : > { %v1205_v8 = vsel %vm258_vm0, %v1028_v3, %v257_v7  ;;  %428 = vmatpush.bf16.msra.mxu1 %v871_v40 }
  0x23   : > { %415 = vmatpush.bf16.msra.mxu0 %v859_v44 }
  0x24   : > { %429 = vmatpush.bf16.msra.mxu1 %v863_v46 }
  0x27   : > { %416 = vmatpush.bf16.msra.mxu0 %v851_v50 }
  0x28   : > { %430 = vmatpush.bf16.msra.mxu1 %v855_v52 }
  0x2b   : > { %417 = vmatpush.bf16.msra.mxu0 %v843_v56 }
  0x2c   : > { %431 = vmatpush.bf16.msra.mxu1 %v847_v60 }
  0x30   : > { %432 = vmatpush.bf16.msra.mxu1 %v839_v2 }
  0x88   : > { %v250_v9 = vpop.xlane.xlu0 %249 }
  0x89   : > { %v260_v10 = vmul.f32 %v1205_v8, %v250_v9 }
  0x8b   : > { %v1208_v11 = vsub.f32 %v247_v0, %v260_v10  ;;  %v835_v0 = vor.u32 %v916_v59, %v834_v58 }
  0x8d   : > { %v264_v12 = vmul.f32 %v1208_v11, %v1208_v11  ;;  %418 = vmatpush.bf16.msra.mxu0 %v835_v0 }
  0x8f   : > { %266 = vadd.xlane.f32.xlu1 %v264_v12 }
  0x90   : > { %v252_v13 = vpop.xlane.xlu0 %251 }
  0x91   : > { %v261_v14 = vmul.f32 %v1205_v8, %v252_v13 }
  0x93   : > { %v1213_v15 = vsub.f32 %v248_v1, %v261_v14 }
  0x95   : > { %v265_v16 = vmul.f32 %v1213_v15, %v1213_v15 }
  0x97   : > { %268 = vadd.xlane.f32.xlu1 %v265_v16 }
 0x102   : > { %v267_v63 = vpop.xlane.xlu1 %266 }
 0x103   : > { %v270_v1 = vmul.f32 %v267_v63, %v1205_v8 }
 0x105   : > { %v272_v3 = vadd.f32 1e-05, %v270_v1 }
 0x107   : > { %1029 = vrsqrt.f32 %v272_v3  ;;  %vm280_vm2 = vweird.f32 %v272_v3 }
 0x10a   : > { %v269_v4 = vpop.xlane.xlu1 %268 }
 0x10b   : > { %v271_v5 = vmul.f32 %v269_v4, %v1205_v8 }
 0x10d   : > { %v1030_v6 = vpop.eup %1029  ;;  %v273_v7 = vadd.f32 1e-05, %v271_v5 }
 0x10e   : > { %v275_v9 = vmul.f32 %v1030_v6, %v272_v3  ;;  %vm281_vm1 = vweird.f32 %v1030_v6 }
 0x10f   : > { %1031 = vrsqrt.f32 %v273_v7  ;;  %vm282_vm3 = vmor %vm280_vm2, %vm281_vm1  ;;  %vm290_vm5 = vweird.f32 %v273_v7 }
 0x110   : > { %v276_v10 = vmul.f32 %v1030_v6, %v275_v9 }
 0x112   : > { %v277_v12 = vmul.f32 0.5, %v276_v10 }
 0x114   : > { %v278_v13 = vsub.f32 1.5, %v277_v12 }
 0x115   : > { %v1032_v14 = vpop.eup %1031 }
 0x116   : > { %v279_v16 = vmul.f32 %v1030_v6, %v278_v13  ;;  %v285_v17 = vmul.f32 %v1032_v14, %v273_v7  ;;  %vm291_vm4 = vweird.f32 %v1032_v14 }
 0x117   : > { %vm292_vm6 = vmor %vm290_vm5, %vm291_vm4 }
 0x118   : > { %v286_v18 = vmul.f32 %v1032_v14, %v285_v17  ;;  %v283_v20 = vsel %vm282_vm3, %v1030_v6, %v279_v16 }
 0x119   : > { %v294_v8 = vmul.f32 %v283_v20, %v1208_v11  ;;  %v325_v11 = vld [vmem:[%s1433_s4] sm:$0x3] }
 0x11a   : > { %v287_v19 = vmul.f32 0.5, %v286_v18  ;;  %v327_v32 = vperm.slane %v325_v11, 0  ;;  %v328_v33 = vperm.slane %v325_v11, 1 }
 0x11b   : > { %v300_v26 = vmul.f32 %v1025_v22, %v294_v8 }
 0x11c   : > { %v288_v21 = vsub.f32 1.5, %v287_v19 }
 0x11d   : > { %v306_v29 = vadd.f32 %v1026_v27, %v300_v26 }
 0x11e   : > { %v289_v23 = vmul.f32 %v1032_v14, %v288_v21 }
 0x120   : > { %v293_v24 = vsel %vm292_vm6, %v1032_v14, %v289_v23 }
 0x121   : > { %v295_v25 = vmul.f32 %v293_v24, %v1213_v15 }
 0x123   : > { %v301_v28 = vmul.f32 %v1025_v22, %v295_v25 }
 0x125   : > { %v307_v30 = vadd.f32 %v1026_v27, %v301_v28 }
 0x127   : > { %v308_v31 = vpack.c.bf16 %v307_v30, %v306_v29 }
 0x129   : > { %419 = vmatmul.bf16.vlgmr.msra.gmra.mxu0 %v308_v31  ;;  %433 = vmatmul.bf16.vlgmr.msra.gmra.mxu1 %v308_v31 }
 0x1a6   : > { %v420_v34 = vpop.f32.mrf.mxu0  ;;  %v434_v35 = vpop.f32.mrf.mxu1 }
 0x1a7   : > { %v1326_v15 = vadd.f32 %v420_v34, %v327_v32  ;;  %v1328_v36 = vadd.f32 %v434_v35, %v328_v33 }
 0x1a9   : > { %v1331_v37 = vmul.f32 0.70710677, %v1326_v15  ;;  %v1334_v38 = vmul.f32 0.70710677, %v1328_v36 }
 0x1ab   : > { %v447_v39 = vand.u32 2147483647, %v1331_v37  ;;  %v448_v40 = vand.u32 2147483647, %v1334_v38 }
 0x1ad   : > { %v451_v41 = vmul.f32 0.3275911, %v447_v39  ;;  %v452_v42 = vmul.f32 0.3275911, %v448_v40  ;;  %v555_v51 = vsub.f32 0.0, %v447_v39  ;;  %v556_v62 = vsub.f32 0.0, %v448_v40 }
 0x1ae   : > { %v422_v43 = vpop.f32.mrf.mxu0  ;;  %v436_v44 = vpop.f32.mrf.mxu1 }
 0x1af   : > { %v455_v45 = vadd.f32 1.0, %v451_v41  ;;  %v456_v46 = vadd.f32 1.0, %v452_v42  ;;  %v1338_v47 = vadd.f32 %v422_v43, %v327_v32  ;;  %v1340_v48 = vadd.f32 %v436_v44, %v328_v33 }
 0x1b0   : > { %v559_v61 = vmul.f32 %v555_v51, %v447_v39  ;;  %v560_v16 = vmul.f32 %v556_v62, %v448_v40 }
 0x1b1   : > { %1033 = vrcp.f32 %v455_v45  ;;  %v1343_v49 = vmul.f32 0.70710677, %v1338_v47  ;;  %v1346_v50 = vmul.f32 0.70710677, %v1340_v48  ;;  %v468_v0 = vand.u32 2147483647, %v455_v45 }
 0x1b2   : > { %1035 = vrcp.f32 %v456_v46  ;;  %v470_v1 = vand.u32 2147483648, %v455_v45  ;;  %v485_v5 = vand.u32 2147483648, %v456_v46  ;;  %v483_v7 = vand.u32 2147483647, %v456_v46 }
 0x1b3   : > { %v1349_v52 = vand.u32 2147483647, %v1343_v49  ;;  %v1352_v54 = vand.u32 2147483647, %v1346_v50  ;;  %vm464_vm9 = vweird.f32 %v455_v45  ;;  %vm479_vm11 = vweird.f32 %v456_v46 }
 0x1b4   : > { %v471_v10 = vor.u32 1.1754944e-38, %v470_v1  ;;  %vm469_vm12 = vcmp.eq.f32.partialorder %v468_v0, 8.507059e+37  ;;  %v486_v14 = vor.u32 1.1754944e-38, %v485_v5  ;;  %v563_v18 = vmul.f32 1.442695, %v559_v61 }
 0x1b5   : > { %v453_v57 = vmul.f32 0.3275911, %v1349_v52  ;;  %v454_v59 = vmul.f32 0.3275911, %v1352_v54  ;;  %vm484_vm14 = vcmp.eq.f32.partialorder %v483_v7, 8.507059e+37  ;;  %v557_v44 = vsub.f32 0.0, %v1349_v52 }
 0x1b6   : > { %v565_v28 = vmul.f32 1.442695, %v560_v16  ;;  %v558_v0 = vsub.f32 0.0, %v1352_v54 }
 0x1b7   : > { %v1034_v53 = vpop.eup %1033  ;;  %v1356_v63 = vadd.f32 1.0, %v453_v57  ;;  %v1358_v3 = vadd.f32 1.0, %v454_v59 }
 0x1b8   : > { %v1036_v55 = vpop.eup %1035  ;;  %v460_v56 = vmul.f32 %v1034_v53, %v455_v45  ;;  %vm465_vm7 = vweird.f32 %v1034_v53 }
 0x1b9   : > { %v475_v58 = vmul.f32 %v1036_v55, %v456_v46  ;;  %1037 = vrcp.f32 %v1356_v63  ;;  %vm480_vm8 = vweird.f32 %v1036_v55  ;;  %vm466_vm10 = vmor %vm464_vm9, %vm465_vm7  ;;  %v498_v31 = vand.u32 2147483647, %v1356_v63 }
 0x1ba   : > { %v461_v60 = vsub.f32 1.0, %v460_v56  ;;  %1039 = vrcp.f32 %v1358_v3  ;;  %vm481_vm13 = vmor %vm479_vm11, %vm480_vm8  ;;  %v500_v11 = vand.u32 2147483648, %v1356_v63  ;;  %v515_v35 = vand.u32 2147483648, %v1358_v3 }
 0x1bb   : > { %v476_v2 = vsub.f32 1.0, %v475_v58  ;;  %1041 = vpow2.f32 %v563_v18  ;;  %v513_v41 = vand.u32 2147483647, %v1358_v3  ;;  %vm494_vm1 = vweird.f32 %v1356_v63 }
 0x1bc   : > { %v462_v4 = vmul.f32 %v1034_v53, %v461_v60  ;;  %v501_v46 = vor.u32 1.1754944e-38, %v500_v11  ;;  %vm509_vm3 = vweird.f32 %v1358_v3  ;;  %vm499_vm4 = vcmp.eq.f32.partialorder %v498_v31, 8.507059e+37 }
 0x1bd   : > { %v477_v6 = vmul.f32 %v1036_v55, %v476_v2  ;;  %v516_v57 = vor.u32 1.1754944e-38, %v515_v35  ;;  %vm514_vm6 = vcmp.eq.f32.partialorder %v513_v41, 8.507059e+37  ;;  %1043 = vpow2.f32 %v565_v28 }
 0x1be   : > { %v463_v9 = vadd.f32 %v1034_v53, %v462_v4  ;;  %vm579_vm7 = vcmp.lt.f32.partialorder %v1331_v37, 0.0  ;;  %vm580_vm8 = vcmp.lt.f32.partialorder %v1334_v38, 0.0  ;;  %v439_v11 = vmul.f32 0.5, %v1326_v15 }
 0x1bf   : > { %v478_v12 = vadd.f32 %v1036_v55, %v477_v6  ;;  %v1038_v20 = vpop.eup %1037  ;;  %v561_v6 = vmul.f32 %v557_v44, %v1349_v52  ;;  %v440_v35 = vmul.f32 0.5, %v1328_v36  ;;  %vm581_vm9 = vcmp.lt.f32.partialorder %v1343_v49, 0.0 }
 0x1c0   : > { %v467_v13 = vsel %vm466_vm10, %v1034_v53, %v463_v9  ;;  %v1040_v22 = vpop.eup %1039  ;;  %v490_v24 = vmul.f32 %v1038_v20, %v1356_v63  ;;  %vm495_vm15 = vweird.f32 %v1038_v20  ;;  %vm582_vm10 = vcmp.lt.f32.partialorder %v1346_v50, 0.0 }
 0x1c1   : > { %v472_v17 = vsel %vm469_vm12, %v471_v10, %v467_v13  ;;  %v482_v19 = vsel %vm481_vm13, %v1036_v55, %v478_v12  ;;  %v505_v26 = vmul.f32 %v1040_v22, %v1358_v3  ;;  %vm510_vm0 = vweird.f32 %v1040_v22  ;;  %vm496_vm2 = vmor %vm494_vm1, %vm495_vm15  ;;  %v1042_v53 = vpop.eup %1041 }
 0x1c2   : > { %v519_v21 = vmul.f32 1.0614054, %v472_v17  ;;  %v487_v8 = vsel %vm484_vm14, %v486_v14, %v482_v19  ;;  %v491_v29 = vsub.f32 1.0, %v490_v24  ;;  %vm511_vm5 = vmor %vm509_vm3, %vm510_vm0  ;;  %v562_v12 = vmul.f32 %v558_v0, %v1352_v54 }
 0x1c3   : > { %v520_v23 = vmul.f32 1.0614054, %v487_v8  ;;  %v506_v32 = vsub.f32 1.0, %v505_v26  ;;  %v1044_v19 = vpop.eup %1043 }
 0x1c4   : > { %v523_v25 = vadd.f32 -1.4531521, %v519_v21  ;;  %v492_v34 = vmul.f32 %v1038_v20, %v491_v29  ;;  %v567_v21 = vmul.f32 1.442695, %v561_v6 }
 0x1c5   : > { %v524_v27 = vadd.f32 -1.4531521, %v520_v23  ;;  %v507_v40 = vmul.f32 %v1040_v22, %v506_v32 }
 0x1c6   : > { %v527_v30 = vmul.f32 %v523_v25, %v472_v17  ;;  %v493_v43 = vadd.f32 %v1038_v20, %v492_v34  ;;  %v569_v25 = vmul.f32 1.442695, %v562_v12  ;;  %1045 = vpow2.f32 %v567_v21 }
 0x1c7   : > { %v528_v33 = vmul.f32 %v524_v27, %v487_v8  ;;  %v508_v51 = vadd.f32 %v1040_v22, %v507_v40 }
 0x1c8   : > { %v531_v39 = vadd.f32 1.4214138, %v527_v30  ;;  %v497_v56 = vsel %vm496_vm2, %v1038_v20, %v493_v43  ;;  %1047 = vpow2.f32 %v569_v25 }
 0x1c9   : > { %v532_v42 = vadd.f32 1.4214138, %v528_v33  ;;  %v502_v59 = vsel %vm499_vm4, %v501_v46, %v497_v56  ;;  %v512_v60 = vsel %vm511_vm5, %v1040_v22, %v508_v51 }
 0x1ca   : > { %v535_v45 = vmul.f32 %v531_v39, %v472_v17  ;;  %v521_v62 = vmul.f32 1.0614054, %v502_v59  ;;  %v517_v63 = vsel %vm514_vm6, %v516_v57, %v512_v60  ;;  %v441_v57 = vmul.f32 0.5, %v1338_v47 }
 0x1cb   : > { %v536_v55 = vmul.f32 %v532_v42, %v487_v8  ;;  %v522_v2 = vmul.f32 1.0614054, %v517_v63  ;;  %v442_v60 = vmul.f32 0.5, %v1340_v48 }
 0x1cc   : > { %v539_v58 = vadd.f32 -0.28449672, %v535_v45  ;;  %v525_v4 = vadd.f32 -1.4531521, %v521_v62  ;;  %v1046_v42 = vpop.eup %1045 }
 0x1cd   : > { %v540_v61 = vadd.f32 -0.28449672, %v536_v55  ;;  %v526_v7 = vadd.f32 -1.4531521, %v522_v2 }
 0x1ce   : > { %v543_v1 = vmul.f32 %v539_v58, %v472_v17  ;;  %v529_v10 = vmul.f32 %v525_v4, %v502_v59  ;;  %v1048_v45 = vpop.eup %1047 }
 0x1cf   : > { %v544_v3 = vmul.f32 %v540_v61, %v487_v8  ;;  %v530_v14 = vmul.f32 %v526_v7, %v517_v63 }
 0x1d0   : > { %v547_v5 = vadd.f32 0.2548296, %v543_v1  ;;  %v533_v18 = vadd.f32 1.4214138, %v529_v10 }
 0x1d1   : > { %v548_v9 = vadd.f32 0.2548296, %v544_v3  ;;  %v534_v22 = vadd.f32 1.4214138, %v530_v14 }
 0x1d2   : > { %v551_v13 = vmul.f32 %v547_v5, %v472_v17  ;;  %v537_v24 = vmul.f32 %v533_v18, %v502_v59 }
 0x1d3   : > { %v552_v16 = vmul.f32 %v548_v9, %v487_v8  ;;  %v538_v27 = vmul.f32 %v534_v22, %v517_v63 }
 0x1d4   : > { %v571_v20 = vmul.f32 %v1042_v53, %v551_v13  ;;  %v541_v28 = vadd.f32 -0.28449672, %v537_v24 }
 0x1d5   : > { %v572_v23 = vmul.f32 %v1044_v19, %v552_v16  ;;  %v542_v30 = vadd.f32 -0.28449672, %v538_v27 }
 0x1d6   : > { %v575_v26 = vsub.f32 1.0, %v571_v20  ;;  %v545_v17 = vmul.f32 %v541_v28, %v502_v59 }
 0x1d7   : > { %v576_v52 = vsub.f32 1.0, %v572_v23  ;;  %v546_v31 = vmul.f32 %v542_v30, %v517_v63 }
 0x1d8   : > { %v583_v29 = vsub.f32 0.0, %v575_v26  ;;  %v549_v34 = vadd.f32 0.2548296, %v545_v17 }
 0x1d9   : > { %v584_v54 = vsub.f32 0.0, %v576_v52  ;;  %v550_v40 = vadd.f32 0.2548296, %v546_v31 }
 0x1da   : > { %v587_v8 = vsel %vm579_vm7, %v583_v29, %v575_v26  ;;  %v553_v37 = vmul.f32 %v549_v34, %v502_v59 }
 0x1db   : > { %v591_v32 = vadd.f32 1.0, %v587_v8  ;;  %v588_v33 = vsel %vm580_vm8, %v584_v54, %v576_v52  ;;  %v554_v44 = vmul.f32 %v550_v40, %v517_v63 }
 0x1dc   : > { %v592_v39 = vadd.f32 1.0, %v588_v33  ;;  %v573_v46 = vmul.f32 %v1046_v42, %v553_v37 }
 0x1dd   : > { %v595_v41 = vmul.f32 %v591_v32, %v439_v11  ;;  %v574_v38 = vmul.f32 %v1048_v45, %v554_v44 }
 0x1de   : > { %v596_v43 = vmul.f32 %v592_v39, %v440_v35  ;;  %v577_v53 = vsub.f32 1.0, %v573_v46 }
 0x1df   : > { %v578_v15 = vsub.f32 1.0, %v574_v38 }
 0x1e0   : > { %v599_v51 = vpack.c.bf16 %v596_v43, %v595_v41  ;;  %v585_v55 = vsub.f32 0.0, %v577_v53 }
 0x1e1   : > { %v586_v36 = vsub.f32 0.0, %v578_v15 }
 0x1e2   : > { %601 = vst [vmem:[%s1380_s18] sm:$0xff] %v599_v51  ;;  %v589_v56 = vsel %vm581_vm9, %v585_v55, %v577_v53 }
 0x1e3   : > { %v593_v58 = vadd.f32 1.0, %v589_v56  ;;  %v590_v59 = vsel %vm582_vm10, %v586_v36, %v578_v15 }
 0x1e4   : > { %v594_v61 = vadd.f32 1.0, %v590_v59 }
 0x1e5   : > { %v597_v62 = vmul.f32 %v593_v58, %v441_v57 }
 0x1e6   : > { %v598_v63 = vmul.f32 %v594_v61, %v442_v60  ;;  %609 = sbr.rel (!%p1193_p4) target bundleno = 530 (0x212), region = 44 }
 0x1e8   : > { %v600_v0 = vpack.c.bf16 %v598_v63, %v597_v62 }
 0x1ea   : > { %602 = vst [vmem:[%s1380_s18 + $0x8] sm:$0xff] %v600_v0 }
 0x1eb   : > { %s1440_s8 = smov (!%p612_p8, %s611_s8), 2 }
 0x1ec   : > { %s931_s13 = sshll.u32 %s1440_s8, 3 }
 0x1ed   : > { %p903_p9 = scmp.eq.s32.totalorder %s931_s13, 0 }
 0x1ee   : > { %s1401_s14 = sshrl.u32 (!%p903_p9), %s1440_s8, 1 }
 0x1ef   : > { %622 = sbr.rel (%p903_p9) target bundleno = 530 (0x212), region = 48  ;;  %p904_p10 = scmp.le.s32.totalorder (!%p903_p9), %s1401_s14, 0 }
 0x1f4   : > { %781 = sbr.rel (%p904_p10) target bundleno = 513 (0x201), region = 124  ;;  %s1105_s21 = smov (!%p904_p10), %s1395_s12  }
 0x1f5   : > { %s1109_s26 = smov (!%p904_p10), %s1380_s18   ;;  %s1113_s27 = smov (!%p904_p10), 0  }
 0x1f6   : > { %s1117_s15 = smov (!%p904_p10), 0  }
 0x1f9 LB: >> { %v687_v47 = vld [vmem:[%s1111_s26] sm:$0xff]  ;;  %v689_v48 = vld [vmem:[%s1111_s26 + $0x8] sm:$0xff]  ;;  %s691_s16 = sadd.s32 1, %s1115_s27  ;;  %s681_s15 = sadd.s32 1, %s1119_s15   ;;  %s1119_s15 = sphi %s1117_s15, %s681_s15   ;;  %s1115_s27 = sphi %s1113_s27, %s1114_s27   ;;  %s1111_s26 = sphi %s1109_s26, %s696_s26   ;;  %s1107_s21 = sphi %s1105_s21, %s697_s21  }
 0x1fa   : >> { %688 = vst [vmem:[%s1107_s21] sm:$0xff] %v687_v47  ;;  %p692_p11 = scmp.ge.s32.totalorder %s691_s16, %s1401_s14  ;;  %p680_p12 = scmp.ge.s32.totalorder %s681_s15, %s1401_s14 }
 0x1fb   : >> { %690 = vst [vmem:[%s1107_s21 + $0x8] sm:$0xff] %v689_v48 }
 0x1fc   : >> { %s1442_s16 = smov (%p692_p11, %s691_s16), 0  ;;  %683 = sbr.rel (!%p680_p12) target bundleno = 505 (0x1f9), region = 130 }
 0x1fd   : >> { %s905_s17 = sshll.u32 %s1442_s16, 4  ;;  %s1114_s27 = smov %s1442_s16  }
 0x1fe   : >> { %s696_s26 = scalar_lea.vmem %s1380_s18, %s905_s17 [#allocation2]   ;;  %s697_s21 = scalar_lea.vmem %s1395_s12, %s905_s17  }
 0x201 PF: > { %s1411_s20 = sand.u32 1, %s1440_s8   ;;  %s934_s23 = sshll.u32 %s1401_s14, 4 }
 0x202   : > { %s702_s24 = scalar_lea.vmem %s1380_s18, %s934_s23 [#allocation2]   ;;  %s704_s28 = scalar_lea.vmem %s1395_s12, %s934_s23  }
 0x203   : > { %p910_p13 = scmp.le.s32.totalorder %s1411_s20, 0 }
 0x204   : > { %s1121_s29 = smov (!%p910_p13), %s704_s28   ;;  %s1125_s30 = smov (!%p910_p13), %s702_s24  }
 0x205   : > { %795 = sbr.rel (%p910_p13) target bundleno = 530 (0x212), region = 135  ;;  %s1129_s6 = smov (!%p910_p13), 0  }
 0x206   : > { %s1133_s7 = smov (!%p910_p13), 0  }
 0x20a LB: >> { %v714_v49 = vld [vmem:[%s1127_s30] sm:$0xff]  ;;  %s716_s8 = sadd.s32 1, %s1131_s6  ;;  %s708_s7 = sadd.s32 1, %s1135_s7   ;;  %s1135_s7 = sphi %s1133_s7, %s708_s7   ;;  %s1131_s6 = sphi %s1129_s6, %s1130_s6   ;;  %s1127_s30 = sphi %s1125_s30, %s721_s30   ;;  %s1123_s29 = sphi %s1121_s29, %s722_s29  }
 0x20b   : >> { %715 = vst [vmem:[%s1123_s29] sm:$0xff] %v714_v49  ;;  %p717_p0 = scmp.ge.s32.totalorder %s716_s8, %s1411_s20  ;;  %p707_p1 = scmp.ge.s32.totalorder %s708_s7, %s1411_s20 }
 0x20d   : >> { %s1444_s8 = smov (%p717_p0, %s716_s8), 0  ;;  %710 = sbr.rel (!%p707_p1) target bundleno = 522 (0x20a), region = 141 }
 0x20e   : >> { %s911_s18 = sshll.u32 %s1444_s8, 3  ;;  %s1130_s6 = smov %s1444_s8  }
 0x20f   : >> { %s721_s30 = scalar_lea.vmem %s702_s24, %s911_s18 [#allocation2]   ;;  %s722_s29 = scalar_lea.vmem %s704_s28, %s911_s18  }
 0x212 PF: > { %p12_p2 = scmp.ge.s32.totalorder %s1183_s22, 4   ;;  %s1436_s18 = smov %s1099_s19 }
 0x213   : > { %s1437_s19 = smov %s1191_s25  ;;  %s1438_s20 = smov %s1183_s22 }
 0x214   :  { %14 = sbr.rel (!%p12_p2) target bundleno = 2 (0x2), region = 152 }

// kernel: tfc_forward.9
= control target key start
LH: loop header
LB: loop body
LE: loop exit
PB: predicated region body
PF: predicated region fallthrough
CT: control target
= control target key end

     0   :  { %10 = vsyncpa [#allocation3], 0  ;;  %s1719_s0 = inlined_call_operand.vmem [shape: f32[18,128], index: 0, kind: input, shape index: {}]   ;;  %s1720_s1 = inlined_call_operand.hbm [shape: f32[1,128], index: 1, kind: input, shape index: {}]   ;;  %s1721_s2 = inlined_call_operand.hbm [shape: f32[1,128], index: 2, kind: input, shape index: {}]   ;;  %s1722_s3 = inlined_call_operand.vmem [shape: bf16[128,384], index: 3, kind: input, shape index: {}]   ;;  %s1723_s4 = inlined_call_operand.vmem [shape: f32[1,384], index: 4, kind: input, shape index: {}]   ;;  %s1724_s5 = inlined_call_operand.vmem [shape: bf16[18,384], index: 5, kind: output, shape index: {}]  }
   0x1   :  { %11 = vsyncpa [#allocation5], 0  ;;  %s1414_s18 = smov 0   ;;  %s1416_s19 = smov 0  }
   0x2   :  { %s1418_s20 = smov 0  }
   0x3 LB: > { %s1427_s21 = sadd.s32 4294967295, %s1315_s20   ;;  %s1429_s22 = sadd.s32 1, %s1315_s20   ;;  %s1315_s20 = sphi %s1418_s20, %s1729_s20   ;;  %s1311_s19 = sphi %s1416_s19, %s1728_s19   ;;  %s1307_s18 = sphi %s1414_s18, %s1727_s18  }
   0x4   : > { %s131_s23 = ssub.s32 %s1315_s20, %s1429_s22  ;;  %s134_s24 = sadd.s32 1, %s1311_s19 }
   0x5   : > { %p132_p0 = scmp.eq.s32.totalorder %s131_s23, 0  ;;  %p144_p1 = scmp.ne.s32.totalorder %s1311_s19, %s1307_s18 }
   0x6   : > { %p145_p2 = scmp.eq.s32.totalorder %s1427_s21, 1  ;;  %p832_p3 = scmp.ge.s32.totalorder %s1315_s20, 1 }
   0x7   : > { %s1437_s25 = scalar_select %p132_p0, %s1311_s19, %s134_s24  }
   0x8   : > { %p1439_p4 = por %p145_p2, %p144_p1  ;;  %p158_p5 = scmp.lt.s32.totalorder %s1315_s20, 3 }
   0x9   : > { %p994_p6 = scmp.eq.s32.totalorder %s1427_s21, 0  ;;  %s170_s30 = sshll.u32 %s1720_s1, 4  ;;  %s171_s30 = int_to_ptr.hbm [resolvable:$true] %s170_s30 }
   0xa   : > { %p1444_p7 = pnand %p832_p3, %p158_p5  ;;  %s1381_s6 = smov [#allocation2]  }
   0xb   : > { %s172_s7 = sshll.u32 %s1381_s6, 4  ;;  %s182_s10 = sshll.u32 %s1721_s2, 4  ;;  %s173_s7 = int_to_ptr.vmem [resolvable:$true] %s172_s7  ;;  %s183_s10 = int_to_ptr.hbm [resolvable:$true] %s182_s10 }
   0xc   : > { %p987_p8 = pneg %p1444_p7  ;;  %s1382_s11 = smov [#allocation4]  }
   0xd   : > { %s184_s12 = sshll.u32 %s1382_s11, 4  ;;  %220 = sbr.rel (%p1444_p7) target bundleno = 517 (0x205), region = 40  ;;  %s185_s12 = int_to_ptr.vmem [resolvable:$true] %s184_s12 }
   0xe   : > { %p988_p9 = pnand %p994_p6, %p987_p8 }
  0x10   : > { %990 = dma.hbm_to_vmem [thread:$0]  (!%p988_p9), %s171_s30, 16, %s173_s7, [#allocation3]  }
  0x11   : > { %993 = dma.hbm_to_vmem [thread:$0]  (!%p988_p9), %s183_s10, 16, %s185_s12, [#allocation5]  }
  0x12   : > { %1298 = dma.done.wait (%p994_p6), [#allocation3], 16  }
  0x13   : > { %1300 = vsyncadd (%p994_p6), [#allocation3], 4294967280 }
  0x14   : > { %1302 = dma.done.wait (%p994_p6), [#allocation5], 16  }
  0x15   : > { %1304 = vsyncadd (%p994_p6), [#allocation5], 4294967280  ;;  %s1469_s13 = sshll.u32 %s1427_s21, 1  ;;  %v1383_v2 = vmov 128.0   ;;  %v927_v17 = vld [vmem:[%s1722_s3 + $0xa8] sm:$0xf] }
  0x16   : > { %p262_p10 = scmp.lt.s32.totalorder %s1469_s13, 2  ;;  %1155 = vrcp.f32 %v1383_v2  ;;  %v975_v18 = vld [vmem:[%s1722_s3 + $0xb0] sm:$0xf0]  ;;  %v974_v19 = vld [vmem:[%s1722_s3 + $0xac] sm:$0xf]  ;;  %s254_s8 = sand.u32 1, %s1307_s18  }
  0x17   : > { %v928_v20 = vor.u32 %v975_v18, %v927_v17  ;;  %v929_v21 = vld [vmem:[%s1722_s3 + $0xb4] sm:$0xf0]  ;;  %v935_v22 = vld [vmem:[%s1722_s3 + $0xb0] sm:$0xf]  ;;  %v976_v23 = vld [vmem:[%s1722_s3 + $0xb8] sm:$0xf0] }
  0x18   : > { %s263_s14 = scalar_select %p262_p10, %s1469_s13, 2  ;;  %v932_v24 = vor.u32 %v974_v19, %v929_v21  ;;  %v936_v25 = vor.u32 %v976_v23, %v935_v22  ;;  %v915_v26 = vld [vmem:[%s1722_s3 + $0x90] sm:$0xf]  ;;  %v972_v27 = vld [vmem:[%s1722_s3 + $0x98] sm:$0xf0] }
  0x19   : > { %507 = vmatpush.bf16.msra.mxu0 %v928_v20  ;;  %v971_v28 = vld [vmem:[%s1722_s3 + $0x94] sm:$0xf]  ;;  %v916_v29 = vor.u32 %v972_v27, %v915_v26  ;;  %v917_v30 = vld [vmem:[%s1722_s3 + $0x9c] sm:$0xf0]  ;;  %v923_v31 = vld [vmem:[%s1722_s3 + $0x98] sm:$0xf] }
  0x1a   : > { %s840_s15 = sshll.u32 %s263_s14, 3  ;;  %521 = vmatpush.bf16.msra.mxu1 %v932_v24  ;;  %535 = vmatpush.bf16.msra.mxu2 %v936_v25  ;;  %v973_v32 = vld [vmem:[%s1722_s3 + $0xa0] sm:$0xf0]  ;;  %v920_v33 = vor.u32 %v971_v28, %v917_v30  ;;  %v903_v35 = vld [vmem:[%s1722_s3 + $0x78] sm:$0xf]  ;;  %s977_s9 = smul.u32 24, %s254_s8 }
  0x1b   : > { %s265_s20 = scalar_lea.vmem %s1719_s0, %s840_s15  ;;  %v924_v34 = vor.u32 %v973_v32, %v923_v31  ;;  %v969_v36 = vld [vmem:[%s1722_s3 + $0x80] sm:$0xf0]  ;;  %v968_v37 = vld [vmem:[%s1722_s3 + $0x7c] sm:$0xf]  ;;  %v905_v39 = vld [vmem:[%s1722_s3 + $0x84] sm:$0xf0] }
  0x1c   : > { %v277_v0 = vld [vmem:[%s265_s20] sm:$0xff]  ;;  %v278_v1 = vld [vmem:[%s265_s20 + $0x8] sm:$0xff]  ;;  %v1156_v3 = vpop.eup %1155  ;;  %v904_v38 = vor.u32 %v969_v36, %v903_v35  ;;  %v908_v42 = vor.u32 %v968_v37, %v905_v39  ;;  %v893_v48 = vld [vmem:[%s1722_s3 + $0x6c] sm:$0xf0]  ;;  %s1640_s10 = scalar_lea.vmem [#allocation6], %s977_s9   ;;  %s565_s18 = ssub.s32 (%p1439_p4), 3, %s1469_s13 }
  0x1d   : > { %279 = vadd.xlane.f32.xlu0 %v277_v0  ;;  %v284_v4 = vmul.f32 128.0, %v1156_v3  ;;  %vm288_vm0 = vweird.f32 %v1156_v3  ;;  %508 = vmatpush.bf16.msra.mxu0 %v916_v29  ;;  %v911_v40 = vld [vmem:[%s1722_s3 + $0x80] sm:$0xf]  ;;  %v970_v41 = vld [vmem:[%s1722_s3 + $0x88] sm:$0xf0]  ;;  %s978_s11 = smul.u32 (%p1439_p4), 24, %s1427_s21 }
  0x1e   : > { %522 = vmatpush.bf16.msra.mxu1 %v920_v33  ;;  %536 = vmatpush.bf16.msra.mxu2 %v924_v34  ;;  %v912_v43 = vor.u32 %v970_v41, %v911_v40  ;;  %v891_v44 = vld [vmem:[%s1722_s3 + $0x60] sm:$0xf]  ;;  %v966_v45 = vld [vmem:[%s1722_s3 + $0x68] sm:$0xf0]  ;;  %v965_v46 = vld [vmem:[%s1722_s3 + $0x64] sm:$0xf] }
  0x1f   : > { %v285_v5 = vsub.f32 1.0, %v284_v4  ;;  %v892_v47 = vor.u32 %v966_v45, %v891_v44  ;;  %v899_v49 = vld [vmem:[%s1722_s3 + $0x68] sm:$0xf]  ;;  %v967_v50 = vld [vmem:[%s1722_s3 + $0x70] sm:$0xf0]  ;;  %v896_v51 = vor.u32 %v965_v46, %v893_v48  ;;  %p566_p11 = scmp.lt.s32.totalorder (%p1439_p4), %s565_s18, 2  ;;  %s1653_s15 = scalar_lea.vmem (%p1439_p4), %s1724_s5, %s978_s11  }
  0x20   : > { %v900_v52 = vor.u32 %v967_v50, %v899_v49  ;;  %v879_v53 = vld [vmem:[%s1722_s3 + $0x48] sm:$0xf]  ;;  %v963_v54 = vld [vmem:[%s1722_s3 + $0x50] sm:$0xf0]  ;;  %v962_v55 = vld [vmem:[%s1722_s3 + $0x4c] sm:$0xf] }
  0x21   : > { %v286_v6 = vmul.f32 %v1156_v3, %v285_v5  ;;  %509 = vmatpush.bf16.msra.mxu0 %v904_v38  ;;  %v880_v56 = vor.u32 %v963_v54, %v879_v53  ;;  %v881_v57 = vld [vmem:[%s1722_s3 + $0x54] sm:$0xf0]  ;;  %v887_v58 = vld [vmem:[%s1722_s3 + $0x50] sm:$0xf]  ;;  %v964_v59 = vld [vmem:[%s1722_s3 + $0x58] sm:$0xf0] }
  0x22   : > { %523 = vmatpush.bf16.msra.mxu1 %v908_v42  ;;  %537 = vmatpush.bf16.msra.mxu2 %v912_v43  ;;  %v884_v60 = vor.u32 %v962_v55, %v881_v57  ;;  %v888_v61 = vor.u32 %v964_v59, %v887_v58  ;;  %v867_v62 = vld [vmem:[%s1722_s3 + $0x30] sm:$0xf]  ;;  %v960_v63 = vld [vmem:[%s1722_s3 + $0x38] sm:$0xf0]  ;;  %v869_v2 = vld [vmem:[%s1722_s3 + $0x3c] sm:$0xf0] }
  0x23   : > { %v287_v7 = vadd.f32 %v1156_v3, %v286_v6  ;;  %v961_v4 = vld [vmem:[%s1722_s3 + $0x40] sm:$0xf0]  ;;  %v843_v19 = vld [vmem:[%s1722_s3] sm:$0xf]  ;;  %v954_v20 = vld [vmem:[%s1722_s3 + $0x8] sm:$0xf0] }
  0x24   : > { %v953_v21 = vld [vmem:[%s1722_s3 + $0x4] sm:$0xf]  ;;  %v844_v23 = vor.u32 %v954_v20, %v843_v19  ;;  %v845_v24 = vld [vmem:[%s1722_s3 + $0xc] sm:$0xf0]  ;;  %v851_v25 = vld [vmem:[%s1722_s3 + $0x8] sm:$0xf] }
  0x25   : > { %281 = vadd.xlane.f32.xlu0 %v278_v1  ;;  %v1476_v8 = vsel %vm288_vm0, %v1156_v3, %v287_v7  ;;  %510 = vmatpush.bf16.msra.mxu0 %v892_v47  ;;  %v875_v3 = vld [vmem:[%s1722_s3 + $0x38] sm:$0xf]  ;;  %v955_v26 = vld [vmem:[%s1722_s3 + $0x10] sm:$0xf0]  ;;  %v848_v28 = vor.u32 %v953_v21, %v845_v24  ;;  %v1153_v46 = vld [vmem:[#allocation2] ss:$0 sm:$0xff] }
  0x26   : > { %524 = vmatpush.bf16.msra.mxu1 %v896_v51  ;;  %538 = vmatpush.bf16.msra.mxu2 %v900_v52  ;;  %v876_v6 = vor.u32 %v961_v4, %v875_v3  ;;  %v855_v7 = vld [vmem:[%s1722_s3 + $0x18] sm:$0xf]  ;;  %v852_v29 = vor.u32 %v955_v26, %v851_v25  ;;  %v1154_v51 = vld [vmem:[#allocation4] ss:$0 sm:$0xff] }
  0x29   : > { %511 = vmatpush.bf16.msra.mxu0 %v880_v56 }
  0x2a   : > { %525 = vmatpush.bf16.msra.mxu1 %v884_v60  ;;  %539 = vmatpush.bf16.msra.mxu2 %v888_v61 }
  0x2e   : > { %540 = vmatpush.bf16.msra.mxu2 %v876_v6 }
  0x90   : > { %v280_v9 = vpop.xlane.xlu0 %279 }
  0x91   : > { %v290_v10 = vmul.f32 %v1476_v8, %v280_v9  ;;  %v957_v9 = vld [vmem:[%s1722_s3 + $0x20] sm:$0xf0] }
  0x93   : > { %v1479_v11 = vsub.f32 %v277_v0, %v290_v10  ;;  %v959_v0 = vld [vmem:[%s1722_s3 + $0x34] sm:$0xf]  ;;  %v956_v10 = vld [vmem:[%s1722_s3 + $0x1c] sm:$0xf] }
  0x94   : > { %v872_v5 = vor.u32 %v959_v0, %v869_v2 }
  0x95   : > { %v294_v12 = vmul.f32 %v1479_v11, %v1479_v11 }
  0x96   : > { %526 = vmatpush.bf16.msra.mxu1 %v872_v5 }
  0x97   : > { %296 = vadd.xlane.f32.xlu1 %v294_v12  ;;  %v856_v12 = vor.u32 %v957_v9, %v855_v7 }
  0x98   : > { %v282_v13 = vpop.xlane.xlu0 %281 }
  0x99   : > { %v291_v14 = vmul.f32 %v1476_v8, %v282_v13  ;;  %v857_v13 = vld [vmem:[%s1722_s3 + $0x24] sm:$0xf0] }
  0x9a   : > { %v860_v17 = vor.u32 %v956_v10, %v857_v13 }
  0x9b   : > { %v1484_v15 = vsub.f32 %v278_v1, %v291_v14  ;;  %v868_v1 = vor.u32 %v960_v63, %v867_v62  ;;  %v863_v14 = vld [vmem:[%s1722_s3 + $0x20] sm:$0xf] }
  0x9c   : > { %527 = vmatpush.bf16.msra.mxu1 %v860_v17 }
  0x9d   : > { %v295_v16 = vmul.f32 %v1484_v15, %v1484_v15  ;;  %512 = vmatpush.bf16.msra.mxu0 %v868_v1 }
  0x9f   : > { %298 = vadd.xlane.f32.xlu1 %v295_v16  ;;  %v958_v16 = vld [vmem:[%s1722_s3 + $0x28] sm:$0xf0] }
  0xa0   : > { %v864_v18 = vor.u32 %v958_v16, %v863_v14  ;;  %528 = vmatpush.bf16.msra.mxu1 %v848_v28 }
  0xa1   : > { %513 = vmatpush.bf16.msra.mxu0 %v856_v12 }
  0xa2   : > { %541 = vmatpush.bf16.msra.mxu2 %v864_v18 }
  0xa5   : > { %514 = vmatpush.bf16.msra.mxu0 %v844_v23 }
  0xa6   : > { %542 = vmatpush.bf16.msra.mxu2 %v852_v29 }
 0x10a   : > { %v297_v22 = vpop.xlane.xlu1 %296 }
 0x10b   : > { %v300_v27 = vmul.f32 %v297_v22, %v1476_v8 }
 0x10d   : > { %v302_v30 = vadd.f32 1e-05, %v300_v27 }
 0x10f   : > { %1157 = vrsqrt.f32 %v302_v30  ;;  %vm310_vm2 = vweird.f32 %v302_v30 }
 0x112   : > { %v299_v31 = vpop.xlane.xlu1 %298 }
 0x113   : > { %v301_v32 = vmul.f32 %v299_v31, %v1476_v8 }
 0x115   : > { %v1158_v33 = vpop.eup %1157  ;;  %v303_v34 = vadd.f32 1e-05, %v301_v32 }
 0x116   : > { %v305_v35 = vmul.f32 %v1158_v33, %v302_v30  ;;  %vm311_vm1 = vweird.f32 %v1158_v33 }
 0x117   : > { %1159 = vrsqrt.f32 %v303_v34  ;;  %vm312_vm3 = vmor %vm310_vm2, %vm311_vm1  ;;  %vm320_vm5 = vweird.f32 %v303_v34 }
 0x118   : > { %v306_v36 = vmul.f32 %v1158_v33, %v305_v35 }
 0x11a   : > { %v307_v37 = vmul.f32 0.5, %v306_v36 }
 0x11c   : > { %v308_v38 = vsub.f32 1.5, %v307_v37 }
 0x11d   : > { %v1160_v39 = vpop.eup %1159 }
 0x11e   : > { %v309_v40 = vmul.f32 %v1158_v33, %v308_v38  ;;  %v315_v41 = vmul.f32 %v1160_v39, %v303_v34  ;;  %vm321_vm4 = vweird.f32 %v1160_v39 }
 0x11f   : > { %vm322_vm6 = vmor %vm320_vm5, %vm321_vm4 }
 0x120   : > { %v316_v42 = vmul.f32 %v1160_v39, %v315_v41  ;;  %v313_v43 = vsel %vm312_vm3, %v1158_v33, %v309_v40 }
 0x121   : > { %v324_v8 = vmul.f32 %v313_v43, %v1479_v11  ;;  %v371_v11 = vld [vmem:[%s1723_s4] sm:$0x7] }
 0x122   : > { %v317_v44 = vmul.f32 0.5, %v316_v42  ;;  %v373_v56 = vperm.slane %v371_v11, 0  ;;  %v374_v57 = vperm.slane %v371_v11, 1  ;;  %v375_v62 = vperm.slane %v371_v11, 2 }
 0x123   : > { %v330_v50 = vmul.f32 %v1153_v46, %v324_v8 }
 0x124   : > { %v318_v45 = vsub.f32 1.5, %v317_v44 }
 0x125   : > { %v336_v53 = vadd.f32 %v1154_v51, %v330_v50 }
 0x126   : > { %v319_v47 = vmul.f32 %v1160_v39, %v318_v45 }
 0x128   : > { %v323_v48 = vsel %vm322_vm6, %v1160_v39, %v319_v47 }
 0x129   : > { %v325_v49 = vmul.f32 %v323_v48, %v1484_v15 }
 0x12b   : > { %v331_v52 = vmul.f32 %v1153_v46, %v325_v49 }
 0x12d   : > { %v337_v54 = vadd.f32 %v1154_v51, %v331_v52 }
 0x12f   : > { %v338_v55 = vpack.c.bf16 %v337_v54, %v336_v53 }
 0x131   : > { %515 = vmatmul.bf16.vlgmr.msra.gmra.mxu0 %v338_v55  ;;  %529 = vmatmul.bf16.vlgmr.msra.gmra.mxu1 %v338_v55 }
 0x132   : > { %543 = vmatmul.bf16.vlgmr.msra.gmra.mxu2 %v338_v55 }
 0x1ae   : > { %v516_v58 = vpop.f32.mrf.mxu0  ;;  %v530_v59 = vpop.f32.mrf.mxu1 }
 0x1af   : > { %v517_v15 = vadd.f32 %v516_v58, %v373_v56  ;;  %v531_v60 = vadd.f32 %v530_v59, %v374_v57 }
 0x1b1   : > { %v549_v61 = vpack.c.bf16 %v531_v60, %v517_v15 }
 0x1b3   : > { %553 = vst [vmem:[%s1640_s10] sm:$0xff] %v549_v61 }
 0x1b5   : > { %v544_v63 = vpop.f32.mrf.mxu2 }
 0x1b6   : > { %v545_v0 = vadd.f32 %v544_v63, %v375_v62  ;;  %v518_v1 = vpop.f32.mrf.mxu0  ;;  %v532_v2 = vpop.f32.mrf.mxu1 }
 0x1b7   : > { %v519_v3 = vadd.f32 %v518_v1, %v373_v56  ;;  %v533_v4 = vadd.f32 %v532_v2, %v374_v57 }
 0x1b8   : > { %v550_v5 = vpack.c.bf16 %v545_v0, %v545_v0 }
 0x1b9   : > { %v551_v6 = vpack.c.bf16 %v533_v4, %v519_v3 }
 0x1ba   : > { %554 = vst [vmem:[%s1640_s10 + $0x8] sm:$0xf] %v550_v5 }
 0x1bb   : > { %555 = vst [vmem:[%s1640_s10 + $0xc] sm:$0xff] %v551_v6 }
 0x1bd   : > { %v546_v7 = vpop.f32.mrf.mxu2 }
 0x1be   : > { %v547_v9 = vadd.f32 %v546_v7, %v375_v62  ;;  %563 = sbr.rel (!%p1439_p4) target bundleno = 517 (0x205), region = 52 }
 0x1c0   : > { %v552_v10 = vpack.c.bf16 %v547_v9, %v547_v9 }
 0x1c2   : > { %556 = vst [vmem:[%s1640_s10 + $0x14] sm:$0xf] %v552_v10 }
 0x1c3   : > { %s1731_s18 = smov (!%p566_p11, %s565_s18), 2 }
 0x1c4   : > { %s939_s16 = smul.u32 12, %s1731_s18 }
 0x1c6   : > { %p943_p12 = scmp.eq.s32.totalorder %s939_s16, 0 }
 0x1c7   : > { %s579_s26 = scalar_lea.vmem (!%p943_p12), %s1640_s10, 8 [#allocation6]   ;;  %s580_s17 = scalar_lea.vmem (!%p943_p12), %s1653_s15, 8  }
 0x1c8   : > { %576 = sbr.rel (%p943_p12) target bundleno = 517 (0x205), region = 56  ;;  %s1661_s20 = sshrl.u32 (!%p943_p12), %s1731_s18, 1 }
 0x1c9   : > { %p944_p13 = scmp.le.s32.totalorder (!%p943_p12), %s1661_s20, 0 }
 0x1cd   : > { %741 = sbr.rel (%p944_p13) target bundleno = 474 (0x1da), region = 123  ;;  %s1317_s21 = smov (!%p944_p13), %s1653_s15  }
 0x1ce   : > { %s1321_s13 = smov (!%p944_p13), %s1640_s10   ;;  %s1325_s23 = smov (!%p944_p13), 0  }
 0x1cf   : > { %s1329_s24 = smov (!%p944_p13), 0  }
 0x1d2 LB: >> { %v591_v12 = vld [vmem:[%s1323_s13] sm:$0xff]  ;;  %v593_v13 = vld [vmem:[%s1323_s13 + $0xc] sm:$0xff]  ;;  %s595_s27 = sadd.s32 1, %s1327_s23  ;;  %s585_s24 = sadd.s32 1, %s1331_s24   ;;  %s1331_s24 = sphi %s1329_s24, %s585_s24   ;;  %s1327_s23 = sphi %s1325_s23, %s1326_s23   ;;  %s1323_s13 = sphi %s1321_s13, %s600_s13   ;;  %s1319_s21 = sphi %s1317_s21, %s601_s21  }
 0x1d3   : >> { %592 = vst [vmem:[%s1319_s21] sm:$0xff] %v591_v12  ;;  %p596_p0 = scmp.ge.s32.totalorder %s595_s27, %s1661_s20  ;;  %p584_p1 = scmp.ge.s32.totalorder %s585_s24, %s1661_s20 }
 0x1d4   : >> { %594 = vst [vmem:[%s1319_s21 + $0xc] sm:$0xff] %v593_v13 }
 0x1d5   : >> { %s1733_s27 = smov (%p596_p0, %s595_s27), 0  ;;  %587 = sbr.rel (!%p584_p1) target bundleno = 466 (0x1d2), region = 129 }
 0x1d6   : >> { %s598_s28 = smul.u32 24, %s1733_s27  ;;  %s1326_s23 = smov %s1733_s27  }
 0x1d8   : >> { %s600_s13 = scalar_lea.vmem %s1640_s10, %s598_s28 [#allocation6]   ;;  %s601_s21 = scalar_lea.vmem %s1653_s15, %s598_s28  }
 0x1da PF: > { %s1673_s29 = sand.u32 1, %s1731_s18   ;;  %s946_s30 = smul.u32 24, %s1661_s20 }
 0x1db   : > { %p948_p2 = scmp.le.s32.totalorder %s1673_s29, 0 }
 0x1dc   : > { %s1677_s6 = scalar_lea.vmem %s1640_s10, %s946_s30 [#allocation6]   ;;  %s1680_s7 = scalar_lea.vmem %s1653_s15, %s946_s30  }
 0x1dd   : > { %755 = sbr.rel (%p948_p2) target bundleno = 490 (0x1ea), region = 134  ;;  %s1333_s8 = smov (!%p948_p2), %s1680_s7  }
 0x1de   : > { %s1337_s9 = smov (!%p948_p2), %s1677_s6   ;;  %s1341_s11 = smov (!%p948_p2), 0  }
 0x1df   : > { %s1345_s12 = smov (!%p948_p2), 0  }
 0x1e2 LB: >> { %v618_v14 = vld [vmem:[%s1339_s9] sm:$0xff]  ;;  %s620_s18 = sadd.s32 1, %s1343_s11  ;;  %s612_s12 = sadd.s32 1, %s1347_s12   ;;  %s1347_s12 = sphi %s1345_s12, %s612_s12   ;;  %s1343_s11 = sphi %s1341_s11, %s1342_s11   ;;  %s1339_s9 = sphi %s1337_s9, %s625_s9   ;;  %s1335_s8 = sphi %s1333_s8, %s626_s8  }
 0x1e3   : >> { %619 = vst [vmem:[%s1335_s8] sm:$0xff] %v618_v14  ;;  %p621_p3 = scmp.ge.s32.totalorder %s620_s18, %s1673_s29  ;;  %p611_p4 = scmp.ge.s32.totalorder %s612_s12, %s1673_s29 }
 0x1e5   : >> { %s1735_s18 = smov (%p621_p3, %s620_s18), 0  ;;  %614 = sbr.rel (!%p611_p4) target bundleno = 482 (0x1e2), region = 140 }
 0x1e6   : >> { %s623_s14 = smul.u32 12, %s1735_s18  ;;  %s1342_s11 = smov %s1735_s18  }
 0x1e8   : >> { %s625_s9 = scalar_lea.vmem %s1677_s6, %s623_s14 [#allocation6]   ;;  %s626_s8 = scalar_lea.vmem %s1680_s7, %s623_s14  }
 0x1ea PF: > { %769 = sbr.rel (%p944_p13) target bundleno = 503 (0x1f7), region = 145  ;;  %s1349_s16 = smov (!%p944_p13), %s580_s17  }
 0x1eb   : > { %s1353_s21 = smov (!%p944_p13), %s579_s26   ;;  %s1357_s13 = smov (!%p944_p13), 0  }
 0x1ec   : > { %s1361_s23 = smov (!%p944_p13), 0  }
 0x1ef LB: >> { %v639_v16 = vld [vmem:[%s1355_s21] sm:$0xf]  ;;  %v641_v17 = vld [vmem:[%s1355_s21 + $0xc] sm:$0xf]  ;;  %s643_s24 = sadd.s32 1, %s1359_s13  ;;  %s633_s23 = sadd.s32 1, %s1363_s23   ;;  %s1363_s23 = sphi %s1361_s23, %s633_s23   ;;  %s1359_s13 = sphi %s1357_s13, %s1358_s13   ;;  %s1355_s21 = sphi %s1353_s21, %s718_s21   ;;  %s1351_s16 = sphi %s1349_s16, %s721_s16  }
 0x1f0   : >> { %640 = vst [vmem:[%s1351_s16] sm:$0xf] %v639_v16  ;;  %p644_p5 = scmp.ge.s32.totalorder %s643_s24, %s1661_s20  ;;  %p632_p6 = scmp.ge.s32.totalorder %s633_s23, %s1661_s20 }
 0x1f1   : >> { %642 = vst [vmem:[%s1351_s16 + $0xc] sm:$0xf] %v641_v17 }
 0x1f2   : >> { %s1737_s24 = smov (%p644_p5, %s643_s24), 0  ;;  %635 = sbr.rel (!%p632_p6) target bundleno = 495 (0x1ef), region = 151 }
 0x1f3   : >> { %s716_s17 = smul.u32 24, %s1737_s24  ;;  %s1358_s13 = smov %s1737_s24  }
 0x1f5   : >> { %s717_s26 = scalar_lea.vmem %s1640_s10, %s716_s17 [#allocation6]  ;;  %s720_s27 = scalar_lea.vmem %s1653_s15, %s716_s17 }
 0x1f6   : >> { %s718_s21 = scalar_lea.vmem %s717_s26, 8 [#allocation6]   ;;  %s721_s16 = scalar_lea.vmem %s720_s27, 8  }
 0x1f7 PF: > { %s724_s28 = scalar_lea.vmem %s1677_s6, 8 [#allocation6]   ;;  %s727_s30 = scalar_lea.vmem %s1680_s7, 8  }
 0x1f8   : > { %783 = sbr.rel (%p948_p2) target bundleno = 517 (0x205), region = 156  ;;  %s1365_s8 = smov (!%p948_p2), %s727_s30  }
 0x1f9   : > { %s1369_s9 = smov (!%p948_p2), %s724_s28   ;;  %s1373_s11 = smov (!%p948_p2), 0  }
 0x1fa   : > { %s1377_s12 = smov (!%p948_p2), 0  }
 0x1fd LB: >> { %v666_v18 = vld [vmem:[%s1371_s9] sm:$0xf]  ;;  %s668_s10 = sadd.s32 1, %s1375_s11  ;;  %s660_s12 = sadd.s32 1, %s1379_s12   ;;  %s1379_s12 = sphi %s1377_s12, %s660_s12   ;;  %s1375_s11 = sphi %s1373_s11, %s1374_s11   ;;  %s1371_s9 = sphi %s1369_s9, %s730_s9   ;;  %s1367_s8 = sphi %s1365_s8, %s733_s8  }
 0x1fe   : >> { %667 = vst [vmem:[%s1367_s8] sm:$0xf] %v666_v18  ;;  %p669_p7 = scmp.ge.s32.totalorder %s668_s10, %s1673_s29  ;;  %p659_p8 = scmp.ge.s32.totalorder %s660_s12, %s1673_s29 }
 0x200   : >> { %s1739_s10 = smov (%p669_p7, %s668_s10), 0  ;;  %662 = sbr.rel (!%p659_p8) target bundleno = 509 (0x1fd), region = 162 }
 0x201   : >> { %s728_s15 = smul.u32 12, %s1739_s10  ;;  %s1374_s11 = smov %s1739_s10  }
 0x203   : >> { %s729_s20 = scalar_lea.vmem %s1677_s6, %s728_s15 [#allocation6]  ;;  %s732_s18 = scalar_lea.vmem %s1680_s7, %s728_s15 }
 0x204   : >> { %s730_s9 = scalar_lea.vmem %s729_s20, 8 [#allocation6]   ;;  %s733_s8 = scalar_lea.vmem %s732_s18, 8  }
 0x205 PF: > { %p14_p9 = scmp.ge.s32.totalorder %s1429_s22, 4   ;;  %s1727_s18 = smov %s1311_s19 }
 0x206   : > { %s1728_s19 = smov %s1437_s25  ;;  %s1729_s20 = smov %s1429_s22 }
 0x207   :  { %16 = sbr.rel (!%p14_p9) target bundleno = 3 (0x3), region = 173 }
 0x20c   :  { %688 = vsyncpa [#allocation3], 1 }
 0x20d   :  { %690 = vsyncpa [#allocation3 + $0x1], 1 }
 0x20e   :  { %691 = vsyncpa [#allocation5], 1 }

// kernel: tfc_forward.10
= control target key start
LH: loop header
LB: loop body
LE: loop exit
PB: predicated region body
PF: predicated region fallthrough
CT: control target
= control target key end

     0   :  { %s1458_s21 = smov 0   ;;  %s1460_s22 = smov 0   ;;  %s1678_s0 = inlined_call_operand.vmem [shape: bf16[2,9,384], index: 0, kind: input, shape index: {}, may-alias: {0,1,2}]   ;;  %s1679_s1 = inlined_call_operand.vmem [shape: bf16[2,9,384], index: 1, kind: input, shape index: {}, may-alias: {0,1,2}]   ;;  %s1680_s2 = inlined_call_operand.vmem [shape: bf16[2,9,384], index: 2, kind: input, shape index: {}, may-alias: {0,1,2}]   ;;  %s1681_s3 = inlined_call_operand.vmem [shape: bf16[128,128], index: 3, kind: input, shape index: {}]   ;;  %s1682_s4 = inlined_call_operand.vmem [shape: f32[1,128], index: 4, kind: input, shape index: {}]   ;;  %s1683_s5 = inlined_call_operand.vmem [shape: f32[2,9,128], index: 5, kind: input, shape index: {}]   ;;  %s1684_s6 = inlined_call_operand.vmem [shape: f32[2,9,128], index: 6, kind: output, shape index: {}]  }
   0x1   :  { %s1462_s23 = smov 0   ;;  %s1464_s24 = smov 0  }
   0x2   :  { %s1466_s25 = smov 0  }
   0x3 LB: > { %s28_s26 = sadd.s32 1, %s1413_s24  ;;  %p44_p1 = scmp.ne.s32.totalorder %s1405_s22, %s1401_s21  ;;  %s1417_s25 = sphi %s1466_s25, %s16_s25   ;;  %s1413_s24 = sphi %s1464_s24, %s1689_s24   ;;  %s1409_s23 = sphi %s1462_s23, %s1688_s23   ;;  %s1405_s22 = sphi %s1460_s22, %s1687_s22   ;;  %s1401_s21 = sphi %s1458_s21, %s1686_s21  }
   0x4   : > { %p30_p0 = scmp.ge.s32.totalorder %s28_s26, 2  ;;  %p45_p2 = scmp.eq.s32.totalorder %s1417_s25, 0 }
   0x5   : > { %s37_s29 = sadd.s32 1, %s1405_s22  ;;  %p1216_p5 = scmp.ge.s32.totalorder %s1417_s25, 2 }
   0x6   : > { %s1691_s26 = smov (%p30_p0, %s28_s26), 0  ;;  %p1489_p3 = por %p45_p2, %p44_p1 }
   0x7   : > { %s32_s28 = ssub.s32 %s1413_s24, %s1691_s26  ;;  %241 = sbr.rel (%p1216_p5) target bundleno = 33 (0x21), region = 24 }
   0x8   : > { %p35_p4 = scmp.eq.s32.totalorder %s32_s28, 0 }
   0xa   : > { %s1497_s30 = scalar_select %p35_p4, %s1405_s22, %s37_s29  }
   0xc   : > { %244 = sbr.rel (!%p1489_p3) target bundleno = 19 (0x13), region = 28  ;;  %s246_s7 = sand.u32 (%p1489_p3), 1, %s1405_s22  }
   0xd   : > { %s1301_s8 = smul.u32 (%p1489_p3), 24, %s1413_s24  ;;  %s1217_s9 = sshll.u32 (%p1489_p3), %s246_s7, 3 }
   0xe   : > { %s248_s13 = scalar_lea.vmem (%p1489_p3), [#allocation2], %s1217_s9 }
   0xf   : > { %s252_s12 = scalar_lea.vmem (%p1489_p3), %s1678_s0, %s1301_s8 }
  0x10   : > { %v269_v0 = vld [vmem:[%s252_s12] sm:$0xf] (%p1489_p3)  ;;  %v271_v1 = vld [vmem:[%s252_s12 + $0xc] sm:$0xf] (%p1489_p3) }
  0x11   : > { %270 = vst [vmem:[%s248_s13] sm:$0xf] %v269_v0 }
  0x12   : > { %272 = vst [vmem:[%s248_s13 + $0x4] sm:$0xf] %v271_v1 }
  0x13 PF: > { %300 = sbr.rel (!%p1489_p3) target bundleno = 26 (0x1a), region = 69  ;;  %s302_s14 = sand.u32 (%p1489_p3), 1, %s1405_s22  }
  0x14   : > { %s1220_s15 = smul.u32 (%p1489_p3), 24, %s1413_s24  ;;  %s1219_s16 = sshll.u32 (%p1489_p3), %s302_s14, 3 }
  0x15   : > { %s304_s20 = scalar_lea.vmem (%p1489_p3), [#allocation3], %s1219_s16 }
  0x16   : > { %s1105_s19 = scalar_lea.vmem (%p1489_p3), %s1679_s1, %s1220_s15 }
  0x17   : > { %v1221_v2 = vld [vmem:[%s1105_s19 + $0x4] sm:$0xf] (%p1489_p3)  ;;  %v1222_v3 = vld [vmem:[%s1105_s19 + $0x10] sm:$0xf] (%p1489_p3) }
  0x18   : > { %327 = vst [vmem:[%s304_s20] sm:$0xf] %v1221_v2 }
  0x19   : > { %329 = vst [vmem:[%s304_s20 + $0x4] sm:$0xf] %v1222_v3 }
  0x1a PF: > { %357 = sbr.rel (!%p1489_p3) target bundleno = 33 (0x21), region = 110  ;;  %s359_s28 = sand.u32 (%p1489_p3), 1, %s1405_s22  }
  0x1b   : > { %s1224_s29 = smul.u32 (%p1489_p3), 24, %s1413_s24  ;;  %s1223_s7 = sshll.u32 (%p1489_p3), %s359_s28, 3 }
  0x1c   : > { %s361_s11 = scalar_lea.vmem (%p1489_p3), [#allocation4], %s1223_s7 }
  0x1d   : > { %s1112_s10 = scalar_lea.vmem (%p1489_p3), %s1680_s2, %s1224_s29 }
  0x1e   : > { %v1225_v4 = vld [vmem:[%s1112_s10 + $0x8] sm:$0xf] (%p1489_p3)  ;;  %v1226_v5 = vld [vmem:[%s1112_s10 + $0x14] sm:$0xf] (%p1489_p3) }
  0x1f   : > { %384 = vst [vmem:[%s361_s11] sm:$0xf] %v1225_v4 }
  0x20   : > { %386 = vst [vmem:[%s361_s11 + $0x4] sm:$0xf] %v1226_v5 }
  0x21 PF: > { %p1227_p6 = scmp.ge.s32.totalorder %s1417_s25, 1  ;;  %p421_p7 = scmp.lt.s32.totalorder %s1417_s25, 3 }
  0x23   : > { %p422_p8 = pnand %p1227_p6, %p421_p7 }
  0x24   : > { %s428_s27 = sand.u32 (!%p422_p8), 1, %s1401_s21   ;;  %s1419_s15 = smov (!%p422_p8), 96  }
  0x25   : > { %425 = sbr.rel (%p422_p8) target bundleno = 1091 (0x443), region = 155  ;;  %s1524_s12 = sshll.u32 (!%p422_p8), %s428_s27, 3 }
  0x26   : > { %s437_s13 = scalar_lea.vmem (!%p422_p8), [#allocation3], %s1524_s12  ;;  %s430_s14 = scalar_lea.vmem (!%p422_p8), [#allocation2], %s1524_s12 }
  0x27   : > { %s1420_s21 = smov (!%p422_p8), 32   ;;  %s444_s16 = scalar_lea.vmem (!%p422_p8), [#allocation4], %s1524_s12 }
  0x28   : > { %s1422_s17 = smov (!%p422_p8), 64   ;;  %p497_p9 = scmp.lt.s32.totalorder (!%p422_p8), %s1409_s23, 1 }
  0x2a   : > { %vm542_vm0 = vcmask 261120   ;;  %v1237_v6 = vld [vmem:[%s437_s13] sm:$0xf]  ;;  %v1291_v7 = vld [vmem:[%s437_s13] sm:$0x10]  ;;  %vm563_vm1 = vcmask 72704  }
  0x2b   : > { %v530_v8 = vld [vmem:[%s430_s14] sm:$0xf]  ;;  %v1528_v9 = vor.u32 %v1291_v7, %v1237_v6  ;;  %v531_v10 = vld [vmem:[%s430_s14 + $0x4] sm:$0x1]  ;;  %vm567_vm2 = vcmask 65536   ;;  %vm592_vm3 = vcmask 1043456  }
  0x2c   : > { %v532_v11 = vunpack.c.l.bf16 %v530_v8  ;;  %v533_v12 = vunpack.c.l.bf16 %v531_v10  ;;  %v1242_v24 = vld [vmem:[%s444_s16] sm:$0xf]  ;;  %v1292_v25 = vld [vmem:[%s444_s16] sm:$0x10]  ;;  %vm593_vm4 = vcmask 1044480   ;;  %v1421_v27 = vmov 65535  }
  0x2d   : > { %651 = vrot.lane.b32.xlu0 %v1528_v9, %s1419_s15  ;;  %v547_v13 = vsel %vm542_vm0, %v1528_v9, 0  ;;  %v1543_v26 = vor.u32 %v1292_v25, %v1242_v24  ;;  %v594_v28 = vsel %vm592_vm3, 4294967295, %v1421_v27  ;;  %v1294_v49 = vld [vmem:[%s1681_s3 + $0x8] sm:$0xff]  ;;  %v1293_v50 = vld [vmem:[%s1681_s3] sm:$0xff]  ;;  %s1693_s23 = smov (!%p497_p9, %s1409_s23), 1 }
  0x2e   : > { %v534_v14 = vmul.f32 0.17677669, %v532_v11  ;;  %556 = vmatpush.bf16.xpose.msra.mxu0 %v547_v13  ;;  %v535_v15 = vmul.f32 0.17677669, %v533_v12  ;;  %v1545_v29 = vsel %vm593_vm4, %v594_v28, 0  ;;  %s1289_s16 = sshll.u32 %s1693_s23, 4 }
  0x2f   : > { %v597_v30 = vand.u32 %v1543_v26, %v1545_v29  ;;  %s501_s19 = scalar_lea.vmem %s1683_s5, %s1289_s16  ;;  %s506_s8 = scalar_lea.vmem %s1684_s6, %s1289_s16 }
  0x30   : > { %v536_v16 = vpack.c.bf16 %v535_v15, %v534_v14 }
  0x31   : > { %606 = vmatpush.bf16.msra.mxu1 %v597_v30 }
  0x35   : > { %649 = vrot.lane.b32.xlu0 %v536_v16, %s1419_s15  ;;  %1239 = vmatmul.msk.bf16.vlgmr.msra.gmra.mxu0 %vm542_vm0, %v536_v16 }
  0x9f   : > { %v652_v17 = vpop.permute.xlu0 %651 }
  0xa0   : > { %v657_v18 = vsel %vm542_vm0, %v652_v17, 0 }
  0xa1   : > { %666 = vmatpush.bf16.xpose.msra.mxu2 %v657_v18 }
  0xa7   : > { %v650_v19 = vpop.permute.xlu0 %649 }
  0xa8   : > { %1245 = vmatmul.msk.bf16.vlgmr.msra.gmra.mxu2 %vm542_vm0, %v650_v19 }
  0xb2   : > { %v558_v20 = vpop.f32.mrf.mxu0 }
  0xb3   : > { %v564_v21 = vsel %vm563_vm1, %v558_v20, -inf }
  0xb4   : > { %565 = vmax.xlane.f32.xlu1 %v564_v21 }
  0xba   : > { %v560_v22 = vpop.f32.mrf.mxu0 }
  0xbb   : > { %v568_v23 = vsel %vm567_vm2, %v560_v22, -inf }
  0xbc   : > { %569 = vmax.xlane.f32.xlu1 %v568_v23 }
  0xd5   : > { %940 = vrot.lane.b32.xlu1 %v1528_v9, %s1420_s21 }
 0x127   : > { %v566_v31 = vpop.xlane.xlu1 %565 }
 0x128   : > { %v571_v32 = vsub.f32 %v558_v20, %v566_v31 }
 0x12a   : > { %v573_v33 = vmul.f32 1.442695, %v571_v32 }
 0x12b   : > { %v668_v34 = vpop.f32.mrf.mxu2 }
 0x12c   : > { %1347 = vpow2.f32 %v573_v33  ;;  %v673_v35 = vsel %vm563_vm1, %v668_v34, -inf }
 0x12d   : > { %674 = vmax.xlane.f32.xlu2 %v673_v35 }
 0x12f   : > { %v570_v36 = vpop.xlane.xlu1 %569 }
 0x130   : > { %v572_v37 = vsub.f32 %v560_v22, %v570_v36 }
 0x132   : > { %v1348_v38 = vpop.eup %1347  ;;  %v575_v39 = vmul.f32 1.442695, %v572_v37 }
 0x133   : > { %v577_v40 = vsel %vm563_vm1, %v1348_v38, 0.0  ;;  %v670_v44 = vpop.f32.mrf.mxu2 }
 0x134   : > { %1349 = vpow2.f32 %v575_v39  ;;  %578 = vadd.xlane.f32.xlu0 %v577_v40  ;;  %v676_v45 = vsel %vm567_vm2, %v670_v44, -inf }
 0x13a   : > { %v1350_v41 = vpop.eup %1349 }
 0x13b   : > { %v580_v42 = vsel %vm567_vm2, %v1350_v41, 0.0  ;;  %v583_v43 = vpack.c.bf16 %v1350_v41, %v1348_v38 }
 0x13c   : > { %581 = vadd.xlane.f32.xlu1 %v580_v42 }
 0x13d   : > { %1244 = vmatmul.msk.bf16.vlgmr.msra.gmra.mxu1 %vm563_vm1, %v583_v43 }
 0x145   : > { %692 = vrot.lane.b32.xlu2 %v1543_v26, %s1419_s15 }
 0x147   : > { %v941_v51 = vpop.permute.xlu1 %940 }
 0x148   : > { %850 = vrot.lane.b32.xlu0 %v1543_v26, %s1422_s17  ;;  %v946_v8 = vsel %vm542_vm0, %v941_v51, 0 }
 0x155   : > { %807 = vrot.lane.b32.xlu1 %v536_v16, %s1422_s17 }
 0x16e   : > { %677 = vmax.xlane.f32.xlu2 %v676_v45 }
 0x186   : > { %809 = vrot.lane.b32.xlu2 %v1528_v9, %s1422_s17 }
 0x18e   : > { %938 = vrot.lane.b32.xlu2 %v536_v16, %s1420_s21 }
 0x1a0   : > { %v675_v46 = vpop.xlane.xlu2 %674 }
 0x1a1   : > { %v679_v54 = vsub.f32 %v668_v34, %v675_v46  ;;  %v1296_v46 = vld [vmem:[%s1681_s3 + $0x18] sm:$0xff] }
 0x1a2   : > { %766 = vmatpush.bf16.msrb.mxu1 %v1296_v46 }
 0x1a3   : > { %v681_v55 = vmul.f32 1.442695, %v679_v54 }
 0x1a7   : > { %v579_v53 = vpop.xlane.xlu0 %578 }
 0x1a8   : > { %v693_v47 = vpop.permute.xlu2 %692  ;;  %v624_v15 = vand.u32 2147483648, %v579_v53  ;;  %vm618_vm9 = vweird.f32 %v579_v53  ;;  %v622_v16 = vand.u32 2147483647, %v579_v53 }
 0x1a9   : > { %v698_v48 = vand.u32 %v693_v47, %v1545_v29 }
 0x1aa   : > { %v625_v21 = vor.u32 1.1754944e-38, %v624_v15  ;;  %vm623_vm12 = vcmp.eq.f32.partialorder %v622_v16, 8.507059e+37 }
 0x1ab   : > { %707 = vmatpush.bf16.msra.mxu3 %v698_v48  ;;  %v1295_v48 = vld [vmem:[%s1681_s3 + $0x10] sm:$0xff] }
 0x1ac   : > { %767 = vmatpush.bf16.msrb.mxu1 %v1295_v48 }
 0x1af   : > { %795 = vmatpush.bf16.msrb.mxu3 %v1294_v49  ;;  %v582_v52 = vpop.xlane.xlu1 %581 }
 0x1b0   : > { %1351 = vrcp.f32 %v582_v52  ;;  %v639_v12 = vand.u32 2147483648, %v582_v52  ;;  %vm633_vm7 = vweird.f32 %v582_v52  ;;  %v637_v14 = vand.u32 2147483647, %v582_v52 }
 0x1b1   : > { %1353 = vrcp.f32 %v579_v53 }
 0x1b2   : > { %1355 = vpow2.f32 %v681_v55  ;;  %v640_v19 = vor.u32 1.1754944e-38, %v639_v12  ;;  %vm638_vm11 = vcmp.eq.f32.partialorder %v637_v14, 8.507059e+37 }
 0x1b3   : > { %796 = vmatpush.bf16.msrb.mxu3 %v1293_v50 }
 0x1b6   : > { %v1352_v57 = vpop.eup %1351 }
 0x1b7   : > { %v1354_v59 = vpop.eup %1353  ;;  %v629_v61 = vmul.f32 %v1352_v57, %v582_v52  ;;  %vm634_vm5 = vweird.f32 %v1352_v57 }
 0x1b8   : > { %v614_v62 = vmul.f32 %v1354_v59, %v579_v53  ;;  %v1356_v2 = vpop.eup %1355  ;;  %vm619_vm6 = vweird.f32 %v1354_v59  ;;  %vm635_vm8 = vmor %vm633_vm7, %vm634_vm5 }
 0x1b9   : > { %v630_v63 = vsub.f32 1.0, %v629_v61  ;;  %vm620_vm10 = vmor %vm618_vm9, %vm619_vm6  ;;  %v685_v34 = vsel %vm563_vm1, %v1356_v2, 0.0 }
 0x1ba   : > { %v615_v3 = vsub.f32 1.0, %v614_v62  ;;  %v608_v5 = vpop.f32.mrf.mxu1  ;;  %v851_v40 = vpop.permute.xlu0 %850 }
 0x1bb   : > { %v631_v6 = vmul.f32 %v1352_v57, %v630_v63  ;;  %v856_v41 = vand.u32 %v851_v40, %v1545_v29 }
 0x1bc   : > { %v616_v9 = vmul.f32 %v1354_v59, %v615_v3 }
 0x1bd   : > { %v632_v11 = vadd.f32 %v1352_v57, %v631_v6  ;;  %865 = vmatpush.bf16.msrb.mxu2 %v856_v41  ;;  %v1299_v41 = vld [vmem:[%s1681_s3 + $0x30] sm:$0xff] }
 0x1be   : > { %v617_v13 = vadd.f32 %v1354_v59, %v616_v9 }
 0x1bf   : > { %v636_v17 = vsel %vm635_vm8, %v1352_v57, %v632_v11 }
 0x1c0   : > { %v621_v20 = vsel %vm620_vm10, %v1354_v59, %v617_v13  ;;  %v641_v22 = vsel %vm638_vm11, %v640_v19, %v636_v17 }
 0x1c1   : > { %v626_v24 = vsel %vm623_vm12, %v625_v21, %v621_v20 }
 0x1c2   : > { %v610_v18 = vpop.f32.mrf.mxu1  ;;  %v627_v25 = vmul.f32 %v626_v24, %v608_v5 }
 0x1c3   : > { %v642_v23 = vmul.f32 %v641_v22, %v610_v18 }
 0x1c5   : > { %v643_v27 = vpack.c.bf16 %v642_v23, %v627_v25 }
 0x1c7   : > { %v808_v10 = vpop.permute.xlu1 %807 }
 0x1e1   : > { %v678_v56 = vpop.xlane.xlu2 %677 }
 0x1e2   : > { %v680_v58 = vsub.f32 %v670_v44, %v678_v56 }
 0x1e4   : > { %v683_v60 = vmul.f32 1.442695, %v680_v58 }
 0x1e6   : > { %1357 = vpow2.f32 %v683_v60 }
 0x1e9   : > { %v810_v0 = vpop.permute.xlu2 %809 }
 0x1ea   : > { %v815_v1 = vsel %vm542_vm0, %v810_v0, 0 }
 0x1eb   : > { %824 = vmatpush.bf16.xpose.msrb.mxu0 %v815_v1 }
 0x1ec   : > { %v1358_v4 = vpop.eup %1357 }
 0x1ed   : > { %v691_v7 = vpack.c.bf16 %v1358_v4, %v1356_v2  ;;  %v688_v37 = vsel %vm567_vm2, %v1358_v4, 0.0 }
 0x1ef   : > { %1246 = vmatmul.msk.bf16.vlgmr.msra.gmra.mxu3 %vm563_vm1, %v691_v7 }
 0x1f0   : > { %955 = vmatpush.bf16.xpose.msra.mxu3 %v946_v8 }
 0x1f1   : > { %v939_v28 = vpop.permute.xlu2 %938 }
 0x1f2   : > { %1265 = vmatmul.msk.bf16.vlgmr.msrb.gmra.mxu0 %vm542_vm0, %v808_v10 }
 0x1ff   : > { %1264 = vmatmul.msk.bf16.vlgmr.msrb.gmra.mxu3 %vm542_vm0, %v643_v27 }
 0x20f   : > { %1276 = vmatmul.msk.bf16.vlgmr.msra.gmra.mxu3 %vm542_vm0, %v939_v28 }
 0x26f   : > { %v826_v30 = vpop.f32.mrf.mxu0 }
 0x270   : > { %v831_v31 = vsel %vm563_vm1, %v826_v30, -inf }
 0x271   : > { %832 = vmax.xlane.f32.xlu2 %v831_v31 }
 0x272   : > { %v1573_v32 = vpop.f32.mrf.mxu3 }
 0x277   : > { %v828_v33 = vpop.f32.mrf.mxu0 }
 0x278   : > { %v834_v35 = vsel %vm567_vm2, %v828_v33, -inf }
 0x279   : > { %686 = vadd.xlane.f32.xlu2 %v685_v34  ;;  %835 = vmax.xlane.f32.xlu1 %v834_v35  ;;  %v1298_v35 = vld [vmem:[%s1681_s3 + $0x28] sm:$0xff] }
 0x27a   : > { %v1577_v36 = vpop.f32.mrf.mxu3  ;;  %924 = vmatpush.bf16.msra.mxu1 %v1298_v35 }
 0x281   : > { %689 = vadd.xlane.f32.xlu1 %v688_v37 }
 0x282   : > { %v1580_v38 = vpop.f32.mrf.mxu3 }
 0x28a   : > { %v1582_v39 = vpop.f32.mrf.mxu3 }
 0x292   : > { %v1585_v42 = vpop.f32.mrf.mxu3 }
 0x293   : > { %v962_v43 = vsel %vm563_vm1, %v1585_v42, -inf }
 0x294   : > { %963 = vmax.xlane.f32.xlu0 %v962_v43 }
 0x29a   : > { %v1589_v44 = vpop.f32.mrf.mxu3 }
 0x29b   : > { %v965_v45 = vsel %vm567_vm2, %v1589_v44, -inf }
 0x29c   : > { %966 = vmax.xlane.f32.xlu0 %v965_v45 }
 0x2b0   : > { %981 = vrot.lane.b32.xlu0 %v1543_v26, %s1420_s21 }
 0x2e4   : > { %v833_v47 = vpop.xlane.xlu2 %832 }
 0x2e5   : > { %v837_v49 = vsub.f32 %v826_v30, %v833_v47 }
 0x2e7   : > { %v839_v50 = vmul.f32 1.442695, %v837_v49 }
 0x2e9   : > { %1359 = vpow2.f32 %v839_v50 }
 0x2ec   : > { %v687_v51 = vpop.xlane.xlu2 %686  ;;  %v836_v52 = vpop.xlane.xlu1 %835 }
 0x2ed   : > { %1361 = vrcp.f32 %v687_v51  ;;  %v838_v53 = vsub.f32 %v828_v33, %v836_v52  ;;  %v725_v2 = vand.u32 2147483648, %v687_v51  ;;  %vm719_vm14 = vweird.f32 %v687_v51 }
 0x2ee   : > { %v723_v3 = vand.u32 2147483647, %v687_v51 }
 0x2ef   : > { %v1360_v54 = vpop.eup %1359  ;;  %v841_v26 = vmul.f32 1.442695, %v838_v53  ;;  %v726_v9 = vor.u32 1.1754944e-38, %v725_v2 }
 0x2f0   : > { %v843_v55 = vsel %vm563_vm1, %v1360_v54, 0.0  ;;  %vm724_vm4 = vcmp.eq.f32.partialorder %v723_v3, 8.507059e+37 }
 0x2f1   : > { %844 = vadd.xlane.f32.xlu1 %v843_v55  ;;  %1363 = vpow2.f32 %v841_v26 }
 0x2f3   : > { %v1362_v56 = vpop.eup %1361 }
 0x2f4   : > { %v715_v57 = vmul.f32 %v1362_v56, %v687_v51  ;;  %v690_v58 = vpop.xlane.xlu1 %689  ;;  %vm720_vm13 = vweird.f32 %v1362_v56 }
 0x2f5   : > { %1365 = vrcp.f32 %v690_v58  ;;  %vm721_vm15 = vmor %vm719_vm14, %vm720_vm13  ;;  %v740_v5 = vand.u32 2147483648, %v690_v58  ;;  %v738_v8 = vand.u32 2147483647, %v690_v58  ;;  %vm734_vm5 = vweird.f32 %v690_v58 }
 0x2f6   : > { %v716_v59 = vsub.f32 1.0, %v715_v57 }
 0x2f7   : > { %v1364_v60 = vpop.eup %1363  ;;  %v741_v11 = vor.u32 1.1754944e-38, %v740_v5  ;;  %vm739_vm7 = vcmp.eq.f32.partialorder %v738_v8, 8.507059e+37 }
 0x2f8   : > { %v717_v61 = vmul.f32 %v1362_v56, %v716_v59  ;;  %v849_v62 = vpack.c.bf16 %v1364_v60, %v1360_v54 }
 0x2fa   : > { %1266 = vmatmul.msk.bf16.vlgmr.msrb.gmra.mxu2 %vm563_vm1, %v849_v62  ;;  %v718_v0 = vadd.f32 %v1362_v56, %v717_v61 }
 0x2fb   : > { %v1366_v63 = vpop.eup %1365 }
 0x2fc   : > { %v730_v1 = vmul.f32 %v1366_v63, %v690_v58  ;;  %v722_v6 = vsel %vm721_vm15, %v1362_v56, %v718_v0  ;;  %vm735_vm3 = vweird.f32 %v1366_v63 }
 0x2fd   : > { %vm736_vm6 = vmor %vm734_vm5, %vm735_vm3  ;;  %v727_v12 = vsel %vm724_vm4, %v726_v9, %v722_v6 }
 0x2fe   : > { %v731_v4 = vsub.f32 1.0, %v730_v1  ;;  %v728_v15 = vmul.f32 %v727_v12, %v1573_v32  ;;  %v846_v32 = vsel %vm567_vm2, %v1364_v60, 0.0 }
 0x300   : > { %v732_v7 = vmul.f32 %v1366_v63, %v731_v4 }
 0x302   : > { %v733_v10 = vadd.f32 %v1366_v63, %v732_v7 }
 0x304   : > { %v737_v13 = vsel %vm736_vm6, %v1366_v63, %v733_v10 }
 0x305   : > { %v742_v14 = vsel %vm739_vm7, %v741_v11, %v737_v13 }
 0x306   : > { %v743_v16 = vmul.f32 %v742_v14, %v1577_v36  ;;  %v1297_v36 = vld [vmem:[%s1681_s3 + $0x20] sm:$0xff] }
 0x307   : > { %v964_v17 = vpop.xlane.xlu0 %963  ;;  %925 = vmatpush.bf16.msra.mxu1 %v1297_v36  ;;  %v512_v36 = vld [vmem:[%s501_s19] sm:$0xff] }
 0x308   : > { %v968_v18 = vsub.f32 %v1585_v42, %v964_v17  ;;  %v744_v19 = vpack.c.bf16 %v743_v16, %v728_v15 }
 0x30a   : > { %v970_v20 = vmul.f32 1.442695, %v968_v18  ;;  %1255 = vmatmul.msk.bf16.vlgmr.msrb.gmra.mxu1 %vm542_vm0, %v744_v19 }
 0x30c   : > { %1367 = vpow2.f32 %v970_v20 }
 0x30f   : > { %v967_v21 = vpop.xlane.xlu0 %966 }
 0x310   : > { %v969_v22 = vsub.f32 %v1589_v44, %v967_v21 }
 0x312   : > { %v1368_v23 = vpop.eup %1367  ;;  %v972_v24 = vmul.f32 1.442695, %v969_v22 }
 0x313   : > { %v974_v25 = vsel %vm563_vm1, %v1368_v23, 0.0 }
 0x314   : > { %1369 = vpow2.f32 %v972_v24  ;;  %975 = vadd.xlane.f32.xlu0 %v974_v25 }
 0x31a   : > { %v1370_v27 = vpop.eup %1369 }
 0x31b   : > { %v977_v28 = vsel %vm567_vm2, %v1370_v27, 0.0  ;;  %v980_v33 = vpack.c.bf16 %v1370_v27, %v1368_v23 }
 0x31c   : > { %978 = vadd.xlane.f32.xlu2 %v977_v28 }
 0x322   : > { %v982_v30 = vpop.permute.xlu0 %981 }
 0x323   : > { %v987_v31 = vand.u32 %v982_v30, %v1545_v29  ;;  %v1300_v29 = vld [vmem:[%s1681_s3 + $0x38] sm:$0xff]  ;;  %v1346_v30 = vld [vmem:[%s1682_s4] ss:$0 sm:$0xff] }
 0x324   : > { %847 = vadd.xlane.f32.xlu2 %v846_v32  ;;  %1055 = vmatpush.bf16.msra.mxu2 %v1300_v29 }
 0x325   : > { %996 = vmatpush.bf16.msra.mxu0 %v987_v31  ;;  %v513_v31 = vld [vmem:[%s501_s19 + $0x8] sm:$0x1] }
 0x326   : > { %v519_v32 = vadd.f32 %v1346_v30, %v513_v31 }
 0x328   : > { %1277 = vmatmul.msk.bf16.vlgmr.msra.gmra.mxu0 %vm563_vm1, %v980_v33  ;;  %1056 = vmatpush.bf16.msra.mxu2 %v1299_v41  ;;  %521 = vst [vmem:[%s506_s8 + $0x8] sm:$0x1] %v519_v32 }
 0x364   : > { %v845_v34 = vpop.xlane.xlu1 %844 }
 0x365   : > { %1371 = vrcp.f32 %v845_v34  ;;  %v883_v53 = vand.u32 2147483648, %v845_v34  ;;  %vm877_vm2 = vweird.f32 %v845_v34  ;;  %v881_v56 = vand.u32 2147483647, %v845_v34 }
 0x367   : > { %v884_v60 = vor.u32 1.1754944e-38, %v883_v53  ;;  %vm882_vm9 = vcmp.eq.f32.partialorder %v881_v56, 8.507059e+37 }
 0x36b   : > { %v1372_v40 = vpop.eup %1371 }
 0x36c   : > { %v873_v43 = vmul.f32 %v1372_v40, %v845_v34  ;;  %vm878_vm1 = vweird.f32 %v1372_v40 }
 0x36d   : > { %vm879_vm8 = vmor %vm877_vm2, %vm878_vm1 }
 0x36e   : > { %v874_v44 = vsub.f32 1.0, %v873_v43 }
 0x370   : > { %v875_v48 = vmul.f32 %v1372_v40, %v874_v44 }
 0x372   : > { %v876_v51 = vadd.f32 %v1372_v40, %v875_v48  ;;  %v1066_v48 = vld [vmem:[%s506_s8 + $0x8] sm:$0x1] }
 0x374   : > { %v880_v58 = vsel %vm879_vm8, %v1372_v40, %v876_v51  ;;  %v518_v40 = vadd.f32 %v1346_v30, %v512_v36 }
 0x375   : > { %v885_v2 = vsel %vm882_vm9, %v884_v60, %v880_v58 }
 0x37d   : > { %v867_v54 = vpop.f32.mrf.mxu2 }
 0x37e   : > { %v886_v15 = vmul.f32 %v885_v2, %v867_v54 }
 0x385   : > { %v869_v11 = vpop.f32.mrf.mxu2 }
 0x387   : > { %v1622_v37 = vpop.xlane.xlu0 %975  ;;  %v769_v33 = vpop.f32.mrf.mxu1 }
 0x388   : > { %1373 = vrcp.f32 %v1622_v37  ;;  %vm1008_vm11 = vweird.f32 %v1622_v37  ;;  %v1014_v8 = vand.u32 2147483648, %v1622_v37  ;;  %v1012_v13 = vand.u32 2147483647, %v1622_v37 }
 0x389   : > { %v799_v29 = vadd.f32 %v1580_v38, %v769_v33 }
 0x38a   : > { %v1015_v20 = vor.u32 1.1754944e-38, %v1014_v8  ;;  %vm1013_vm7 = vcmp.eq.f32.partialorder %v1012_v13, 8.507059e+37 }
 0x38e   : > { %v1374_v45 = vpop.eup %1373 }
 0x38f   : > { %v1627_v42 = vpop.xlane.xlu2 %978  ;;  %v1004_v49 = vmul.f32 %v1374_v45, %v1622_v37  ;;  %vm1009_vm13 = vweird.f32 %v1374_v45  ;;  %v771_v34 = vpop.f32.mrf.mxu1 }
 0x390   : > { %1375 = vrcp.f32 %v1627_v42  ;;  %v1029_v10 = vand.u32 2147483648, %v1627_v42  ;;  %vm1010_vm4 = vmor %vm1008_vm11, %vm1009_vm13  ;;  %vm1023_vm5 = vweird.f32 %v1627_v42  ;;  %v1027_v14 = vand.u32 2147483647, %v1627_v42 }
 0x391   : > { %v1005_v26 = vsub.f32 1.0, %v1004_v49 }
 0x392   : > { %v1030_v21 = vor.u32 1.1754944e-38, %v1029_v10  ;;  %vm1028_vm1 = vcmp.eq.f32.partialorder %v1027_v14, 8.507059e+37 }
 0x393   : > { %v1006_v61 = vmul.f32 %v1374_v45, %v1005_v26 }
 0x395   : > { %v1007_v6 = vadd.f32 %v1374_v45, %v1006_v61 }
 0x396   : > { %v1631_v46 = vpop.eup %1375 }
 0x397   : > { %v848_v47 = vpop.xlane.xlu2 %847  ;;  %v1019_v50 = vmul.f32 %v1631_v46, %v1627_v42  ;;  %vm1024_vm15 = vweird.f32 %v1631_v46  ;;  %v1011_v17 = vsel %vm1010_vm4, %v1374_v45, %v1007_v6  ;;  %v801_v45 = vadd.f32 %v1582_v39, %v771_v34 }
 0x398   : > { %1377 = vrcp.f32 %v848_v47  ;;  %v898_v62 = vand.u32 2147483648, %v848_v47  ;;  %v896_v1 = vand.u32 2147483647, %v848_v47  ;;  %vm892_vm12 = vweird.f32 %v848_v47  ;;  %vm1025_vm6 = vmor %vm1023_vm5, %vm1024_vm15 }
 0x399   : > { %v1020_v55 = vsub.f32 1.0, %v1019_v50  ;;  %v1016_v22 = vsel %vm1013_vm7, %v1015_v20, %v1011_v17 }
 0x39a   : > { %v899_v5 = vor.u32 1.1754944e-38, %v898_v62  ;;  %vm897_vm3 = vcmp.eq.f32.partialorder %v896_v1, 8.507059e+37 }
 0x39b   : > { %v1021_v63 = vmul.f32 %v1631_v46, %v1020_v55 }
 0x39d   : > { %v1022_v7 = vadd.f32 %v1631_v46, %v1021_v63 }
 0x39e   : > { %v1378_v52 = vpop.eup %1377 }
 0x39f   : > { %v888_v57 = vmul.f32 %v1378_v52, %v848_v47  ;;  %vm893_vm10 = vweird.f32 %v1378_v52  ;;  %v1026_v18 = vsel %vm1025_vm6, %v1631_v46, %v1022_v7 }
 0x3a0   : > { %vm894_vm14 = vmor %vm892_vm12, %vm893_vm10  ;;  %v1031_v24 = vsel %vm1028_vm1, %v1030_v21, %v1026_v18 }
 0x3a1   : > { %v889_v59 = vsub.f32 1.0, %v888_v57 }
 0x3a3   : > { %v890_v0 = vmul.f32 %v1378_v52, %v889_v59 }
 0x3a5   : > { %v891_v3 = vadd.f32 %v1378_v52, %v890_v0  ;;  %v998_v4 = vpop.f32.mrf.mxu0 }
 0x3a6   : > { %v1017_v25 = vmul.f32 %v1016_v22, %v998_v4 }
 0x3a7   : > { %v895_v9 = vsel %vm894_vm14, %v1378_v52, %v891_v3 }
 0x3a8   : > { %v900_v12 = vsel %vm897_vm3, %v899_v5, %v895_v9 }
 0x3a9   : > { %v901_v16 = vmul.f32 %v900_v12, %v869_v11 }
 0x3ab   : > { %v902_v19 = vpack.c.bf16 %v901_v16, %v886_v15 }
 0x3ad   : > { %1275 = vmatmul.msk.bf16.vlgmr.msra.gmra.mxu1 %vm542_vm0, %v902_v19  ;;  %v1000_v23 = vpop.f32.mrf.mxu0 }
 0x3ae   : > { %v1032_v27 = vmul.f32 %v1031_v24, %v1000_v23 }
 0x3b0   : > { %v1033_v28 = vpack.c.bf16 %v1032_v27, %v1017_v25 }
 0x3b2   : > { %1286 = vmatmul.msk.bf16.vlgmr.msra.gmra.mxu2 %vm542_vm0, %v1033_v28 }
 0x42a   : > { %v927_v35 = vpop.f32.mrf.mxu1 }
 0x42b   : > { %v932_v37 = vadd.f32 %v927_v35, %v799_v29 }
 0x432   : > { %v929_v44 = vpop.f32.mrf.mxu1 }
 0x433   : > { %v933_v46 = vadd.f32 %v929_v44, %v801_v45 }
 0x435   : > { %v1058_v41 = vpop.f32.mrf.mxu2 }
 0x436   : > { %v1063_v42 = vadd.f32 %v1058_v41, %v932_v37 }
 0x438   : > { %v1067_v43 = vadd.f32 %v1063_v42, %v518_v40 }
 0x43a   : > { %1069 = vst [vmem:[%s506_s8] sm:$0xff] %v1067_v43 }
 0x43d   : > { %v1060_v47 = vpop.f32.mrf.mxu2 }
 0x43e   : > { %v1064_v49 = vadd.f32 %v1060_v47, %v933_v46 }
 0x440   : > { %v1068_v50 = vadd.f32 %v1066_v48, %v1064_v49 }
 0x442   : > { %1070 = vst [vmem:[%s506_s8 + $0x8] sm:$0x1] %v1068_v50 }
 0x443 PF: > { %s16_s25 = sadd.s32 1, %s1417_s25   ;;  %s1686_s21 = smov %s1405_s22 }
 0x444   : > { %p13_p10 = scmp.ge.s32.totalorder %s16_s25, 4   ;;  %s1687_s22 = smov %s1497_s30 }
 0x445   : > { %s1688_s23 = smov %s1413_s24  ;;  %s1689_s24 = smov %s1691_s26 }
 0x446   :  { %15 = sbr.rel (!%p13_p10) target bundleno = 3 (0x3), region = 228 }

// kernel: tfc_forward.13
= control target key start
LH: loop header
LB: loop body
LE: loop exit
PB: predicated region body
PF: predicated region fallthrough
CT: control target
= control target key end

     0   :  { %s1267_s18 = smov 0   ;;  %s1269_s19 = smov 0   ;;  %s1553_s0 = inlined_call_operand.vmem [shape: f32[18,128], index: 0, kind: input, shape index: {}]   ;;  %s1554_s1 = inlined_call_operand.vmem [shape: f32[1,128], index: 1, kind: input, shape index: {}]   ;;  %s1555_s2 = inlined_call_operand.vmem [shape: f32[1,128], index: 2, kind: input, shape index: {}]   ;;  %s1556_s3 = inlined_call_operand.vmem [shape: bf16[128,384], index: 3, kind: input, shape index: {}]   ;;  %s1557_s4 = inlined_call_operand.vmem [shape: f32[1,384], index: 4, kind: input, shape index: {}]   ;;  %s1558_s5 = inlined_call_operand.vmem [shape: bf16[18,384], index: 5, kind: output, shape index: {}]  }
   0x1   :  { %s1271_s20 = smov 0  }
   0x2 LB: > { %s1280_s21 = sadd.s32 4294967295, %s1170_s20   ;;  %s1282_s22 = sadd.s32 1, %s1170_s20   ;;  %s1170_s20 = sphi %s1271_s20, %s1562_s20   ;;  %s1166_s19 = sphi %s1269_s19, %s1561_s19   ;;  %s1162_s18 = sphi %s1267_s18, %s1560_s18  }
   0x3   : > { %s129_s23 = ssub.s32 %s1170_s20, %s1282_s22  ;;  %s132_s24 = sadd.s32 1, %s1166_s19 }
   0x4   : > { %p130_p0 = scmp.eq.s32.totalorder %s129_s23, 0  ;;  %p142_p1 = scmp.ne.s32.totalorder %s1166_s19, %s1162_s18 }
   0x5   : > { %p143_p2 = scmp.eq.s32.totalorder %s1280_s21, 1  ;;  %p782_p3 = scmp.ge.s32.totalorder %s1170_s20, 1 }
   0x6   : > { %s1290_s25 = scalar_select %p130_p0, %s1166_s19, %s132_s24  }
   0x7   : > { %p1292_p4 = por %p143_p2, %p142_p1  ;;  %p196_p5 = scmp.lt.s32.totalorder %s1170_s20, 3 }
   0x9   : > { %p197_p6 = pnand %p782_p3, %p196_p5 }
   0xa   : > { %s1297_s27 = sshll.u32 (!%p197_p6), %s1280_s21, 1  ;;  %s224_s24 = sand.u32 (!%p197_p6), 1, %s1162_s18  }
   0xb   : > { %200 = sbr.rel (%p197_p6) target bundleno = 509 (0x1fd), region = 40  ;;  %p232_p7 = scmp.lt.s32.totalorder (!%p197_p6), %s1297_s27, 2 }
  0x10   : > { %s233_s28 = scalar_select %p232_p7, %s1297_s27, 2  ;;  %v1236_v2 = vmov 128.0   ;;  %v871_v17 = vld [vmem:[%s1556_s3 + $0xa8] sm:$0xf]  ;;  %v919_v18 = vld [vmem:[%s1556_s3 + $0xb0] sm:$0xf0] }
  0x11   : > { %1078 = vrcp.f32 %v1236_v2  ;;  %v918_v19 = vld [vmem:[%s1556_s3 + $0xac] sm:$0xf]  ;;  %v872_v20 = vor.u32 %v919_v18, %v871_v17  ;;  %v873_v21 = vld [vmem:[%s1556_s3 + $0xb4] sm:$0xf0]  ;;  %v879_v22 = vld [vmem:[%s1556_s3 + $0xb0] sm:$0xf] }
  0x12   : > { %s784_s29 = sshll.u32 %s233_s28, 3  ;;  %v920_v23 = vld [vmem:[%s1556_s3 + $0xb8] sm:$0xf0]  ;;  %v876_v24 = vor.u32 %v918_v19, %v873_v21  ;;  %v859_v26 = vld [vmem:[%s1556_s3 + $0x90] sm:$0xf]  ;;  %s921_s28 = smul.u32 24, %s224_s24 }
  0x13   : > { %s235_s7 = scalar_lea.vmem %s1553_s0, %s784_s29  ;;  %v880_v25 = vor.u32 %v920_v23, %v879_v22  ;;  %477 = vmatpush.bf16.msra.mxu0 %v872_v20  ;;  %v916_v27 = vld [vmem:[%s1556_s3 + $0x98] sm:$0xf0]  ;;  %v915_v28 = vld [vmem:[%s1556_s3 + $0x94] sm:$0xf]  ;;  %v861_v30 = vld [vmem:[%s1556_s3 + $0x9c] sm:$0xf0] }
  0x14   : > { %v247_v0 = vld [vmem:[%s235_s7] sm:$0xff]  ;;  %v248_v1 = vld [vmem:[%s235_s7 + $0x8] sm:$0xff]  ;;  %491 = vmatpush.bf16.msra.mxu1 %v876_v24  ;;  %v860_v29 = vor.u32 %v916_v27, %v859_v26  ;;  %v867_v31 = vld [vmem:[%s1556_s3 + $0x98] sm:$0xf]  ;;  %v864_v33 = vor.u32 %v915_v28, %v861_v30  ;;  %s1474_s29 = scalar_lea.vmem [#allocation2], %s921_s28   ;;  %s535_s18 = ssub.s32 (%p1292_p4), 3, %s1297_s27 }
  0x15   : > { %249 = vadd.xlane.f32.xlu0 %v247_v0  ;;  %505 = vmatpush.bf16.msra.mxu2 %v880_v25  ;;  %v917_v32 = vld [vmem:[%s1556_s3 + $0xa0] sm:$0xf0]  ;;  %v847_v35 = vld [vmem:[%s1556_s3 + $0x78] sm:$0xf]  ;;  %v912_v37 = vld [vmem:[%s1556_s3 + $0x7c] sm:$0xf] }
  0x16   : > { %v868_v34 = vor.u32 %v917_v32, %v867_v31  ;;  %v913_v36 = vld [vmem:[%s1556_s3 + $0x80] sm:$0xf0]  ;;  %v849_v39 = vld [vmem:[%s1556_s3 + $0x84] sm:$0xf0]  ;;  %v855_v40 = vld [vmem:[%s1556_s3 + $0x80] sm:$0xf] }
  0x17   : > { %v1079_v3 = vpop.eup %1078  ;;  %478 = vmatpush.bf16.msra.mxu0 %v860_v29  ;;  %v848_v38 = vor.u32 %v913_v36, %v847_v35  ;;  %v914_v41 = vld [vmem:[%s1556_s3 + $0x88] sm:$0xf0]  ;;  %v852_v42 = vor.u32 %v912_v37, %v849_v39  ;;  %v835_v44 = vld [vmem:[%s1556_s3 + $0x60] sm:$0xf]  ;;  %v909_v46 = vld [vmem:[%s1556_s3 + $0x64] sm:$0xf] }
  0x18   : > { %v254_v4 = vmul.f32 128.0, %v1079_v3  ;;  %vm258_vm0 = vweird.f32 %v1079_v3  ;;  %492 = vmatpush.bf16.msra.mxu1 %v864_v33  ;;  %v856_v43 = vor.u32 %v914_v41, %v855_v40  ;;  %v910_v45 = vld [vmem:[%s1556_s3 + $0x68] sm:$0xf0]  ;;  %v837_v48 = vld [vmem:[%s1556_s3 + $0x6c] sm:$0xf0]  ;;  %s922_s30 = smul.u32 (%p1292_p4), 24, %s1280_s21 }
  0x19   : > { %506 = vmatpush.bf16.msra.mxu2 %v868_v34  ;;  %v836_v47 = vor.u32 %v910_v45, %v835_v44  ;;  %v843_v49 = vld [vmem:[%s1556_s3 + $0x68] sm:$0xf]  ;;  %v911_v50 = vld [vmem:[%s1556_s3 + $0x70] sm:$0xf0]  ;;  %v840_v51 = vor.u32 %v909_v46, %v837_v48  ;;  %v906_v55 = vld [vmem:[%s1556_s3 + $0x4c] sm:$0xf] }
  0x1a   : > { %v255_v5 = vsub.f32 1.0, %v254_v4  ;;  %v844_v52 = vor.u32 %v911_v50, %v843_v49  ;;  %v823_v53 = vld [vmem:[%s1556_s3 + $0x48] sm:$0xf]  ;;  %v907_v54 = vld [vmem:[%s1556_s3 + $0x50] sm:$0xf0]  ;;  %p536_p8 = scmp.lt.s32.totalorder (%p1292_p4), %s535_s18, 2  ;;  %s1487_s8 = scalar_lea.vmem (%p1292_p4), %s1558_s5, %s922_s30  }
  0x1b   : > { %479 = vmatpush.bf16.msra.mxu0 %v848_v38  ;;  %v824_v56 = vor.u32 %v907_v54, %v823_v53  ;;  %v825_v57 = vld [vmem:[%s1556_s3 + $0x54] sm:$0xf0]  ;;  %v831_v58 = vld [vmem:[%s1556_s3 + $0x50] sm:$0xf]  ;;  %v908_v59 = vld [vmem:[%s1556_s3 + $0x58] sm:$0xf0] }
  0x1c   : > { %v256_v6 = vmul.f32 %v1079_v3, %v255_v5  ;;  %493 = vmatpush.bf16.msra.mxu1 %v852_v42  ;;  %v828_v60 = vor.u32 %v906_v55, %v825_v57  ;;  %v832_v61 = vor.u32 %v908_v59, %v831_v58  ;;  %v811_v62 = vld [vmem:[%s1556_s3 + $0x30] sm:$0xf]  ;;  %v904_v63 = vld [vmem:[%s1556_s3 + $0x38] sm:$0xf0]  ;;  %v813_v2 = vld [vmem:[%s1556_s3 + $0x3c] sm:$0xf0] }
  0x1d   : > { %251 = vadd.xlane.f32.xlu0 %v248_v1  ;;  %507 = vmatpush.bf16.msra.mxu2 %v856_v43  ;;  %v905_v4 = vld [vmem:[%s1556_s3 + $0x40] sm:$0xf0]  ;;  %v787_v19 = vld [vmem:[%s1556_s3] sm:$0xf]  ;;  %v898_v20 = vld [vmem:[%s1556_s3 + $0x8] sm:$0xf0] }
  0x1e   : > { %v257_v7 = vadd.f32 %v1079_v3, %v256_v6  ;;  %v897_v21 = vld [vmem:[%s1556_s3 + $0x4] sm:$0xf]  ;;  %v788_v23 = vor.u32 %v898_v20, %v787_v19  ;;  %v789_v24 = vld [vmem:[%s1556_s3 + $0xc] sm:$0xf0]  ;;  %v795_v25 = vld [vmem:[%s1556_s3 + $0x8] sm:$0xf] }
  0x1f   : > { %480 = vmatpush.bf16.msra.mxu0 %v836_v47  ;;  %v899_v26 = vld [vmem:[%s1556_s3 + $0x10] sm:$0xf0]  ;;  %v792_v28 = vor.u32 %v897_v21, %v789_v24  ;;  %v1076_v46 = vld [vmem:[%s1554_s1] ss:$0 sm:$0xff] }
  0x20   : > { %v1304_v8 = vsel %vm258_vm0, %v1079_v3, %v257_v7  ;;  %494 = vmatpush.bf16.msra.mxu1 %v840_v51  ;;  %v819_v3 = vld [vmem:[%s1556_s3 + $0x38] sm:$0xf]  ;;  %v796_v29 = vor.u32 %v899_v26, %v795_v25  ;;  %v1077_v51 = vld [vmem:[%s1555_s2] ss:$0 sm:$0xff] }
  0x21   : > { %508 = vmatpush.bf16.msra.mxu2 %v844_v52  ;;  %v820_v6 = vor.u32 %v905_v4, %v819_v3  ;;  %v799_v7 = vld [vmem:[%s1556_s3 + $0x18] sm:$0xf]  ;;  %v341_v55 = vld [vmem:[%s1557_s4] sm:$0x7] }
  0x22   : > { %v344_v57 = vperm.slane %v341_v55, 1 }
  0x23   : > { %481 = vmatpush.bf16.msra.mxu0 %v824_v56  ;;  %v343_v56 = vperm.slane %v341_v55, 0 }
  0x24   : > { %495 = vmatpush.bf16.msra.mxu1 %v828_v60 }
  0x25   : > { %509 = vmatpush.bf16.msra.mxu2 %v832_v61 }
  0x29   : > { %510 = vmatpush.bf16.msra.mxu2 %v820_v6 }
  0x88   : > { %v250_v9 = vpop.xlane.xlu0 %249 }
  0x89   : > { %v260_v10 = vmul.f32 %v1304_v8, %v250_v9  ;;  %v901_v9 = vld [vmem:[%s1556_s3 + $0x20] sm:$0xf0] }
  0x8b   : > { %v1307_v11 = vsub.f32 %v247_v0, %v260_v10  ;;  %v903_v0 = vld [vmem:[%s1556_s3 + $0x34] sm:$0xf]  ;;  %v900_v10 = vld [vmem:[%s1556_s3 + $0x1c] sm:$0xf] }
  0x8c   : > { %v816_v5 = vor.u32 %v903_v0, %v813_v2 }
  0x8d   : > { %v264_v12 = vmul.f32 %v1307_v11, %v1307_v11 }
  0x8e   : > { %496 = vmatpush.bf16.msra.mxu1 %v816_v5 }
  0x8f   : > { %266 = vadd.xlane.f32.xlu1 %v264_v12  ;;  %v800_v12 = vor.u32 %v901_v9, %v799_v7 }
  0x90   : > { %v252_v13 = vpop.xlane.xlu0 %251 }
  0x91   : > { %v261_v14 = vmul.f32 %v1304_v8, %v252_v13  ;;  %v801_v13 = vld [vmem:[%s1556_s3 + $0x24] sm:$0xf0] }
  0x92   : > { %v804_v17 = vor.u32 %v900_v10, %v801_v13 }
  0x93   : > { %v1312_v15 = vsub.f32 %v248_v1, %v261_v14  ;;  %v812_v1 = vor.u32 %v904_v63, %v811_v62  ;;  %v807_v14 = vld [vmem:[%s1556_s3 + $0x20] sm:$0xf]  ;;  %v345_v62 = vperm.slane %v341_v55, 2 }
  0x94   : > { %497 = vmatpush.bf16.msra.mxu1 %v804_v17 }
  0x95   : > { %v265_v16 = vmul.f32 %v1312_v15, %v1312_v15  ;;  %482 = vmatpush.bf16.msra.mxu0 %v812_v1 }
  0x97   : > { %268 = vadd.xlane.f32.xlu1 %v265_v16  ;;  %v902_v16 = vld [vmem:[%s1556_s3 + $0x28] sm:$0xf0] }
  0x98   : > { %v808_v18 = vor.u32 %v902_v16, %v807_v14  ;;  %498 = vmatpush.bf16.msra.mxu1 %v792_v28 }
  0x99   : > { %483 = vmatpush.bf16.msra.mxu0 %v800_v12 }
  0x9a   : > { %511 = vmatpush.bf16.msra.mxu2 %v808_v18 }
  0x9d   : > { %484 = vmatpush.bf16.msra.mxu0 %v788_v23 }
  0x9e   : > { %512 = vmatpush.bf16.msra.mxu2 %v796_v29 }
 0x102   : > { %v267_v22 = vpop.xlane.xlu1 %266 }
 0x103   : > { %v270_v27 = vmul.f32 %v267_v22, %v1304_v8 }
 0x105   : > { %v272_v30 = vadd.f32 1e-05, %v270_v27 }
 0x107   : > { %1080 = vrsqrt.f32 %v272_v30  ;;  %vm280_vm2 = vweird.f32 %v272_v30 }
 0x10a   : > { %v269_v31 = vpop.xlane.xlu1 %268 }
 0x10b   : > { %v271_v32 = vmul.f32 %v269_v31, %v1304_v8 }
 0x10d   : > { %v1081_v33 = vpop.eup %1080  ;;  %v273_v34 = vadd.f32 1e-05, %v271_v32 }
 0x10e   : > { %v275_v35 = vmul.f32 %v1081_v33, %v272_v30  ;;  %vm281_vm1 = vweird.f32 %v1081_v33 }
 0x10f   : > { %1082 = vrsqrt.f32 %v273_v34  ;;  %vm282_vm3 = vmor %vm280_vm2, %vm281_vm1  ;;  %vm290_vm5 = vweird.f32 %v273_v34 }
 0x110   : > { %v276_v36 = vmul.f32 %v1081_v33, %v275_v35 }
 0x112   : > { %v277_v37 = vmul.f32 0.5, %v276_v36 }
 0x114   : > { %v278_v38 = vsub.f32 1.5, %v277_v37 }
 0x115   : > { %v1083_v39 = vpop.eup %1082 }
 0x116   : > { %v279_v40 = vmul.f32 %v1081_v33, %v278_v38  ;;  %v285_v41 = vmul.f32 %v1083_v39, %v273_v34  ;;  %vm291_vm4 = vweird.f32 %v1083_v39 }
 0x117   : > { %vm292_vm6 = vmor %vm290_vm5, %vm291_vm4 }
 0x118   : > { %v286_v42 = vmul.f32 %v1083_v39, %v285_v41  ;;  %v283_v43 = vsel %vm282_vm3, %v1081_v33, %v279_v40 }
 0x119   : > { %v294_v8 = vmul.f32 %v283_v43, %v1307_v11 }
 0x11a   : > { %v287_v44 = vmul.f32 0.5, %v286_v42 }
 0x11b   : > { %v300_v50 = vmul.f32 %v1076_v46, %v294_v8 }
 0x11c   : > { %v288_v45 = vsub.f32 1.5, %v287_v44 }
 0x11d   : > { %v306_v53 = vadd.f32 %v1077_v51, %v300_v50 }
 0x11e   : > { %v289_v47 = vmul.f32 %v1083_v39, %v288_v45 }
 0x120   : > { %v293_v48 = vsel %vm292_vm6, %v1083_v39, %v289_v47 }
 0x121   : > { %v295_v49 = vmul.f32 %v293_v48, %v1312_v15 }
 0x123   : > { %v301_v52 = vmul.f32 %v1076_v46, %v295_v49 }
 0x125   : > { %v307_v54 = vadd.f32 %v1077_v51, %v301_v52 }
 0x127   : > { %v308_v11 = vpack.c.bf16 %v307_v54, %v306_v53 }
 0x129   : > { %485 = vmatmul.bf16.vlgmr.msra.gmra.mxu0 %v308_v11  ;;  %499 = vmatmul.bf16.vlgmr.msra.gmra.mxu1 %v308_v11 }
 0x12a   : > { %513 = vmatmul.bf16.vlgmr.msra.gmra.mxu2 %v308_v11 }
 0x1a6   : > { %v486_v15 = vpop.f32.mrf.mxu0  ;;  %v500_v58 = vpop.f32.mrf.mxu1 }
 0x1a7   : > { %v487_v59 = vadd.f32 %v486_v15, %v343_v56  ;;  %v501_v60 = vadd.f32 %v500_v58, %v344_v57 }
 0x1a9   : > { %v519_v61 = vpack.c.bf16 %v501_v60, %v487_v59 }
 0x1ab   : > { %523 = vst [vmem:[%s1474_s29] sm:$0xff] %v519_v61 }
 0x1ad   : > { %v514_v63 = vpop.f32.mrf.mxu2 }
 0x1ae   : > { %v515_v0 = vadd.f32 %v514_v63, %v345_v62  ;;  %v488_v1 = vpop.f32.mrf.mxu0  ;;  %v502_v2 = vpop.f32.mrf.mxu1 }
 0x1af   : > { %v489_v3 = vadd.f32 %v488_v1, %v343_v56  ;;  %v503_v4 = vadd.f32 %v502_v2, %v344_v57 }
 0x1b0   : > { %v520_v5 = vpack.c.bf16 %v515_v0, %v515_v0 }
 0x1b1   : > { %v521_v6 = vpack.c.bf16 %v503_v4, %v489_v3 }
 0x1b2   : > { %524 = vst [vmem:[%s1474_s29 + $0x8] sm:$0xf] %v520_v5 }
 0x1b3   : > { %525 = vst [vmem:[%s1474_s29 + $0xc] sm:$0xff] %v521_v6 }
 0x1b5   : > { %v516_v7 = vpop.f32.mrf.mxu2 }
 0x1b6   : > { %v517_v9 = vadd.f32 %v516_v7, %v345_v62  ;;  %533 = sbr.rel (!%p1292_p4) target bundleno = 509 (0x1fd), region = 44 }
 0x1b8   : > { %v522_v10 = vpack.c.bf16 %v517_v9, %v517_v9 }
 0x1ba   : > { %526 = vst [vmem:[%s1474_s29 + $0x14] sm:$0xf] %v522_v10 }
 0x1bb   : > { %s1564_s18 = smov (!%p536_p8, %s535_s18), 2 }
 0x1bc   : > { %s883_s9 = smul.u32 12, %s1564_s18 }
 0x1be   : > { %p887_p9 = scmp.eq.s32.totalorder %s883_s9, 0 }
 0x1bf   : > { %s549_s26 = scalar_lea.vmem (!%p887_p9), %s1474_s29, 8 [#allocation2]   ;;  %s550_s10 = scalar_lea.vmem (!%p887_p9), %s1487_s8, 8  }
 0x1c0   : > { %546 = sbr.rel (%p887_p9) target bundleno = 509 (0x1fd), region = 48  ;;  %s1495_s11 = sshrl.u32 (!%p887_p9), %s1564_s18, 1 }
 0x1c1   : > { %p888_p10 = scmp.le.s32.totalorder (!%p887_p9), %s1495_s11, 0 }
 0x1c5   : > { %707 = sbr.rel (%p888_p10) target bundleno = 466 (0x1d2), region = 114  ;;  %s1172_s21 = smov (!%p888_p10), %s1487_s8  }
 0x1c6   : > { %s1176_s27 = smov (!%p888_p10), %s1474_s29   ;;  %s1180_s12 = smov (!%p888_p10), 0  }
 0x1c7   : > { %s1184_s13 = smov (!%p888_p10), 0  }
 0x1ca LB: >> { %v561_v12 = vld [vmem:[%s1178_s27] sm:$0xff]  ;;  %v563_v13 = vld [vmem:[%s1178_s27 + $0xc] sm:$0xff]  ;;  %s565_s14 = sadd.s32 1, %s1182_s12  ;;  %s555_s13 = sadd.s32 1, %s1186_s13   ;;  %s1186_s13 = sphi %s1184_s13, %s555_s13   ;;  %s1182_s12 = sphi %s1180_s12, %s1181_s12   ;;  %s1178_s27 = sphi %s1176_s27, %s570_s27   ;;  %s1174_s21 = sphi %s1172_s21, %s571_s21  }
 0x1cb   : >> { %562 = vst [vmem:[%s1174_s21] sm:$0xff] %v561_v12  ;;  %p566_p11 = scmp.ge.s32.totalorder %s565_s14, %s1495_s11  ;;  %p554_p12 = scmp.ge.s32.totalorder %s555_s13, %s1495_s11 }
 0x1cc   : >> { %564 = vst [vmem:[%s1174_s21 + $0xc] sm:$0xff] %v563_v13 }
 0x1cd   : >> { %s1566_s14 = smov (%p566_p11, %s565_s14), 0  ;;  %557 = sbr.rel (!%p554_p12) target bundleno = 458 (0x1ca), region = 120 }
 0x1ce   : >> { %s568_s15 = smul.u32 24, %s1566_s14  ;;  %s1181_s12 = smov %s1566_s14  }
 0x1d0   : >> { %s570_s27 = scalar_lea.vmem %s1474_s29, %s568_s15 [#allocation2]   ;;  %s571_s21 = scalar_lea.vmem %s1487_s8, %s568_s15  }
 0x1d2 PF: > { %s1507_s16 = sand.u32 1, %s1564_s18   ;;  %s890_s17 = smul.u32 24, %s1495_s11 }
 0x1d3   : > { %p892_p13 = scmp.le.s32.totalorder %s1507_s16, 0 }
 0x1d4   : > { %s1511_s20 = scalar_lea.vmem %s1474_s29, %s890_s17 [#allocation2]   ;;  %s1514_s23 = scalar_lea.vmem %s1487_s8, %s890_s17  }
 0x1d5   : > { %721 = sbr.rel (%p892_p13) target bundleno = 482 (0x1e2), region = 125  ;;  %s1188_s24 = smov (!%p892_p13), %s1514_s23  }
 0x1d6   : > { %s1192_s28 = smov (!%p892_p13), %s1511_s20   ;;  %s1196_s30 = smov (!%p892_p13), 0  }
 0x1d7   : > { %s1200_s6 = smov (!%p892_p13), 0  }
 0x1da LB: >> { %v588_v14 = vld [vmem:[%s1194_s28] sm:$0xff]  ;;  %s590_s18 = sadd.s32 1, %s1198_s30  ;;  %s582_s6 = sadd.s32 1, %s1202_s6   ;;  %s1202_s6 = sphi %s1200_s6, %s582_s6   ;;  %s1198_s30 = sphi %s1196_s30, %s1197_s30   ;;  %s1194_s28 = sphi %s1192_s28, %s595_s28   ;;  %s1190_s24 = sphi %s1188_s24, %s596_s24  }
 0x1db   : >> { %589 = vst [vmem:[%s1190_s24] sm:$0xff] %v588_v14  ;;  %p591_p0 = scmp.ge.s32.totalorder %s590_s18, %s1507_s16  ;;  %p581_p1 = scmp.ge.s32.totalorder %s582_s6, %s1507_s16 }
 0x1dd   : >> { %s1568_s18 = smov (%p591_p0, %s590_s18), 0  ;;  %584 = sbr.rel (!%p581_p1) target bundleno = 474 (0x1da), region = 131 }
 0x1de   : >> { %s593_s7 = smul.u32 12, %s1568_s18  ;;  %s1197_s30 = smov %s1568_s18  }
 0x1e0   : >> { %s595_s28 = scalar_lea.vmem %s1511_s20, %s593_s7 [#allocation2]   ;;  %s596_s24 = scalar_lea.vmem %s1514_s23, %s593_s7  }
 0x1e2 PF: > { %735 = sbr.rel (%p888_p10) target bundleno = 495 (0x1ef), region = 136  ;;  %s1204_s9 = smov (!%p888_p10), %s550_s10  }
 0x1e3   : > { %s1208_s21 = smov (!%p888_p10), %s549_s26   ;;  %s1212_s27 = smov (!%p888_p10), 0  }
 0x1e4   : > { %s1216_s12 = smov (!%p888_p10), 0  }
 0x1e7 LB: >> { %v609_v16 = vld [vmem:[%s1210_s21] sm:$0xf]  ;;  %v611_v17 = vld [vmem:[%s1210_s21 + $0xc] sm:$0xf]  ;;  %s613_s13 = sadd.s32 1, %s1214_s27  ;;  %s603_s12 = sadd.s32 1, %s1218_s12   ;;  %s1218_s12 = sphi %s1216_s12, %s603_s12   ;;  %s1214_s27 = sphi %s1212_s27, %s1213_s27   ;;  %s1210_s21 = sphi %s1208_s21, %s684_s21   ;;  %s1206_s9 = sphi %s1204_s9, %s687_s9  }
 0x1e8   : >> { %610 = vst [vmem:[%s1206_s9] sm:$0xf] %v609_v16  ;;  %p614_p2 = scmp.ge.s32.totalorder %s613_s13, %s1495_s11  ;;  %p602_p3 = scmp.ge.s32.totalorder %s603_s12, %s1495_s11 }
 0x1e9   : >> { %612 = vst [vmem:[%s1206_s9 + $0xc] sm:$0xf] %v611_v17 }
 0x1ea   : >> { %s1570_s13 = smov (%p614_p2, %s613_s13), 0  ;;  %605 = sbr.rel (!%p602_p3) target bundleno = 487 (0x1e7), region = 142 }
 0x1eb   : >> { %s682_s10 = smul.u32 24, %s1570_s13  ;;  %s1213_s27 = smov %s1570_s13  }
 0x1ed   : >> { %s683_s26 = scalar_lea.vmem %s1474_s29, %s682_s10 [#allocation2]  ;;  %s686_s14 = scalar_lea.vmem %s1487_s8, %s682_s10 }
 0x1ee   : >> { %s684_s21 = scalar_lea.vmem %s683_s26, 8 [#allocation2]   ;;  %s687_s9 = scalar_lea.vmem %s686_s14, 8  }
 0x1ef PF: > { %s690_s15 = scalar_lea.vmem %s1511_s20, 8 [#allocation2]   ;;  %s693_s17 = scalar_lea.vmem %s1514_s23, 8  }
 0x1f0   : > { %749 = sbr.rel (%p892_p13) target bundleno = 509 (0x1fd), region = 147  ;;  %s1220_s24 = smov (!%p892_p13), %s693_s17  }
 0x1f1   : > { %s1224_s28 = smov (!%p892_p13), %s690_s15   ;;  %s1228_s30 = smov (!%p892_p13), 0  }
 0x1f2   : > { %s1232_s6 = smov (!%p892_p13), 0  }
 0x1f5 LB: >> { %v636_v18 = vld [vmem:[%s1226_s28] sm:$0xf]  ;;  %s638_s29 = sadd.s32 1, %s1230_s30  ;;  %s630_s6 = sadd.s32 1, %s1234_s6   ;;  %s1234_s6 = sphi %s1232_s6, %s630_s6   ;;  %s1230_s30 = sphi %s1228_s30, %s1229_s30   ;;  %s1226_s28 = sphi %s1224_s28, %s696_s28   ;;  %s1222_s24 = sphi %s1220_s24, %s699_s24  }
 0x1f6   : >> { %637 = vst [vmem:[%s1222_s24] sm:$0xf] %v636_v18  ;;  %p639_p4 = scmp.ge.s32.totalorder %s638_s29, %s1507_s16  ;;  %p629_p5 = scmp.ge.s32.totalorder %s630_s6, %s1507_s16 }
 0x1f8   : >> { %s1572_s29 = smov (%p639_p4, %s638_s29), 0  ;;  %632 = sbr.rel (!%p629_p5) target bundleno = 501 (0x1f5), region = 153 }
 0x1f9   : >> { %s694_s8 = smul.u32 12, %s1572_s29  ;;  %s1229_s30 = smov %s1572_s29  }
 0x1fb   : >> { %s695_s11 = scalar_lea.vmem %s1511_s20, %s694_s8 [#allocation2]  ;;  %s698_s18 = scalar_lea.vmem %s1514_s23, %s694_s8 }
 0x1fc   : >> { %s696_s28 = scalar_lea.vmem %s695_s11, 8 [#allocation2]   ;;  %s699_s24 = scalar_lea.vmem %s698_s18, 8  }
 0x1fd PF: > { %p12_p6 = scmp.ge.s32.totalorder %s1282_s22, 4   ;;  %s1560_s18 = smov %s1166_s19 }
 0x1fe   : > { %s1561_s19 = smov %s1290_s25  ;;  %s1562_s20 = smov %s1282_s22 }
 0x1ff   :  { %14 = sbr.rel (!%p12_p6) target bundleno = 2 (0x2), region = 164 }

// kernel: tfc_forward.17
= control target key start
LH: loop header
LB: loop body
LE: loop exit
PB: predicated region body
PF: predicated region fallthrough
CT: control target
= control target key end

     0   :  { %vm22_vm0 = vcmask 1041408   ;;  %s310_s0 = inlined_call_operand.vmem [shape: f32[2,128], index: 0, kind: input, shape index: {}]   ;;  %s311_s1 = inlined_call_operand.vmem [shape: f32[1,128], index: 1, kind: input, shape index: {}]   ;;  %s312_s2 = inlined_call_operand.vmem [shape: f32[1,128], index: 2, kind: input, shape index: {}]   ;;  %s313_s3 = inlined_call_operand.vmem [shape: bf16[128,3], index: 3, kind: input, shape index: {}]   ;;  %s314_s4 = inlined_call_operand.vmem [shape: f32[1,3], index: 4, kind: input, shape index: {}]   ;;  %s315_s5 = inlined_call_operand.hbm [shape: f32[2,3], index: 5, kind: output, shape index: {}]  }
   0x1   :  { %v21_v0 = vld [vmem:[%s310_s0] sm:$0x3] }
   0x2   :  { %v23_v1 = vsel %vm22_vm0, %v21_v0, 0.0 }
   0x3   :  { %24 = vadd.xlane.f32.xlu0 %v23_v1 }
   0x4   :  { %10 = vsyncpa [#allocation3], 0  ;;  %v237_v2 = vmov 128.0   ;;  %v201_v3 = vld [vmem:[%s313_s3 + $0x38] sm:$0xff]  ;;  %v200_v15 = vld [vmem:[%s313_s3 + $0x30] sm:$0xff]  ;;  %s238_s15 = smov [#allocation2]  }
   0x5   :  { %207 = vrcp.f32 %v237_v2  ;;  %131 = vmatpush.bf16.msra.mxu0 %v201_v3  ;;  %v199_v16 = vld [vmem:[%s313_s3 + $0x28] sm:$0xff]  ;;  %v198_v17 = vld [vmem:[%s313_s3 + $0x20] sm:$0xff]  ;;  %v197_v18 = vld [vmem:[%s313_s3 + $0x18] sm:$0xff]  ;;  %s151_s16 = sshll.u32 %s238_s15, 4  ;;  %vm144_vm5 = vcmask 17408   ;;  %s152_s16 = int_to_ptr.vmem [resolvable:$true] %s151_s16 }
   0x6   :  { %v196_v19 = vld [vmem:[%s313_s3 + $0x10] sm:$0xff]  ;;  %v195_v20 = vld [vmem:[%s313_s3 + $0x8] sm:$0xff]  ;;  %v194_v21 = vld [vmem:[%s313_s3] sm:$0xff] }
   0x7   :  { %v204_v31 = vld [vmem:[%s311_s1] ss:$0 sm:$0xff]  ;;  %s153_s1 = sshll.u32 %s315_s5, 4  ;;  %s154_s1 = int_to_ptr.hbm [resolvable:$true] %s153_s1 }
   0x8   :  { %v205_v34 = vld [vmem:[%s312_s2] ss:$0 sm:$0xff] }
   0x9   :  { %132 = vmatpush.bf16.msra.mxu0 %v200_v15  ;;  %v206_v38 = vld [vmem:[%s314_s4] ss:$0 sm:$0xff] }
   0xb   :  { %v208_v4 = vpop.eup %207 }
   0xc   :  { %v27_v5 = vmul.f32 128.0, %v208_v4  ;;  %vm31_vm1 = vweird.f32 %v208_v4 }
   0xd   :  { %133 = vmatpush.bf16.msra.mxu0 %v199_v16 }
   0xe   :  { %v28_v6 = vsub.f32 1.0, %v27_v5 }
  0x10   :  { %v29_v7 = vmul.f32 %v208_v4, %v28_v6 }
  0x11   :  { %134 = vmatpush.bf16.msra.mxu0 %v198_v17 }
  0x12   :  { %v30_v8 = vadd.f32 %v208_v4, %v29_v7 }
  0x14   :  { %v32_v9 = vsel %vm31_vm1, %v208_v4, %v30_v8 }
  0x15   :  { %135 = vmatpush.bf16.msra.mxu0 %v197_v18 }
  0x19   :  { %136 = vmatpush.bf16.msra.mxu0 %v196_v19 }
  0x1d   :  { %137 = vmatpush.bf16.msra.mxu0 %v195_v20 }
  0x21   :  { %138 = vmatpush.bf16.msra.mxu0 %v194_v21 }
  0x76   :  { %v25_v10 = vpop.xlane.xlu0 %24 }
  0x77   :  { %v33_v11 = vmul.f32 %v32_v9, %v25_v10 }
  0x79   :  { %v34_v12 = vsub.f32 %v21_v0, %v33_v11 }
  0x7b   :  { %v35_v13 = vmul.f32 %v34_v12, %v34_v12 }
  0x7d   :  { %v36_v14 = vsel %vm22_vm0, %v35_v13, 0.0 }
  0x7e   :  { %37 = vadd.xlane.f32.xlu0 %v36_v14 }
  0xf1   :  { %v38_v22 = vpop.xlane.xlu0 %37 }
  0xf2   :  { %v39_v23 = vmul.f32 %v38_v22, %v32_v9 }
  0xf4   :  { %v40_v24 = vadd.f32 1e-05, %v39_v23 }
  0xf6   :  { %209 = vrsqrt.f32 %v40_v24  ;;  %vm47_vm3 = vweird.f32 %v40_v24 }
  0xfc   :  { %v210_v25 = vpop.eup %209 }
  0xfd   :  { %v42_v26 = vmul.f32 %v210_v25, %v40_v24  ;;  %vm48_vm2 = vweird.f32 %v210_v25 }
  0xfe   :  { %vm49_vm4 = vmor %vm47_vm3, %vm48_vm2 }
  0xff   :  { %v43_v27 = vmul.f32 %v210_v25, %v42_v26 }
 0x101   :  { %v44_v28 = vmul.f32 0.5, %v43_v27 }
 0x103   :  { %v45_v29 = vsub.f32 1.5, %v44_v28 }
 0x105   :  { %v46_v30 = vmul.f32 %v210_v25, %v45_v29 }
 0x107   :  { %v50_v32 = vsel %vm49_vm4, %v210_v25, %v46_v30 }
 0x108   :  { %v51_v33 = vmul.f32 %v50_v32, %v34_v12 }
 0x10a   :  { %v56_v35 = vmul.f32 %v204_v31, %v51_v33 }
 0x10c   :  { %v61_v36 = vadd.f32 %v205_v34, %v56_v35 }
 0x10e   :  { %v62_v37 = vpack.c.bf16 %v61_v36, %v61_v36 }
 0x110   :  { %139 = vmatmul.bf16.vlgmr.msra.gmra.mxu0 %v62_v37 }
 0x18d   :  { %v140_v39 = vpop.f32.mrf.mxu0 }
 0x18e   :  { %v141_v40 = vadd.f32 %v206_v38, %v140_v39 }
 0x190   :  { %145 = vst.msk [vmem:[#allocation2] sm:$0x3] %vm144_vm5, %v141_v40 }
 0x191   :  { %156 = dma.vmem_to_hbm [thread:$0]  %s152_s16, 32, %s154_s1, [#allocation3]  }
 0x195   :  { %v142_v41 = vpop.f32.mrf.mxu0 }
 0x196   :  { %235 = dma.done.wait [#allocation3], 32  }
 0x197   :  { %236 = vsyncadd [#allocation3], 4294967264 }
 0x198   :  { %161 = vsyncpa [#allocation3], 1 }

</bundles_post_ra>
